<compile_context>
chip_gen: v6e
topology: v6e:2x2x1
jax: 0.10.0
libtpu: 0.0.40
codegen_flags: <defaults>
</compile_context>

<pallas_src>
import functools

import jax
import jax.numpy as jnp
from jax.experimental import pallas as pl
from jax.experimental.pallas import tpu as pltpu

BN_EPS = 1e-5
TILE_N = 512                      # row tile (multiple of 8)
VMEM_LIMIT = 64 * 1024 * 1024


# ----------------------------- Pallas kernels ------------------------------ #

def _matmul_stats_kernel(p_ref, w_ref, y_ref, sum_ref, sq_ref):
    """Y = patches @ W (bf16 in, f32 accum), plus per-column sum / sum-of-squares
    accumulated across the row-tile grid axis (outputs revisited -> 'arbitrary')."""
    @pl.when(pl.program_id(0) == 0)
    def _():
        sum_ref[...] = jnp.zeros_like(sum_ref)
        sq_ref[...] = jnp.zeros_like(sq_ref)

    y = jnp.dot(p_ref[...], w_ref[...], preferred_element_type=jnp.float32)
    y_ref[...] = y
    sum_ref[...] += jnp.sum(y, axis=0, keepdims=True)
    sq_ref[...] += jnp.sum(y * y, axis=0, keepdims=True)


def _affine_relu_kernel(y_ref, scale_ref, shift_ref, o_ref):
    """o = relu(y * scale + shift) — fused BN-affine + ReLU (element-wise)."""
    y = y_ref[...] * scale_ref[...] + shift_ref[...]
    o_ref[...] = jnp.maximum(y, 0.0).astype(o_ref.dtype)


def _matmul_act_kernel(p_ref, w_ref, o_ref, *, act):
    """o = act(patches @ W) — fused matmul + activation (no BatchNorm)."""
    y = jnp.dot(p_ref[...], w_ref[...], preferred_element_type=jnp.float32)
    if act == "relu":
        o_ref[...] = jnp.maximum(y, 0.0).astype(o_ref.dtype)
    else:
        o_ref[...] = jnp.tanh(y).astype(o_ref.dtype)


def matmul_stats(patches, w, tile_n):
    n_pad, kdim = patches.shape
    cols = w.shape[1]
    return pl.pallas_call(
        _matmul_stats_kernel,
        out_shape=(jax.ShapeDtypeStruct((n_pad, cols), jnp.float32),
                   jax.ShapeDtypeStruct((1, cols), jnp.float32),
                   jax.ShapeDtypeStruct((1, cols), jnp.float32)),
        grid=(n_pad // tile_n,),
        in_specs=[pl.BlockSpec((tile_n, kdim), lambda i: (i, 0)),
                  pl.BlockSpec((kdim, cols), lambda i: (0, 0))],
        out_specs=(pl.BlockSpec((tile_n, cols), lambda i: (i, 0)),
                   pl.BlockSpec((1, cols), lambda i: (0, 0)),
                   pl.BlockSpec((1, cols), lambda i: (0, 0))),
        compiler_params=pltpu.CompilerParams(
            dimension_semantics=("arbitrary",),
            vmem_limit_bytes=VMEM_LIMIT),
    )(patches, w)


def affine_relu(y, scale, shift, out_dtype, tile_n):
    n_pad, cols = y.shape
    return pl.pallas_call(
        _affine_relu_kernel,
        out_shape=jax.ShapeDtypeStruct((n_pad, cols), out_dtype),
        grid=(n_pad // tile_n,),
        in_specs=[pl.BlockSpec((tile_n, cols), lambda i: (i, 0)),
                  pl.BlockSpec((1, cols), lambda i: (0, 0)),
                  pl.BlockSpec((1, cols), lambda i: (0, 0))],
        out_specs=pl.BlockSpec((tile_n, cols), lambda i: (i, 0)),
        compiler_params=pltpu.CompilerParams(
            dimension_semantics=("parallel",),
            vmem_limit_bytes=VMEM_LIMIT),
    )(y, scale, shift)


def matmul_act(patches, w, act, out_dtype, tile_n):
    n_pad, kdim = patches.shape
    cols = w.shape[1]
    return pl.pallas_call(
        functools.partial(_matmul_act_kernel, act=act),
        out_shape=jax.ShapeDtypeStruct((n_pad, cols), out_dtype),
        grid=(n_pad // tile_n,),
        in_specs=[pl.BlockSpec((tile_n, kdim), lambda i: (i, 0)),
                  pl.BlockSpec((kdim, cols), lambda i: (0, 0))],
        out_specs=pl.BlockSpec((tile_n, cols), lambda i: (i, 0)),
        compiler_params=pltpu.CompilerParams(
            dimension_semantics=("parallel",),
            vmem_limit_bytes=VMEM_LIMIT),
    )(patches, w)


# ------------------------------ JAX glue ----------------------------------- #

def _choose_tile(nrows):
    if nrows < TILE_N:
        t = ((nrows + 7) // 8) * 8
        return t, t
    return TILE_N, ((nrows + TILE_N - 1) // TILE_N) * TILE_N


def _pad_rows(p, n_pad):
    n = p.shape[0]
    return p if n == n_pad else jnp.pad(p, ((0, n_pad - n), (0, 0)))


def _bn_scale_shift(colsum, colsq, count, gamma, beta, groups, cout):
    """Combine per-column stats over the `groups` column blocks into per-channel
    BatchNorm (training-mode, biased-variance) scale/shift, broadcast back."""
    s = colsum.reshape(groups, cout).sum(axis=0)
    q = colsq.reshape(groups, cout).sum(axis=0)
    mean = s / count
    var = q / count - mean * mean
    scale_c = gamma.reshape(-1) * jax.lax.rsqrt(var + BN_EPS)
    shift_c = beta.reshape(-1) - mean * scale_c
    return (jnp.tile(scale_c, groups).reshape(1, groups * cout),
            jnp.tile(shift_c, groups).reshape(1, groups * cout))


def fused_matmul_bn_act(patches, wmat, groups, cout, gamma, beta, act, out_dtype):
    """Y = act(BN(patches @ wmat)); BN stats are over the full batch (rows*groups).
    Zero-padded rows contribute 0 to both sum and sum-of-squares, so using the
    true row count keeps the statistics exact."""
    nrows = patches.shape[0]
    tile_n, n_pad = _choose_tile(nrows)
    p = _pad_rows(patches, n_pad).astype(jnp.bfloat16)
    w = wmat.astype(jnp.bfloat16)
    if gamma is not None:
        y, colsum, colsq = matmul_stats(p, w, tile_n)
        scale, shift = _bn_scale_shift(colsum, colsq, nrows * groups,
                                       gamma, beta, groups, cout)
        out = affine_relu(y, scale, shift, out_dtype, tile_n)
    else:
        out = matmul_act(p, w, act, out_dtype, tile_n)
    return out[:nrows]


# Per output phase p (along one spatial axis) the non-zero taps of the
# K=4, S=2, P=1 transposed conv:  {3x3-neighborhood offset d : kernel index k},
# derived from  k = (2*m + p) + P - 2*ih  with  ih = m + d - 1.
_PHASE_TAPS = ({0: 3, 1: 1}, {1: 2, 2: 0})


def subpixel_patches(x):
    """x: (B, H, W, C) NHWC -> shared 3x3-neighborhood patches (B*H*W, 9*C)."""
    b, h, w, c = x.shape
    xp = jnp.pad(x, ((0, 0), (1, 1), (1, 1), (0, 0)))
    taps = [xp[:, da:da + h, db:db + w, :] for da in range(3) for db in range(3)]
    p = jnp.stack(taps, axis=3)                          # (B, H, W, 9, C)
    return p.reshape(b * h * w, 9 * c)
    # TODO(synk): fold this gather into the kernel (implicit GEMM over shifted
    # VMEM slices) to avoid materializing the 9x patch slab in HBM at all.


def subpixel_weight(wt):
    """ConvTranspose2d(4,2,1) weight (Cin, Cout, 4, 4) -> (9*Cin, 4*Cout);
    column group g corresponds to output phase (pi, pj) = (g // 2, g % 2)."""
    cin, cout = wt.shape[0], wt.shape[1]
    wbig = jnp.zeros((9, cin, 4, cout), wt.dtype)
    for pi in range(2):
        for pj in range(2):
            for da, kh in _PHASE_TAPS[pi].items():
                for db, kw in _PHASE_TAPS[pj].items():
                    wbig = wbig.at[da * 3 + db, :, pi * 2 + pj, :].set(wt[:, :, kh, kw])
    return wbig.reshape(9 * cin, 4 * cout)


def firstlayer_weight(wt):
    """ConvTranspose2d(4,1,0) on a 1x1 input: (nz, Cout, 4, 4) -> (nz, 16*Cout);
    column group g corresponds to output pixel (oh, ow) = (g // 4, g % 4)."""
    nz, cout = wt.shape[0], wt.shape[1]
    return jnp.transpose(wt, (0, 2, 3, 1)).reshape(nz, 16 * cout)


def generator_forward(params, idx):
    emb = jnp.take(params["emb"], idx, axis=0)           # (B, nz)  [XLA gather]
    b = emb.shape[0]

    # Layer 0: 1x1 -> 4x4 (stride 1, pad 0) == pure matmul, 16 pixel groups.
    wt0 = params["w"][0]
    c0 = wt0.shape[1]
    y = fused_matmul_bn_act(emb, firstlayer_weight(wt0), 16, c0,
                            params["gamma"][0], params["beta"][0], "relu",
                            jnp.bfloat16)
    x = y.reshape(b, 4, 4, c0)                            # NHWC, bf16

    # Layers 1..4: ConvTranspose2d(4, 2, 1) via sub-pixel phase decomposition.
    n_layers = len(params["w"])
    for li in range(1, n_layers):
        wt = params["w"][li]
        cout = wt.shape[1]
        h, w = x.shape[1], x.shape[2]
        last = li == n_layers - 1
        y = fused_matmul_bn_act(
            subpixel_patches(x), subpixel_weight(wt), 4, cout,
            None if last else params["gamma"][li],
            None if last else params["beta"][li],
            "tanh" if last else "relu",
            jnp.float32 if last else jnp.bfloat16)
        # depth-to-space: (B*H*W, 4*Cout) -> (B, 2H, 2W, Cout)
        x = (y.reshape(b, h, w, 2, 2, cout)
               .transpose(0, 1, 3, 2, 4, 5)
               .reshape(b, 2 * h, 2 * w, cout))
    return jnp.transpose(x, (0, 3, 1, 2))                 # NCHW to match PyTorch


# ------------------------- reference & parameters --------------------------- #

LAYER_CFG = [(4, 1, 0), (4, 2, 1), (4, 2, 1), (4, 2, 1), (4, 2, 1)]  # (K, S, P)


def reference_forward(params, idx):
    """Pure-JAX/XLA reference (lax conv) with identical BN-training semantics."""
    x = jnp.take(params["emb"], idx, axis=0)[:, :, None, None]
    for li, (k, s, p) in enumerate(LAYER_CFG):
        wt = params["w"][li]
        wc = jnp.transpose(wt[:, :, ::-1, ::-1], (1, 0, 2, 3))   # (Cout, Cin, K, K)
        y = jax.lax.conv_general_dilated(
            x, wc, window_strides=(1, 1),
            padding=[(k - 1 - p, k - 1 - p)] * 2,
            lhs_dilation=(s, s),
            dimension_numbers=("NCHW", "OIHW", "NCHW"))
        if li < len(LAYER_CFG) - 1:
            mean = jnp.mean(y, axis=(0, 2, 3), keepdims=True)
            var = jnp.mean(y * y, axis=(0, 2, 3), keepdims=True) - mean * mean
            g = params["gamma"][li].reshape(1, -1, 1, 1)
            bta = params["beta"][li].reshape(1, -1, 1, 1)
            y = jnp.maximum((y - mean) * jax.lax.rsqrt(var + BN_EPS) * g + bta, 0.0)
        else:
            y = jnp.tanh(y)
        x = y
    return x


def init_params(key, nz, ngf, nc, opt_class):
    chans = [nz, ngf * 8, ngf * 4, ngf * 2, ngf, nc]
    keys = jax.random.split(key, 1 + len(LAYER_CFG))
    params = {"emb": jax.random.normal(keys[0], (opt_class, nz), jnp.float32),
              "w": [], "gamma": [], "beta": []}
    for li, (k, _, _) in enumerate(LAYER_CFG):
        cin, cout = chans[li], chans[li + 1]
        params["w"].append(
            0.1 * jax.random.normal(keys[1 + li], (cin, cout, k, k), jnp.float32))
        params["gamma"].append(jnp.ones((cout,), jnp.float32))
        params["beta"].append(jnp.zeros((cout,), jnp.float32))
    return params


if __name__ == "__main__":
    nz, ngf, nc, opt_class, B = 8, 8, 3, 10, 2
    key = jax.random.PRNGKey(0)
    kp, ki = jax.random.split(key)
    params = init_params(kp, nz, ngf, nc, opt_class)
    idx = jax.random.randint(ki, (B,), 0, opt_class, dtype=jnp.int32)

    out = jax.block_until_ready(jax.jit(generator_forward)(params, idx))
    assert out.shape == (B, nc, 64, 64), out.shape
    assert bool(jnp.all(jnp.isfinite(out)))

    ref = jax.block_until_ready(jax.jit(reference_forward)(params, idx))
    max_err = float(jnp.max(jnp.abs(out - ref)))
    assert bool(jnp.allclose(out, ref, rtol=3e-2, atol=3e-2)), max_err

    print("KERNEL_OK")
</pallas_src>

<mosaic_0001>
module attributes {stable_mosaic.version = 11 : i64} {
  func.func @_matmul_stats_kernel(%arg0: i32, %arg1: memref<8x8xbf16, #tpu.memory_space<vmem>>, %arg2: memref<8x1024xbf16, #tpu.memory_space<vmem>>, %arg3: memref<8x1024xf32, #tpu.memory_space<vmem>>, %arg4: memref<1x1024xf32, #tpu.memory_space<vmem>>, %arg5: memref<1x1024xf32, #tpu.memory_space<vmem>>) attributes {dimension_semantics = [#tpu.dimension_semantics<arbitrary>], iteration_bounds = array<i64: 1>, scalar_prefetch = 0 : i64, scratch_operands = 0 : i64, tpu.core_type = #tpu.core_type<tc>, window_params = [{transform_indices = @transform_0, window_bounds = array<i64: 8, 8>}, {pipeline_mode = #tpu.pipeline_mode<synchronous>, transform_indices = @transform_1, window_bounds = array<i64: 8, 1024>}, {transform_indices = @transform_2, window_bounds = array<i64: 8, 1024>}, {pipeline_mode = #tpu.pipeline_mode<synchronous>, transform_indices = @transform_3, window_bounds = array<i64: 1, 1024>}, {pipeline_mode = #tpu.pipeline_mode<synchronous>, transform_indices = @transform_4, window_bounds = array<i64: 1, 1024>}]} {
    %c0_i32 = arith.constant 0 : i32
    %0 = arith.cmpi eq, %arg0, %c0_i32 : i32
    %1 = arith.extui %0 : i1 to i32
    %c0_i32_0 = arith.constant 0 : i32
    %2 = arith.cmpi ne, %1, %c0_i32_0 : i32
    scf.if %2 {
      %cst_16 = arith.constant 0.000000e+00 : f32
      %18 = vector.broadcast %cst_16 : f32 to vector<1x1024xf32>
      %c0_17 = arith.constant 0 : index
      %c0_18 = arith.constant 0 : index
      %19 = vector.load %arg4[%c0_17, %c0_18] : memref<1x1024xf32, #tpu.memory_space<vmem>>, vector<1x1024xf32>
      tpu.vector_store %arg4[%c0_17, %c0_18], %18 {strides = array<i32>} : memref<1x1024xf32, #tpu.memory_space<vmem>>, vector<1x1024xf32>,
      %cst_19 = arith.constant 0.000000e+00 : f32
      %20 = vector.broadcast %cst_19 : f32 to vector<1x1024xf32>
      %c0_20 = arith.constant 0 : index
      %c0_21 = arith.constant 0 : index
      %21 = vector.load %arg5[%c0_20, %c0_21] : memref<1x1024xf32, #tpu.memory_space<vmem>>, vector<1x1024xf32>
      tpu.vector_store %arg5[%c0_20, %c0_21], %20 {strides = array<i32>} : memref<1x1024xf32, #tpu.memory_space<vmem>>, vector<1x1024xf32>,
    } else {
    }
    %c0 = arith.constant 0 : index
    %c0_1 = arith.constant 0 : index
    %3 = vector.load %arg1[%c0, %c0_1] : memref<8x8xbf16, #tpu.memory_space<vmem>>, vector<8x8xbf16>
    %c0_2 = arith.constant 0 : index
    %c0_3 = arith.constant 0 : index
    %4 = vector.load %arg2[%c0_2, %c0_3] : memref<8x1024xbf16, #tpu.memory_space<vmem>>, vector<8x1024xbf16>
    %cst = arith.constant dense<0.000000e+00> : vector<8x1024xf32>
    %5 = tpu.matmul %3, %4, %cst {dimension_numbers = #tpu.dot_dimension_numbers<[1], [0], [0], [1], [0, 0, 1, 1], [], []>} : vector<8x8xbf16>, vector<8x1024xbf16>, vector<8x1024xf32> -> vector<8x1024xf32>
    %c0_4 = arith.constant 0 : index
    %c0_5 = arith.constant 0 : index
    %6 = vector.load %arg3[%c0_4, %c0_5] : memref<8x1024xf32, #tpu.memory_space<vmem>>, vector<8x1024xf32>
    tpu.vector_store %arg3[%c0_4, %c0_5], %5 {strides = array<i32>} : memref<8x1024xf32, #tpu.memory_space<vmem>>, vector<8x1024xf32>,
    %c0_6 = arith.constant 0 : index
    %c0_7 = arith.constant 0 : index
    %7 = vector.load %arg4[%c0_6, %c0_7] : memref<1x1024xf32, #tpu.memory_space<vmem>>, vector<1x1024xf32>
    %cst_8 = arith.constant dense<0.000000e+00> : vector<1024xf32>
    %8 = vector.multi_reduction <add>, %5, %cst_8 [0] : vector<8x1024xf32> to vector<1024xf32>
    %9 = vector.shape_cast %8 : vector<1024xf32> to vector<1x1024xf32>
    %10 = arith.addf %7, %9 : vector<1x1024xf32>
    %c0_9 = arith.constant 0 : index
    %c0_10 = arith.constant 0 : index
    %11 = vector.load %arg4[%c0_9, %c0_10] : memref<1x1024xf32, #tpu.memory_space<vmem>>, vector<1x1024xf32>
    tpu.vector_store %arg4[%c0_9, %c0_10], %10 {strides = array<i32>} : memref<1x1024xf32, #tpu.memory_space<vmem>>, vector<1x1024xf32>,
    %c0_11 = arith.constant 0 : index
    %c0_12 = arith.constant 0 : index
    %12 = vector.load %arg5[%c0_11, %c0_12] : memref<1x1024xf32, #tpu.memory_space<vmem>>, vector<1x1024xf32>
    %13 = arith.mulf %5, %5 : vector<8x1024xf32>
    %cst_13 = arith.constant dense<0.000000e+00> : vector<1024xf32>
    %14 = vector.multi_reduction <add>, %13, %cst_13 [0] : vector<8x1024xf32> to vector<1024xf32>
    %15 = vector.shape_cast %14 : vector<1024xf32> to vector<1x1024xf32>
    %16 = arith.addf %12, %15 : vector<1x1024xf32>
    %c0_14 = arith.constant 0 : index
    %c0_15 = arith.constant 0 : index
    %17 = vector.load %arg5[%c0_14, %c0_15] : memref<1x1024xf32, #tpu.memory_space<vmem>>, vector<1x1024xf32>
    tpu.vector_store %arg5[%c0_14, %c0_15], %16 {strides = array<i32>} : memref<1x1024xf32, #tpu.memory_space<vmem>>, vector<1x1024xf32>,
    return
  }
  func.func @transform_0(%arg0: i32) -> (i32, i32) {
    %c0_i32 = arith.constant 0 : i32
    %c0_i32_0 = arith.constant 0 : i32
    return %arg0, %c0_i32 : i32, i32
  }
  func.func @transform_1(%arg0: i32) -> (i32, i32) {
    %c0_i32 = arith.constant 0 : i32
    %c0_i32_0 = arith.constant 0 : i32
    %c0_i32_1 = arith.constant 0 : i32
    return %c0_i32, %c0_i32_0 : i32, i32
  }
  func.func @transform_2(%arg0: i32) -> (i32, i32) {
    %c0_i32 = arith.constant 0 : i32
    %c0_i32_0 = arith.constant 0 : i32
    return %arg0, %c0_i32 : i32, i32
  }
  func.func @transform_3(%arg0: i32) -> (i32, i32) {
    %c0_i32 = arith.constant 0 : i32
    %c0_i32_0 = arith.constant 0 : i32
    %c0_i32_1 = arith.constant 0 : i32
    return %c0_i32, %c0_i32_0 : i32, i32
  }
  func.func @transform_4(%arg0: i32) -> (i32, i32) {
    %c0_i32 = arith.constant 0 : i32
    %c0_i32_0 = arith.constant 0 : i32
    %c0_i32_1 = arith.constant 0 : i32
    return %c0_i32, %c0_i32_0 : i32, i32
  }
}

module attributes {stable_mosaic.version = 11 : i64} {
  func.func @_affine_relu_kernel(%arg0: i32, %arg1: memref<8x1024xf32, #tpu.memory_space<vmem>>, %arg2: memref<1x1024xf32, #tpu.memory_space<vmem>>, %arg3: memref<1x1024xf32, #tpu.memory_space<vmem>>, %arg4: memref<8x1024xbf16, #tpu.memory_space<vmem>>) attributes {dimension_semantics = [#tpu.dimension_semantics<parallel>], iteration_bounds = array<i64: 1>, scalar_prefetch = 0 : i64, scratch_operands = 0 : i64, tpu.core_type = #tpu.core_type<tc>, window_params = [{transform_indices = @transform_0, window_bounds = array<i64: 8, 1024>}, {pipeline_mode = #tpu.pipeline_mode<synchronous>, transform_indices = @transform_1, window_bounds = array<i64: 1, 1024>}, {pipeline_mode = #tpu.pipeline_mode<synchronous>, transform_indices = @transform_2, window_bounds = array<i64: 1, 1024>}, {transform_indices = @transform_3, window_bounds = array<i64: 8, 1024>}]} {
    %c0 = arith.constant 0 : index
    %c0_0 = arith.constant 0 : index
    %0 = vector.load %arg1[%c0, %c0_0] : memref<8x1024xf32, #tpu.memory_space<vmem>>, vector<8x1024xf32>
    %c0_1 = arith.constant 0 : index
    %c0_2 = arith.constant 0 : index
    %1 = vector.load %arg2[%c0_1, %c0_2] : memref<1x1024xf32, #tpu.memory_space<vmem>>, vector<1x1024xf32>
    %2 = vector.broadcast %1 : vector<1x1024xf32> to vector<8x1024xf32>
    %3 = arith.mulf %0, %2 : vector<8x1024xf32>
    %c0_3 = arith.constant 0 : index
    %c0_4 = arith.constant 0 : index
    %4 = vector.load %arg3[%c0_3, %c0_4] : memref<1x1024xf32, #tpu.memory_space<vmem>>, vector<1x1024xf32>
    %5 = vector.broadcast %4 : vector<1x1024xf32> to vector<8x1024xf32>
    %6 = arith.addf %3, %5 : vector<8x1024xf32>
    %cst = arith.constant 0.000000e+00 : f32
    %7 = vector.broadcast %cst : f32 to vector<8x1024xf32>
    %8 = arith.maximumf %6, %7 : vector<8x1024xf32>
    %9 = arith.truncf %8 : vector<8x1024xf32> to vector<8x1024xbf16>
    %c0_5 = arith.constant 0 : index
    %c0_6 = arith.constant 0 : index
    %10 = vector.load %arg4[%c0_5, %c0_6] : memref<8x1024xbf16, #tpu.memory_space<vmem>>, vector<8x1024xbf16>
    tpu.vector_store %arg4[%c0_5, %c0_6], %9 {strides = array<i32>} : memref<8x1024xbf16, #tpu.memory_space<vmem>>, vector<8x1024xbf16>,
    return
  }
  func.func @transform_0(%arg0: i32) -> (i32, i32) {
    %c0_i32 = arith.constant 0 : i32
    %c0_i32_0 = arith.constant 0 : i32
    return %arg0, %c0_i32 : i32, i32
  }
  func.func @transform_1(%arg0: i32) -> (i32, i32) {
    %c0_i32 = arith.constant 0 : i32
    %c0_i32_0 = arith.constant 0 : i32
    %c0_i32_1 = arith.constant 0 : i32
    return %c0_i32, %c0_i32_0 : i32, i32
  }
  func.func @transform_2(%arg0: i32) -> (i32, i32) {
    %c0_i32 = arith.constant 0 : i32
    %c0_i32_0 = arith.constant 0 : i32
    %c0_i32_1 = arith.constant 0 : i32
    return %c0_i32, %c0_i32_0 : i32, i32
  }
  func.func @transform_3(%arg0: i32) -> (i32, i32) {
    %c0_i32 = arith.constant 0 : i32
    %c0_i32_0 = arith.constant 0 : i32
    return %arg0, %c0_i32 : i32, i32
  }
}

module attributes {stable_mosaic.version = 11 : i64} {
  func.func @_matmul_stats_kernel(%arg0: i32, %arg1: memref<32x576xbf16, #tpu.memory_space<vmem>>, %arg2: memref<576x128xbf16, #tpu.memory_space<vmem>>, %arg3: memref<32x128xf32, #tpu.memory_space<vmem>>, %arg4: memref<1x128xf32, #tpu.memory_space<vmem>>, %arg5: memref<1x128xf32, #tpu.memory_space<vmem>>) attributes {dimension_semantics = [#tpu.dimension_semantics<arbitrary>], iteration_bounds = array<i64: 1>, scalar_prefetch = 0 : i64, scratch_operands = 0 : i64, tpu.core_type = #tpu.core_type<tc>, window_params = [{transform_indices = @transform_0, window_bounds = array<i64: 32, 576>}, {pipeline_mode = #tpu.pipeline_mode<synchronous>, transform_indices = @transform_1, window_bounds = array<i64: 576, 128>}, {transform_indices = @transform_2, window_bounds = array<i64: 32, 128>}, {pipeline_mode = #tpu.pipeline_mode<synchronous>, transform_indices = @transform_3, window_bounds = array<i64: 1, 128>}, {pipeline_mode = #tpu.pipeline_mode<synchronous>, transform_indices = @transform_4, window_bounds = array<i64: 1, 128>}]} {
    %c0_i32 = arith.constant 0 : i32
    %0 = arith.cmpi eq, %arg0, %c0_i32 : i32
    %1 = arith.extui %0 : i1 to i32
    %c0_i32_0 = arith.constant 0 : i32
    %2 = arith.cmpi ne, %1, %c0_i32_0 : i32
    scf.if %2 {
      %cst_16 = arith.constant 0.000000e+00 : f32
      %18 = vector.broadcast %cst_16 : f32 to vector<1x128xf32>
      %c0_17 = arith.constant 0 : index
      %c0_18 = arith.constant 0 : index
      %19 = vector.load %arg4[%c0_17, %c0_18] : memref<1x128xf32, #tpu.memory_space<vmem>>, vector<1x128xf32>
      tpu.vector_store %arg4[%c0_17, %c0_18], %18 {strides = array<i32>} : memref<1x128xf32, #tpu.memory_space<vmem>>, vector<1x128xf32>,
      %cst_19 = arith.constant 0.000000e+00 : f32
      %20 = vector.broadcast %cst_19 : f32 to vector<1x128xf32>
      %c0_20 = arith.constant 0 : index
      %c0_21 = arith.constant 0 : index
      %21 = vector.load %arg5[%c0_20, %c0_21] : memref<1x128xf32, #tpu.memory_space<vmem>>, vector<1x128xf32>
      tpu.vector_store %arg5[%c0_20, %c0_21], %20 {strides = array<i32>} : memref<1x128xf32, #tpu.memory_space<vmem>>, vector<1x128xf32>,
    } else {
    }
    %c0 = arith.constant 0 : index
    %c0_1 = arith.constant 0 : index
    %3 = vector.load %arg1[%c0, %c0_1] : memref<32x576xbf16, #tpu.memory_space<vmem>>, vector<32x576xbf16>
    %c0_2 = arith.constant 0 : index
    %c0_3 = arith.constant 0 : index
    %4 = vector.load %arg2[%c0_2, %c0_3] : memref<576x128xbf16, #tpu.memory_space<vmem>>, vector<576x128xbf16>
    %cst = arith.constant dense<0.000000e+00> : vector<32x128xf32>
    %5 = tpu.matmul %3, %4, %cst {dimension_numbers = #tpu.dot_dimension_numbers<[1], [0], [0], [1], [0, 0, 1, 1], [], []>} : vector<32x576xbf16>, vector<576x128xbf16>, vector<32x128xf32> -> vector<32x128xf32>
    %c0_4 = arith.constant 0 : index
    %c0_5 = arith.constant 0 : index
    %6 = vector.load %arg3[%c0_4, %c0_5] : memref<32x128xf32, #tpu.memory_space<vmem>>, vector<32x128xf32>
    tpu.vector_store %arg3[%c0_4, %c0_5], %5 {strides = array<i32>} : memref<32x128xf32, #tpu.memory_space<vmem>>, vector<32x128xf32>,
    %c0_6 = arith.constant 0 : index
    %c0_7 = arith.constant 0 : index
    %7 = vector.load %arg4[%c0_6, %c0_7] : memref<1x128xf32, #tpu.memory_space<vmem>>, vector<1x128xf32>
    %cst_8 = arith.constant dense<0.000000e+00> : vector<128xf32>
    %8 = vector.multi_reduction <add>, %5, %cst_8 [0] : vector<32x128xf32> to vector<128xf32>
    %9 = vector.shape_cast %8 : vector<128xf32> to vector<1x128xf32>
    %10 = arith.addf %7, %9 : vector<1x128xf32>
    %c0_9 = arith.constant 0 : index
    %c0_10 = arith.constant 0 : index
    %11 = vector.load %arg4[%c0_9, %c0_10] : memref<1x128xf32, #tpu.memory_space<vmem>>, vector<1x128xf32>
    tpu.vector_store %arg4[%c0_9, %c0_10], %10 {strides = array<i32>} : memref<1x128xf32, #tpu.memory_space<vmem>>, vector<1x128xf32>,
    %c0_11 = arith.constant 0 : index
    %c0_12 = arith.constant 0 : index
    %12 = vector.load %arg5[%c0_11, %c0_12] : memref<1x128xf32, #tpu.memory_space<vmem>>, vector<1x128xf32>
    %13 = arith.mulf %5, %5 : vector<32x128xf32>
    %cst_13 = arith.constant dense<0.000000e+00> : vector<128xf32>
    %14 = vector.multi_reduction <add>, %13, %cst_13 [0] : vector<32x128xf32> to vector<128xf32>
    %15 = vector.shape_cast %14 : vector<128xf32> to vector<1x128xf32>
    %16 = arith.addf %12, %15 : vector<1x128xf32>
    %c0_14 = arith.constant 0 : index
    %c0_15 = arith.constant 0 : index
    %17 = vector.load %arg5[%c0_14, %c0_15] : memref<1x128xf32, #tpu.memory_space<vmem>>, vector<1x128xf32>
    tpu.vector_store %arg5[%c0_14, %c0_15], %16 {strides = array<i32>} : memref<1x128xf32, #tpu.memory_space<vmem>>, vector<1x128xf32>,
    return
  }
  func.func @transform_0(%arg0: i32) -> (i32, i32) {
    %c0_i32 = arith.constant 0 : i32
    %c0_i32_0 = arith.constant 0 : i32
    return %arg0, %c0_i32 : i32, i32
  }
  func.func @transform_1(%arg0: i32) -> (i32, i32) {
    %c0_i32 = arith.constant 0 : i32
    %c0_i32_0 = arith.constant 0 : i32
    %c0_i32_1 = arith.constant 0 : i32
    return %c0_i32, %c0_i32_0 : i32, i32
  }
  func.func @transform_2(%arg0: i32) -> (i32, i32) {
    %c0_i32 = arith.constant 0 : i32
    %c0_i32_0 = arith.constant 0 : i32
    return %arg0, %c0_i32 : i32, i32
  }
  func.func @transform_3(%arg0: i32) -> (i32, i32) {
    %c0_i32 = arith.constant 0 : i32
    %c0_i32_0 = arith.constant 0 : i32
    %c0_i32_1 = arith.constant 0 : i32
    return %c0_i32, %c0_i32_0 : i32, i32
  }
  func.func @transform_4(%arg0: i32) -> (i32, i32) {
    %c0_i32 = arith.constant 0 : i32
    %c0_i32_0 = arith.constant 0 : i32
    %c0_i32_1 = arith.constant 0 : i32
    return %c0_i32, %c0_i32_0 : i32, i32
  }
}

module attributes {stable_mosaic.version = 11 : i64} {
  func.func @_affine_relu_kernel(%arg0: i32, %arg1: memref<32x128xf32, #tpu.memory_space<vmem>>, %arg2: memref<1x128xf32, #tpu.memory_space<vmem>>, %arg3: memref<1x128xf32, #tpu.memory_space<vmem>>, %arg4: memref<32x128xbf16, #tpu.memory_space<vmem>>) attributes {dimension_semantics = [#tpu.dimension_semantics<parallel>], iteration_bounds = array<i64: 1>, scalar_prefetch = 0 : i64, scratch_operands = 0 : i64, tpu.core_type = #tpu.core_type<tc>, window_params = [{transform_indices = @transform_0, window_bounds = array<i64: 32, 128>}, {pipeline_mode = #tpu.pipeline_mode<synchronous>, transform_indices = @transform_1, window_bounds = array<i64: 1, 128>}, {pipeline_mode = #tpu.pipeline_mode<synchronous>, transform_indices = @transform_2, window_bounds = array<i64: 1, 128>}, {transform_indices = @transform_3, window_bounds = array<i64: 32, 128>}]} {
    %c0 = arith.constant 0 : index
    %c0_0 = arith.constant 0 : index
    %0 = vector.load %arg1[%c0, %c0_0] : memref<32x128xf32, #tpu.memory_space<vmem>>, vector<32x128xf32>
    %c0_1 = arith.constant 0 : index
    %c0_2 = arith.constant 0 : index
    %1 = vector.load %arg2[%c0_1, %c0_2] : memref<1x128xf32, #tpu.memory_space<vmem>>, vector<1x128xf32>
    %2 = vector.broadcast %1 : vector<1x128xf32> to vector<32x128xf32>
    %3 = arith.mulf %0, %2 : vector<32x128xf32>
    %c0_3 = arith.constant 0 : index
    %c0_4 = arith.constant 0 : index
    %4 = vector.load %arg3[%c0_3, %c0_4] : memref<1x128xf32, #tpu.memory_space<vmem>>, vector<1x128xf32>
    %5 = vector.broadcast %4 : vector<1x128xf32> to vector<32x128xf32>
    %6 = arith.addf %3, %5 : vector<32x128xf32>
    %cst = arith.constant 0.000000e+00 : f32
    %7 = vector.broadcast %cst : f32 to vector<32x128xf32>
    %8 = arith.maximumf %6, %7 : vector<32x128xf32>
    %9 = arith.truncf %8 : vector<32x128xf32> to vector<32x128xbf16>
    %c0_5 = arith.constant 0 : index
    %c0_6 = arith.constant 0 : index
    %10 = vector.load %arg4[%c0_5, %c0_6] : memref<32x128xbf16, #tpu.memory_space<vmem>>, vector<32x128xbf16>
    tpu.vector_store %arg4[%c0_5, %c0_6], %9 {strides = array<i32>} : memref<32x128xbf16, #tpu.memory_space<vmem>>, vector<32x128xbf16>,
    return
  }
  func.func @transform_0(%arg0: i32) -> (i32, i32) {
    %c0_i32 = arith.constant 0 : i32
    %c0_i32_0 = arith.constant 0 : i32
    return %arg0, %c0_i32 : i32, i32
  }
  func.func @transform_1(%arg0: i32) -> (i32, i32) {
    %c0_i32 = arith.constant 0 : i32
    %c0_i32_0 = arith.constant 0 : i32
    %c0_i32_1 = arith.constant 0 : i32
    return %c0_i32, %c0_i32_0 : i32, i32
  }
  func.func @transform_2(%arg0: i32) -> (i32, i32) {
    %c0_i32 = arith.constant 0 : i32
    %c0_i32_0 = arith.constant 0 : i32
    %c0_i32_1 = arith.constant 0 : i32
    return %c0_i32, %c0_i32_0 : i32, i32
  }
  func.func @transform_3(%arg0: i32) -> (i32, i32) {
    %c0_i32 = arith.constant 0 : i32
    %c0_i32_0 = arith.constant 0 : i32
    return %arg0, %c0_i32 : i32, i32
  }
}

module attributes {stable_mosaic.version = 11 : i64} {
  func.func @_matmul_stats_kernel(%arg0: i32, %arg1: memref<128x288xbf16, #tpu.memory_space<vmem>>, %arg2: memref<288x64xbf16, #tpu.memory_space<vmem>>, %arg3: memref<128x64xf32, #tpu.memory_space<vmem>>, %arg4: memref<1x64xf32, #tpu.memory_space<vmem>>, %arg5: memref<1x64xf32, #tpu.memory_space<vmem>>) attributes {dimension_semantics = [#tpu.dimension_semantics<arbitrary>], iteration_bounds = array<i64: 1>, scalar_prefetch = 0 : i64, scratch_operands = 0 : i64, tpu.core_type = #tpu.core_type<tc>, window_params = [{transform_indices = @transform_0, window_bounds = array<i64: 128, 288>}, {pipeline_mode = #tpu.pipeline_mode<synchronous>, transform_indices = @transform_1, window_bounds = array<i64: 288, 64>}, {transform_indices = @transform_2, window_bounds = array<i64: 128, 64>}, {pipeline_mode = #tpu.pipeline_mode<synchronous>, transform_indices = @transform_3, window_bounds = array<i64: 1, 64>}, {pipeline_mode = #tpu.pipeline_mode<synchronous>, transform_indices = @transform_4, window_bounds = array<i64: 1, 64>}]} {
    %c0_i32 = arith.constant 0 : i32
    %0 = arith.cmpi eq, %arg0, %c0_i32 : i32
    %1 = arith.extui %0 : i1 to i32
    %c0_i32_0 = arith.constant 0 : i32
    %2 = arith.cmpi ne, %1, %c0_i32_0 : i32
    scf.if %2 {
      %cst_16 = arith.constant 0.000000e+00 : f32
      %18 = vector.broadcast %cst_16 : f32 to vector<1x64xf32>
      %c0_17 = arith.constant 0 : index
      %c0_18 = arith.constant 0 : index
      %19 = vector.load %arg4[%c0_17, %c0_18] : memref<1x64xf32, #tpu.memory_space<vmem>>, vector<1x64xf32>
      tpu.vector_store %arg4[%c0_17, %c0_18], %18 {strides = array<i32>} : memref<1x64xf32, #tpu.memory_space<vmem>>, vector<1x64xf32>,
      %cst_19 = arith.constant 0.000000e+00 : f32
      %20 = vector.broadcast %cst_19 : f32 to vector<1x64xf32>
      %c0_20 = arith.constant 0 : index
      %c0_21 = arith.constant 0 : index
      %21 = vector.load %arg5[%c0_20, %c0_21] : memref<1x64xf32, #tpu.memory_space<vmem>>, vector<1x64xf32>
      tpu.vector_store %arg5[%c0_20, %c0_21], %20 {strides = array<i32>} : memref<1x64xf32, #tpu.memory_space<vmem>>, vector<1x64xf32>,
    } else {
    }
    %c0 = arith.constant 0 : index
    %c0_1 = arith.constant 0 : index
    %3 = vector.load %arg1[%c0, %c0_1] : memref<128x288xbf16, #tpu.memory_space<vmem>>, vector<128x288xbf16>
    %c0_2 = arith.constant 0 : index
    %c0_3 = arith.constant 0 : index
    %4 = vector.load %arg2[%c0_2, %c0_3] : memref<288x64xbf16, #tpu.memory_space<vmem>>, vector<288x64xbf16>
    %cst = arith.constant dense<0.000000e+00> : vector<128x64xf32>
    %5 = tpu.matmul %3, %4, %cst {dimension_numbers = #tpu.dot_dimension_numbers<[1], [0], [0], [1], [0, 0, 1, 1], [], []>} : vector<128x288xbf16>, vector<288x64xbf16>, vector<128x64xf32> -> vector<128x64xf32>
    %c0_4 = arith.constant 0 : index
    %c0_5 = arith.constant 0 : index
    %6 = vector.load %arg3[%c0_4, %c0_5] : memref<128x64xf32, #tpu.memory_space<vmem>>, vector<128x64xf32>
    tpu.vector_store %arg3[%c0_4, %c0_5], %5 {strides = array<i32>} : memref<128x64xf32, #tpu.memory_space<vmem>>, vector<128x64xf32>,
    %c0_6 = arith.constant 0 : index
    %c0_7 = arith.constant 0 : index
    %7 = vector.load %arg4[%c0_6, %c0_7] : memref<1x64xf32, #tpu.memory_space<vmem>>, vector<1x64xf32>
    %cst_8 = arith.constant dense<0.000000e+00> : vector<64xf32>
    %8 = vector.multi_reduction <add>, %5, %cst_8 [0] : vector<128x64xf32> to vector<64xf32>
    %9 = vector.shape_cast %8 : vector<64xf32> to vector<1x64xf32>
    %10 = arith.addf %7, %9 : vector<1x64xf32>
    %c0_9 = arith.constant 0 : index
    %c0_10 = arith.constant 0 : index
    %11 = vector.load %arg4[%c0_9, %c0_10] : memref<1x64xf32, #tpu.memory_space<vmem>>, vector<1x64xf32>
    tpu.vector_store %arg4[%c0_9, %c0_10], %10 {strides = array<i32>} : memref<1x64xf32, #tpu.memory_space<vmem>>, vector<1x64xf32>,
    %c0_11 = arith.constant 0 : index
    %c0_12 = arith.constant 0 : index
    %12 = vector.load %arg5[%c0_11, %c0_12] : memref<1x64xf32, #tpu.memory_space<vmem>>, vector<1x64xf32>
    %13 = arith.mulf %5, %5 : vector<128x64xf32>
    %cst_13 = arith.constant dense<0.000000e+00> : vector<64xf32>
    %14 = vector.multi_reduction <add>, %13, %cst_13 [0] : vector<128x64xf32> to vector<64xf32>
    %15 = vector.shape_cast %14 : vector<64xf32> to vector<1x64xf32>
    %16 = arith.addf %12, %15 : vector<1x64xf32>
    %c0_14 = arith.constant 0 : index
    %c0_15 = arith.constant 0 : index
    %17 = vector.load %arg5[%c0_14, %c0_15] : memref<1x64xf32, #tpu.memory_space<vmem>>, vector<1x64xf32>
    tpu.vector_store %arg5[%c0_14, %c0_15], %16 {strides = array<i32>} : memref<1x64xf32, #tpu.memory_space<vmem>>, vector<1x64xf32>,
    return
  }
  func.func @transform_0(%arg0: i32) -> (i32, i32) {
    %c0_i32 = arith.constant 0 : i32
    %c0_i32_0 = arith.constant 0 : i32
    return %arg0, %c0_i32 : i32, i32
  }
  func.func @transform_1(%arg0: i32) -> (i32, i32) {
    %c0_i32 = arith.constant 0 : i32
    %c0_i32_0 = arith.constant 0 : i32
    %c0_i32_1 = arith.constant 0 : i32
    return %c0_i32, %c0_i32_0 : i32, i32
  }
  func.func @transform_2(%arg0: i32) -> (i32, i32) {
    %c0_i32 = arith.constant 0 : i32
    %c0_i32_0 = arith.constant 0 : i32
    return %arg0, %c0_i32 : i32, i32
  }
  func.func @transform_3(%arg0: i32) -> (i32, i32) {
    %c0_i32 = arith.constant 0 : i32
    %c0_i32_0 = arith.constant 0 : i32
    %c0_i32_1 = arith.constant 0 : i32
    return %c0_i32, %c0_i32_0 : i32, i32
  }
  func.func @transform_4(%arg0: i32) -> (i32, i32) {
    %c0_i32 = arith.constant 0 : i32
    %c0_i32_0 = arith.constant 0 : i32
    %c0_i32_1 = arith.constant 0 : i32
    return %c0_i32, %c0_i32_0 : i32, i32
  }
}

module attributes {stable_mosaic.version = 11 : i64} {
  func.func @_affine_relu_kernel(%arg0: i32, %arg1: memref<128x64xf32, #tpu.memory_space<vmem>>, %arg2: memref<1x64xf32, #tpu.memory_space<vmem>>, %arg3: memref<1x64xf32, #tpu.memory_space<vmem>>, %arg4: memref<128x64xbf16, #tpu.memory_space<vmem>>) attributes {dimension_semantics = [#tpu.dimension_semantics<parallel>], iteration_bounds = array<i64: 1>, scalar_prefetch = 0 : i64, scratch_operands = 0 : i64, tpu.core_type = #tpu.core_type<tc>, window_params = [{transform_indices = @transform_0, window_bounds = array<i64: 128, 64>}, {pipeline_mode = #tpu.pipeline_mode<synchronous>, transform_indices = @transform_1, window_bounds = array<i64: 1, 64>}, {pipeline_mode = #tpu.pipeline_mode<synchronous>, transform_indices = @transform_2, window_bounds = array<i64: 1, 64>}, {transform_indices = @transform_3, window_bounds = array<i64: 128, 64>}]} {
    %c0 = arith.constant 0 : index
    %c0_0 = arith.constant 0 : index
    %0 = vector.load %arg1[%c0, %c0_0] : memref<128x64xf32, #tpu.memory_space<vmem>>, vector<128x64xf32>
    %c0_1 = arith.constant 0 : index
    %c0_2 = arith.constant 0 : index
    %1 = vector.load %arg2[%c0_1, %c0_2] : memref<1x64xf32, #tpu.memory_space<vmem>>, vector<1x64xf32>
    %2 = vector.broadcast %1 : vector<1x64xf32> to vector<128x64xf32>
    %3 = arith.mulf %0, %2 : vector<128x64xf32>
    %c0_3 = arith.constant 0 : index
    %c0_4 = arith.constant 0 : index
    %4 = vector.load %arg3[%c0_3, %c0_4] : memref<1x64xf32, #tpu.memory_space<vmem>>, vector<1x64xf32>
    %5 = vector.broadcast %4 : vector<1x64xf32> to vector<128x64xf32>
    %6 = arith.addf %3, %5 : vector<128x64xf32>
    %cst = arith.constant 0.000000e+00 : f32
    %7 = vector.broadcast %cst : f32 to vector<128x64xf32>
    %8 = arith.maximumf %6, %7 : vector<128x64xf32>
    %9 = arith.truncf %8 : vector<128x64xf32> to vector<128x64xbf16>
    %c0_5 = arith.constant 0 : index
    %c0_6 = arith.constant 0 : index
    %10 = vector.load %arg4[%c0_5, %c0_6] : memref<128x64xbf16, #tpu.memory_space<vmem>>, vector<128x64xbf16>
    tpu.vector_store %arg4[%c0_5, %c0_6], %9 {strides = array<i32>} : memref<128x64xbf16, #tpu.memory_space<vmem>>, vector<128x64xbf16>,
    return
  }
  func.func @transform_0(%arg0: i32) -> (i32, i32) {
    %c0_i32 = arith.constant 0 : i32
    %c0_i32_0 = arith.constant 0 : i32
    return %arg0, %c0_i32 : i32, i32
  }
  func.func @transform_1(%arg0: i32) -> (i32, i32) {
    %c0_i32 = arith.constant 0 : i32
    %c0_i32_0 = arith.constant 0 : i32
    %c0_i32_1 = arith.constant 0 : i32
    return %c0_i32, %c0_i32_0 : i32, i32
  }
  func.func @transform_2(%arg0: i32) -> (i32, i32) {
    %c0_i32 = arith.constant 0 : i32
    %c0_i32_0 = arith.constant 0 : i32
    %c0_i32_1 = arith.constant 0 : i32
    return %c0_i32, %c0_i32_0 : i32, i32
  }
  func.func @transform_3(%arg0: i32) -> (i32, i32) {
    %c0_i32 = arith.constant 0 : i32
    %c0_i32_0 = arith.constant 0 : i32
    return %arg0, %c0_i32 : i32, i32
  }
}

module attributes {stable_mosaic.version = 11 : i64} {
  func.func @_matmul_stats_kernel(%arg0: i32, %arg1: memref<512x144xbf16, #tpu.memory_space<vmem>>, %arg2: memref<144x32xbf16, #tpu.memory_space<vmem>>, %arg3: memref<512x32xf32, #tpu.memory_space<vmem>>, %arg4: memref<1x32xf32, #tpu.memory_space<vmem>>, %arg5: memref<1x32xf32, #tpu.memory_space<vmem>>) attributes {dimension_semantics = [#tpu.dimension_semantics<arbitrary>], iteration_bounds = array<i64: 1>, scalar_prefetch = 0 : i64, scratch_operands = 0 : i64, tpu.core_type = #tpu.core_type<tc>, window_params = [{transform_indices = @transform_0, window_bounds = array<i64: 512, 144>}, {pipeline_mode = #tpu.pipeline_mode<synchronous>, transform_indices = @transform_1, window_bounds = array<i64: 144, 32>}, {transform_indices = @transform_2, window_bounds = array<i64: 512, 32>}, {pipeline_mode = #tpu.pipeline_mode<synchronous>, transform_indices = @transform_3, window_bounds = array<i64: 1, 32>}, {pipeline_mode = #tpu.pipeline_mode<synchronous>, transform_indices = @transform_4, window_bounds = array<i64: 1, 32>}]} {
    %c0_i32 = arith.constant 0 : i32
    %0 = arith.cmpi eq, %arg0, %c0_i32 : i32
    %1 = arith.extui %0 : i1 to i32
    %c0_i32_0 = arith.constant 0 : i32
    %2 = arith.cmpi ne, %1, %c0_i32_0 : i32
    scf.if %2 {
      %cst_16 = arith.constant 0.000000e+00 : f32
      %18 = vector.broadcast %cst_16 : f32 to vector<1x32xf32>
      %c0_17 = arith.constant 0 : index
      %c0_18 = arith.constant 0 : index
      %19 = vector.load %arg4[%c0_17, %c0_18] : memref<1x32xf32, #tpu.memory_space<vmem>>, vector<1x32xf32>
      tpu.vector_store %arg4[%c0_17, %c0_18], %18 {strides = array<i32>} : memref<1x32xf32, #tpu.memory_space<vmem>>, vector<1x32xf32>,
      %cst_19 = arith.constant 0.000000e+00 : f32
      %20 = vector.broadcast %cst_19 : f32 to vector<1x32xf32>
      %c0_20 = arith.constant 0 : index
      %c0_21 = arith.constant 0 : index
      %21 = vector.load %arg5[%c0_20, %c0_21] : memref<1x32xf32, #tpu.memory_space<vmem>>, vector<1x32xf32>
      tpu.vector_store %arg5[%c0_20, %c0_21], %20 {strides = array<i32>} : memref<1x32xf32, #tpu.memory_space<vmem>>, vector<1x32xf32>,
    } else {
    }
    %c0 = arith.constant 0 : index
    %c0_1 = arith.constant 0 : index
    %3 = vector.load %arg1[%c0, %c0_1] : memref<512x144xbf16, #tpu.memory_space<vmem>>, vector<512x144xbf16>
    %c0_2 = arith.constant 0 : index
    %c0_3 = arith.constant 0 : index
    %4 = vector.load %arg2[%c0_2, %c0_3] : memref<144x32xbf16, #tpu.memory_space<vmem>>, vector<144x32xbf16>
    %cst = arith.constant dense<0.000000e+00> : vector<512x32xf32>
    %5 = tpu.matmul %3, %4, %cst {dimension_numbers = #tpu.dot_dimension_numbers<[1], [0], [0], [1], [0, 0, 1, 1], [], []>} : vector<512x144xbf16>, vector<144x32xbf16>, vector<512x32xf32> -> vector<512x32xf32>
    %c0_4 = arith.constant 0 : index
    %c0_5 = arith.constant 0 : index
    %6 = vector.load %arg3[%c0_4, %c0_5] : memref<512x32xf32, #tpu.memory_space<vmem>>, vector<512x32xf32>
    tpu.vector_store %arg3[%c0_4, %c0_5], %5 {strides = array<i32>} : memref<512x32xf32, #tpu.memory_space<vmem>>, vector<512x32xf32>,
    %c0_6 = arith.constant 0 : index
    %c0_7 = arith.constant 0 : index
    %7 = vector.load %arg4[%c0_6, %c0_7] : memref<1x32xf32, #tpu.memory_space<vmem>>, vector<1x32xf32>
    %cst_8 = arith.constant dense<0.000000e+00> : vector<32xf32>
    %8 = vector.multi_reduction <add>, %5, %cst_8 [0] : vector<512x32xf32> to vector<32xf32>
    %9 = vector.shape_cast %8 : vector<32xf32> to vector<1x32xf32>
    %10 = arith.addf %7, %9 : vector<1x32xf32>
    %c0_9 = arith.constant 0 : index
    %c0_10 = arith.constant 0 : index
    %11 = vector.load %arg4[%c0_9, %c0_10] : memref<1x32xf32, #tpu.memory_space<vmem>>, vector<1x32xf32>
    tpu.vector_store %arg4[%c0_9, %c0_10], %10 {strides = array<i32>} : memref<1x32xf32, #tpu.memory_space<vmem>>, vector<1x32xf32>,
    %c0_11 = arith.constant 0 : index
    %c0_12 = arith.constant 0 : index
    %12 = vector.load %arg5[%c0_11, %c0_12] : memref<1x32xf32, #tpu.memory_space<vmem>>, vector<1x32xf32>
    %13 = arith.mulf %5, %5 : vector<512x32xf32>
    %cst_13 = arith.constant dense<0.000000e+00> : vector<32xf32>
    %14 = vector.multi_reduction <add>, %13, %cst_13 [0] : vector<512x32xf32> to vector<32xf32>
    %15 = vector.shape_cast %14 : vector<32xf32> to vector<1x32xf32>
    %16 = arith.addf %12, %15 : vector<1x32xf32>
    %c0_14 = arith.constant 0 : index
    %c0_15 = arith.constant 0 : index
    %17 = vector.load %arg5[%c0_14, %c0_15] : memref<1x32xf32, #tpu.memory_space<vmem>>, vector<1x32xf32>
    tpu.vector_store %arg5[%c0_14, %c0_15], %16 {strides = array<i32>} : memref<1x32xf32, #tpu.memory_space<vmem>>, vector<1x32xf32>,
    return
  }
  func.func @transform_0(%arg0: i32) -> (i32, i32) {
    %c0_i32 = arith.constant 0 : i32
    %c0_i32_0 = arith.constant 0 : i32
    return %arg0, %c0_i32 : i32, i32
  }
  func.func @transform_1(%arg0: i32) -> (i32, i32) {
    %c0_i32 = arith.constant 0 : i32
    %c0_i32_0 = arith.constant 0 : i32
    %c0_i32_1 = arith.constant 0 : i32
    return %c0_i32, %c0_i32_0 : i32, i32
  }
  func.func @transform_2(%arg0: i32) -> (i32, i32) {
    %c0_i32 = arith.constant 0 : i32
    %c0_i32_0 = arith.constant 0 : i32
    return %arg0, %c0_i32 : i32, i32
  }
  func.func @transform_3(%arg0: i32) -> (i32, i32) {
    %c0_i32 = arith.constant 0 : i32
    %c0_i32_0 = arith.constant 0 : i32
    %c0_i32_1 = arith.constant 0 : i32
    return %c0_i32, %c0_i32_0 : i32, i32
  }
  func.func @transform_4(%arg0: i32) -> (i32, i32) {
    %c0_i32 = arith.constant 0 : i32
    %c0_i32_0 = arith.constant 0 : i32
    %c0_i32_1 = arith.constant 0 : i32
    return %c0_i32, %c0_i32_0 : i32, i32
  }
}

module attributes {stable_mosaic.version = 11 : i64} {
  func.func @_affine_relu_kernel(%arg0: i32, %arg1: memref<512x32xf32, #tpu.memory_space<vmem>>, %arg2: memref<1x32xf32, #tpu.memory_space<vmem>>, %arg3: memref<1x32xf32, #tpu.memory_space<vmem>>, %arg4: memref<512x32xbf16, #tpu.memory_space<vmem>>) attributes {dimension_semantics = [#tpu.dimension_semantics<parallel>], iteration_bounds = array<i64: 1>, scalar_prefetch = 0 : i64, scratch_operands = 0 : i64, tpu.core_type = #tpu.core_type<tc>, window_params = [{transform_indices = @transform_0, window_bounds = array<i64: 512, 32>}, {pipeline_mode = #tpu.pipeline_mode<synchronous>, transform_indices = @transform_1, window_bounds = array<i64: 1, 32>}, {pipeline_mode = #tpu.pipeline_mode<synchronous>, transform_indices = @transform_2, window_bounds = array<i64: 1, 32>}, {transform_indices = @transform_3, window_bounds = array<i64: 512, 32>}]} {
    %c0 = arith.constant 0 : index
    %c0_0 = arith.constant 0 : index
    %0 = vector.load %arg1[%c0, %c0_0] : memref<512x32xf32, #tpu.memory_space<vmem>>, vector<512x32xf32>
    %c0_1 = arith.constant 0 : index
    %c0_2 = arith.constant 0 : index
    %1 = vector.load %arg2[%c0_1, %c0_2] : memref<1x32xf32, #tpu.memory_space<vmem>>, vector<1x32xf32>
    %2 = vector.broadcast %1 : vector<1x32xf32> to vector<512x32xf32>
    %3 = arith.mulf %0, %2 : vector<512x32xf32>
    %c0_3 = arith.constant 0 : index
    %c0_4 = arith.constant 0 : index
    %4 = vector.load %arg3[%c0_3, %c0_4] : memref<1x32xf32, #tpu.memory_space<vmem>>, vector<1x32xf32>
    %5 = vector.broadcast %4 : vector<1x32xf32> to vector<512x32xf32>
    %6 = arith.addf %3, %5 : vector<512x32xf32>
    %cst = arith.constant 0.000000e+00 : f32
    %7 = vector.broadcast %cst : f32 to vector<512x32xf32>
    %8 = arith.maximumf %6, %7 : vector<512x32xf32>
    %9 = arith.truncf %8 : vector<512x32xf32> to vector<512x32xbf16>
    %c0_5 = arith.constant 0 : index
    %c0_6 = arith.constant 0 : index
    %10 = vector.load %arg4[%c0_5, %c0_6] : memref<512x32xbf16, #tpu.memory_space<vmem>>, vector<512x32xbf16>
    tpu.vector_store %arg4[%c0_5, %c0_6], %9 {strides = array<i32>} : memref<512x32xbf16, #tpu.memory_space<vmem>>, vector<512x32xbf16>,
    return
  }
  func.func @transform_0(%arg0: i32) -> (i32, i32) {
    %c0_i32 = arith.constant 0 : i32
    %c0_i32_0 = arith.constant 0 : i32
    return %arg0, %c0_i32 : i32, i32
  }
  func.func @transform_1(%arg0: i32) -> (i32, i32) {
    %c0_i32 = arith.constant 0 : i32
    %c0_i32_0 = arith.constant 0 : i32
    %c0_i32_1 = arith.constant 0 : i32
    return %c0_i32, %c0_i32_0 : i32, i32
  }
  func.func @transform_2(%arg0: i32) -> (i32, i32) {
    %c0_i32 = arith.constant 0 : i32
    %c0_i32_0 = arith.constant 0 : i32
    %c0_i32_1 = arith.constant 0 : i32
    return %c0_i32, %c0_i32_0 : i32, i32
  }
  func.func @transform_3(%arg0: i32) -> (i32, i32) {
    %c0_i32 = arith.constant 0 : i32
    %c0_i32_0 = arith.constant 0 : i32
    return %arg0, %c0_i32 : i32, i32
  }
}

module attributes {stable_mosaic.version = 11 : i64} {
  func.func @_matmul_act_kernel(%arg0: i32, %arg1: memref<512x72xbf16, #tpu.memory_space<vmem>>, %arg2: memref<72x12xbf16, #tpu.memory_space<vmem>>, %arg3: memref<512x12xf32, #tpu.memory_space<vmem>>) attributes {dimension_semantics = [#tpu.dimension_semantics<parallel>], iteration_bounds = array<i64: 4>, scalar_prefetch = 0 : i64, scratch_operands = 0 : i64, tpu.core_type = #tpu.core_type<tc>, window_params = [{transform_indices = @transform_0, window_bounds = array<i64: 512, 72>}, {pipeline_mode = #tpu.pipeline_mode<synchronous>, transform_indices = @transform_1, window_bounds = array<i64: 72, 12>}, {transform_indices = @transform_2, window_bounds = array<i64: 512, 12>}]} {
    %c0 = arith.constant 0 : index
    %c0_0 = arith.constant 0 : index
    %0 = vector.load %arg1[%c0, %c0_0] : memref<512x72xbf16, #tpu.memory_space<vmem>>, vector<512x72xbf16>
    %c0_1 = arith.constant 0 : index
    %c0_2 = arith.constant 0 : index
    %1 = vector.load %arg2[%c0_1, %c0_2] : memref<72x12xbf16, #tpu.memory_space<vmem>>, vector<72x12xbf16>
    %cst = arith.constant dense<0.000000e+00> : vector<512x12xf32>
    %2 = tpu.matmul %0, %1, %cst {dimension_numbers = #tpu.dot_dimension_numbers<[1], [0], [0], [1], [0, 0, 1, 1], [], []>} : vector<512x72xbf16>, vector<72x12xbf16>, vector<512x12xf32> -> vector<512x12xf32>
    %3 = math.tanh %2 : vector<512x12xf32>
    %c0_3 = arith.constant 0 : index
    %c0_4 = arith.constant 0 : index
    %4 = vector.load %arg3[%c0_3, %c0_4] : memref<512x12xf32, #tpu.memory_space<vmem>>, vector<512x12xf32>
    tpu.vector_store %arg3[%c0_3, %c0_4], %3 {strides = array<i32>} : memref<512x12xf32, #tpu.memory_space<vmem>>, vector<512x12xf32>,
    return
  }
  func.func @transform_0(%arg0: i32) -> (i32, i32) {
    %c0_i32 = arith.constant 0 : i32
    %c0_i32_0 = arith.constant 0 : i32
    return %arg0, %c0_i32 : i32, i32
  }
  func.func @transform_1(%arg0: i32) -> (i32, i32) {
    %c0_i32 = arith.constant 0 : i32
    %c0_i32_0 = arith.constant 0 : i32
    %c0_i32_1 = arith.constant 0 : i32
    return %c0_i32, %c0_i32_0 : i32, i32
  }
  func.func @transform_2(%arg0: i32) -> (i32, i32) {
    %c0_i32 = arith.constant 0 : i32
    %c0_i32_0 = arith.constant 0 : i32
    return %arg0, %c0_i32 : i32, i32
  }
}

</mosaic_0001>

<bundles_post_ra>
// kernel: tile.44
= control target key start
LH: loop header
LB: loop body
LE: loop exit
PB: predicated region body
PF: predicated region fallthrough
CT: control target
= control target key end

     0   :  { %vm3_vm0 = vcmask 523264   ;;  %vm10_vm1 = vcmask 1048064   ;;  %s125_s0 = inlined_call_operand.vmem [shape: f32[16,64], index: 0, kind: input, shape index: {}]   ;;  %s126_s1 = inlined_call_operand.vmem [shape: f32[1,1024], index: 1, kind: output, shape index: {}]  }
   0x1   :  { %v75_v0 = vld [vmem:[%s125_s0 + $0x1] ss:$2 sm:$0xff]   ;;  %v2_v1 = vld [vmem:[%s125_s0] ss:$2 sm:$0xff]   ;;  %s84_s0 = smov 64  }
   0x2   :  { %8 = vrot.lane.b32.xlu0 %v75_v0, %s84_s0  ;;  %4 = vst.msk [vmem:[#allocation0] ss:$8 sm:$0xf] %vm3_vm0, %v2_v1   ;;  %5 = vst.msk [vmem:[#allocation0] ss:$8 sm:$0xf0] %vm3_vm0, %v2_v1  }
  0x74   :  { %v9_v2 = vpop.permute.xlu0 %8  }
  0x75   :  { %11 = vst.msk [vmem:[#allocation0] ss:$8 sm:$0xf] %vm10_vm1, %v9_v2   ;;  %12 = vst.msk [vmem:[#allocation0] ss:$8 sm:$0xf0] %vm10_vm1, %v9_v2  }
  0x7c   :  { %v17_v3 = vld [vmem:[#allocation0] sm:$0x1]  ;;  %v22_v4 = vld [vmem:[#allocation0 + $0x8] sm:$0x1]  ;;  %v28_v5 = vld [vmem:[#allocation0 + $0x10] sm:$0x1] }
  0x7d   :  { %20 = vst [vmem:[%s126_s1] sm:$0x1] %v17_v3  ;;  %76 = vst [vmem:[%s126_s1 + $0x1] sm:$0x1] %v22_v4  ;;  %v35_v6 = vld [vmem:[#allocation0 + $0x18] sm:$0x1] }
  0x7e   :  { %77 = vst [vmem:[%s126_s1 + $0x2] sm:$0x1] %v28_v5  ;;  %v42_v7 = vld [vmem:[#allocation0 + $0x20] sm:$0x1]  ;;  %v49_v8 = vld [vmem:[#allocation0 + $0x28] sm:$0x1] }
  0x7f   :  { %78 = vst [vmem:[%s126_s1 + $0x3] sm:$0x1] %v35_v6  ;;  %79 = vst [vmem:[%s126_s1 + $0x4] sm:$0x1] %v42_v7  ;;  %v56_v9 = vld [vmem:[#allocation0 + $0x30] sm:$0x1] }
  0x80   :  { %80 = vst [vmem:[%s126_s1 + $0x5] sm:$0x1] %v49_v8  ;;  %v63_v10 = vld [vmem:[#allocation0 + $0x38] sm:$0x1]  ;;  %81 = vst [vmem:[%s126_s1 + $0x6] sm:$0x1] %v56_v9 }
  0x81   :  { %82 = vst [vmem:[%s126_s1 + $0x7] sm:$0x1] %v63_v10 }

// kernel: tile.43
= control target key start
LH: loop header
LB: loop body
LE: loop exit
PB: predicated region body
PF: predicated region fallthrough
CT: control target
= control target key end

     0   :  { %s28_s0 = inlined_call_operand.vmem [shape: f32[64], index: 0, kind: input, shape index: {}]   ;;  %s29_s1 = inlined_call_operand.vmem [shape: f32[16,64], index: 1, kind: output, shape index: {}]  }
   0x1   :  { %v4_v0 = vld [vmem:[%s28_s0] ss:$0 sm:$0xff] }
   0x2   :  { %5 = vst [vmem:[%s29_s1] sm:$0xff] %v4_v0  ;;  %8 = vst [vmem:[%s29_s1 + $0x8] sm:$0xff] %v4_v0 }

// kernel: generator_forward.10
= control target key start
LH: loop header
LB: loop body
LE: loop exit
PB: predicated region body
PF: predicated region fallthrough
CT: control target
= control target key end

     0   :  { %v24_v0 = vlaneseq  ;;  %s240_s1 = inlined_call_operand.vmem [shape: f32[1,1024], index: 1, kind: input, shape index: {}]   ;;  %s241_s2 = inlined_call_operand.vmem [shape: f32[1,1024], index: 2, kind: input, shape index: {}]   ;;  %s242_s0 = inlined_call_operand.vmem [shape: f32[8,1024], index: 0, kind: input, shape index: {}]   ;;  %s243_s3 = inlined_call_operand.vmem [shape: bf16[8,1024], index: 3, kind: output, shape index: {}]  }
   0x1   :  { %v22_v2 = vld [vmem:[%s240_s1] sm:$0xff]  ;;  %v15_v9 = vld [vmem:[%s242_s0 + $0x8] sm:$0xff]  ;;  %v16_v18 = vld [vmem:[%s242_s0 + $0x10] sm:$0xff] }
   0x2   :  { %v25_v1 = vshrl.u32 %v24_v0, 7  ;;  %v72_v3 = vld [vmem:[%s241_s2] sm:$0xff]  ;;  %v17_v19 = vld [vmem:[%s242_s0 + $0x18] sm:$0xff]  ;;  %v19_v25 = vld [vmem:[%s242_s0 + $0x28] sm:$0xff] }
   0x3   :  { %v14_v8 = vld [vmem:[%s242_s0] sm:$0xff]  ;;  %v20_v38 = vld [vmem:[%s242_s0 + $0x30] sm:$0xff]  ;;  %v21_v39 = vld [vmem:[%s242_s0 + $0x38] sm:$0xff] }
   0x4   :  { %v26_v4 = vsub.s32 0, %v25_v1  ;;  %v30_v5 = vsub.s32 1, %v25_v1  ;;  %v34_v6 = vsub.s32 2, %v25_v1  ;;  %v38_v7 = vsub.s32 3, %v25_v1  ;;  %v18_v24 = vld [vmem:[%s242_s0 + $0x20] sm:$0xff] }
   0x5   :  { %v42_v10 = vsub.s32 4, %v25_v1  ;;  %v46_v11 = vsub.s32 5, %v25_v1  ;;  %v50_v12 = vsub.s32 6, %v25_v1  ;;  %v54_v13 = vsub.s32 7, %v25_v1 }
   0x6   :  { %v27_v14 = vrot.slane %v22_v2, %v26_v4  ;;  %v31_v15 = vrot.slane %v22_v2, %v30_v5  ;;  %v77_v16 = vrot.slane %v72_v3, %v26_v4  ;;  %v81_v17 = vrot.slane %v72_v3, %v30_v5 }
   0x7   :  { %v35_v20 = vrot.slane %v22_v2, %v34_v6  ;;  %v39_v21 = vrot.slane %v22_v2, %v38_v7  ;;  %v85_v22 = vrot.slane %v72_v3, %v34_v6  ;;  %v89_v23 = vrot.slane %v72_v3, %v38_v7 }
   0x8   :  { %v64_v26 = vmul.f32 %v27_v14, %v14_v8  ;;  %v65_v27 = vmul.f32 %v31_v15, %v15_v9  ;;  %v43_v28 = vrot.slane %v22_v2, %v42_v10  ;;  %v47_v29 = vrot.slane %v22_v2, %v46_v11 }
   0x9   :  { %v66_v30 = vmul.f32 %v35_v20, %v16_v18  ;;  %v67_v31 = vmul.f32 %v39_v21, %v17_v19  ;;  %v93_v32 = vrot.slane %v72_v3, %v42_v10  ;;  %v97_v33 = vrot.slane %v72_v3, %v46_v11 }
   0xa   :  { %v114_v34 = vadd.f32 %v77_v16, %v64_v26  ;;  %v115_v35 = vadd.f32 %v81_v17, %v65_v27  ;;  %v68_v36 = vmul.f32 %v43_v28, %v18_v24  ;;  %v69_v37 = vmul.f32 %v47_v29, %v19_v25 }
   0xb   :  { %v116_v40 = vadd.f32 %v85_v22, %v66_v30  ;;  %v117_v41 = vadd.f32 %v89_v23, %v67_v31  ;;  %v51_v42 = vrot.slane %v22_v2, %v50_v12  ;;  %v55_v43 = vrot.slane %v22_v2, %v54_v13 }
   0xc   :  { %v122_v44 = vmax.f32 %v114_v34, 0.0  ;;  %v123_v45 = vmax.f32 %v115_v35, 0.0  ;;  %v118_v46 = vadd.f32 %v93_v32, %v68_v36  ;;  %v119_v47 = vadd.f32 %v97_v33, %v69_v37 }
   0xd   :  { %v124_v48 = vmax.f32 %v116_v40, 0.0  ;;  %v125_v49 = vmax.f32 %v117_v41, 0.0  ;;  %v70_v50 = vmul.f32 %v51_v42, %v20_v38  ;;  %v71_v51 = vmul.f32 %v55_v43, %v21_v39 }
   0xe   :  { %v174_v52 = vpack.c.bf16 %v123_v45, %v122_v44  ;;  %v126_v53 = vmax.f32 %v118_v46, 0.0  ;;  %v127_v54 = vmax.f32 %v119_v47, 0.0  ;;  %v101_v55 = vrot.slane %v72_v3, %v50_v12 }
   0xf   :  { %v175_v56 = vpack.c.bf16 %v125_v49, %v124_v48  ;;  %v105_v57 = vrot.slane %v72_v3, %v54_v13 }
  0x10   :  { %162 = vst [vmem:[%s243_s3] sm:$0xff] %v174_v52  ;;  %v176_v58 = vpack.c.bf16 %v127_v54, %v126_v53  ;;  %v120_v59 = vadd.f32 %v101_v55, %v70_v50 }
  0x11   :  { %163 = vst [vmem:[%s243_s3 + $0x8] sm:$0xff] %v175_v56  ;;  %v121_v60 = vadd.f32 %v105_v57, %v71_v51 }
  0x12   :  { %164 = vst [vmem:[%s243_s3 + $0x10] sm:$0xff] %v176_v58  ;;  %v128_v61 = vmax.f32 %v120_v59, 0.0 }
  0x13   :  { %v129_v62 = vmax.f32 %v121_v60, 0.0 }
  0x15   :  { %v177_v63 = vpack.c.bf16 %v129_v62, %v128_v61 }
  0x17   :  { %165 = vst [vmem:[%s243_s3 + $0x18] sm:$0xff] %v177_v63 }

// kernel: generator_forward.9
= control target key start
LH: loop header
LB: loop body
LE: loop exit
PB: predicated region body
PF: predicated region fallthrough
CT: control target
= control target key end

     0   :  { %vm50_vm0 = vcmask 1043456   ;;  %v512_v2 = vmov 0   ;;  %vm46_vm1 = vcmask 64512   ;;  %v513_v55 = vmov 1966171168   ;;  %s613_s1 = inlined_call_operand.vmem [shape: bf16[8,1024], index: 1, kind: input, shape index: {}]   ;;  %s614_s0 = inlined_call_operand.vmem [shape: bf16[8,8], index: 0, kind: input, shape index: {}]   ;;  %s615_s2 = inlined_call_operand.vmem [shape: f32[8,1024], index: 2, kind: output, shape index: {0}]   ;;  %s616_s3 = inlined_call_operand.vmem [shape: f32[1,1024], index: 3, kind: output, shape index: {1}]   ;;  %s617_s4 = inlined_call_operand.vmem [shape: f32[1,1024], index: 4, kind: output, shape index: {2}]  }
   0x1   :  { %v22_v0 = vld [vmem:[%s613_s1] sm:$0xff]  ;;  %v23_v1 = vld [vmem:[%s613_s1 + $0x8] sm:$0xff]  ;;  %107 = vmatprep.mubr.bf16.mxu0 %v512_v2  ;;  %148 = vmatprep.mubr.bf16.mxu1 %v512_v2  ;;  %v24_v7 = vld [vmem:[%s613_s1 + $0x10] sm:$0xff]  ;;  %v309_v56 = vunpack.c.l.s4 %v513_v55  ;;  %v311_v57 = vlaneseq }
   0x2   :  { %v486_v3 = vcombine.high %v22_v0, %v22_v0  ;;  %v488_v4 = vcombine.high %v23_v1, %v23_v1  ;;  %v485_v5 = vcombine.low %v22_v0, %v22_v0  ;;  %v487_v6 = vcombine.low %v23_v1, %v23_v1  ;;  %v25_v8 = vld [vmem:[%s613_s1 + $0x18] sm:$0xff]  ;;  %v21_v15 = vld [vmem:[%s614_s0] sm:$0xf] }
   0x3   :  { %v490_v9 = vcombine.high %v24_v7, %v24_v7  ;;  %v492_v10 = vcombine.high %v25_v8, %v25_v8  ;;  %v489_v11 = vcombine.low %v24_v7, %v24_v7  ;;  %v491_v12 = vcombine.low %v25_v8, %v25_v8 }
   0x4   :  { %493 = vmatprep.subr.msk.bf16.mxu0 %vm50_vm0, %v486_v3  ;;  %495 = vmatprep.subr.msk.bf16.mxu1 %vm50_vm0, %v488_v4  ;;  %v52_v13 = vsel %vm50_vm0, %v485_v5, 0  ;;  %v58_v14 = vsel %vm50_vm0, %v487_v6, 0 }
   0x5   :  { %90 = vmatpush1.bf16.msra.mxu0 %v52_v13  ;;  %131 = vmatpush1.bf16.msra.mxu1 %v58_v14  ;;  %v64_v16 = vsel %vm50_vm0, %v489_v11, 0  ;;  %v70_v17 = vsel %vm50_vm0, %v491_v12, 0  ;;  %v310_v12 = vunpack.c.0.s8 %v309_v56  ;;  %v312_v13 = vshrl.u32 %v311_v57, 7 }
   0x6   :  { %497 = vmatprep.subr.msk.bf16.mxu0 %vm50_vm0, %v490_v9  ;;  %499 = vmatprep.subr.msk.bf16.mxu1 %vm50_vm0, %v492_v10 }
   0x8   :  { %494 = vmatmul.mubr.msk.bf16.vlgmr.msra.gmra.mxu0 %vm46_vm1, %v21_v15  ;;  %496 = vmatmul.mubr.msk.bf16.vlgmr.msra.gmra.mxu1 %vm46_vm1, %v21_v15 }
   0x9   :  { %172 = vmatpush1.bf16.msra.mxu0 %v64_v16  ;;  %213 = vmatpush1.bf16.msra.mxu1 %v70_v17 }
   0xa   :  { %189 = vmatprep.mubr.bf16.mxu0 %v512_v2  ;;  %230 = vmatprep.mubr.bf16.mxu1 %v512_v2 }
  0x10   :  { %498 = vmatmul.mubr.msk.bf16.vlgmr.msra.gmra.mxu0 %vm46_vm1, %v21_v15  ;;  %500 = vmatmul.mubr.msk.bf16.vlgmr.msra.gmra.mxu1 %vm46_vm1, %v21_v15 }
  0xc8   :  { %v109_v18 = vpop.f32.mrf.mxu0  ;;  %v150_v19 = vpop.f32.mrf.mxu1 }
  0xc9   :  { %239 = vst [vmem:[%s615_s2] sm:$0xff] %v109_v18  ;;  %v248_v20 = vrot.slane %v109_v18, 4  ;;  %v357_v21 = vmul.f32 %v109_v18, %v109_v18  ;;  %241 = vst [vmem:[%s615_s2 + $0x10] sm:$0xff] %v150_v19  ;;  %v260_v22 = vrot.slane %v150_v19, 4  ;;  %v359_v23 = vmul.f32 %v150_v19, %v150_v19 }
  0xca   :  { %v111_v24 = vpop.f32.mrf.mxu0  ;;  %v152_v25 = vpop.f32.mrf.mxu1 }
  0xcb   :  { %v249_v26 = vadd.f32 %v248_v20, %v109_v18  ;;  %v365_v27 = vrot.slane %v357_v21, 4  ;;  %240 = vst [vmem:[%s615_s2 + $0x8] sm:$0xff] %v111_v24  ;;  %242 = vst [vmem:[%s615_s2 + $0x18] sm:$0xff] %v152_v25  ;;  %v254_v28 = vrot.slane %v111_v24, 4  ;;  %v358_v29 = vmul.f32 %v111_v24, %v111_v24 }
  0xcc   :  { %v266_v30 = vrot.slane %v152_v25, 4  ;;  %v360_v31 = vmul.f32 %v152_v25, %v152_v25  ;;  %v113_v32 = vpop.f32.mrf.mxu0  ;;  %v154_v33 = vpop.f32.mrf.mxu1  ;;  %v261_v34 = vadd.f32 %v260_v22, %v150_v19  ;;  %v377_v35 = vrot.slane %v359_v23, 4 }
  0xcd   :  { %v366_v36 = vadd.f32 %v365_v27, %v357_v21  ;;  %v255_v37 = vadd.f32 %v254_v28, %v111_v24  ;;  %v371_v38 = vrot.slane %v358_v29, 4  ;;  %v250_v42 = vrot.slane %v249_v26, 2 }
  0xce   :  { %v267_v39 = vadd.f32 %v266_v30, %v152_v25  ;;  %v114_v40 = vpop.f32.mrf.mxu0  ;;  %v155_v41 = vpop.f32.mrf.mxu1  ;;  %v383_v43 = vrot.slane %v360_v31, 4  ;;  %v262_v46 = vrot.slane %v261_v34, 2  ;;  %v378_v47 = vadd.f32 %v377_v35, %v359_v23 }
  0xcf   :  { %v367_v48 = vrot.slane %v366_v36, 2  ;;  %v256_v49 = vrot.slane %v255_v37, 2  ;;  %v372_v50 = vadd.f32 %v371_v38, %v358_v29  ;;  %v251_v54 = vadd.f32 %v250_v42, %v249_v26 }
  0xd0   :  { %v191_v44 = vpop.f32.mrf.mxu0  ;;  %v232_v45 = vpop.f32.mrf.mxu1  ;;  %v268_v51 = vrot.slane %v267_v39, 2  ;;  %v384_v58 = vadd.f32 %v383_v43, %v360_v31  ;;  %v263_v61 = vadd.f32 %v262_v46, %v261_v34  ;;  %v379_v62 = vrot.slane %v378_v47, 2 }
  0xd1   :  { %243 = vst [vmem:[%s615_s2 + $0x20] sm:$0xff] %v191_v44  ;;  %245 = vst [vmem:[%s615_s2 + $0x30] sm:$0xff] %v232_v45  ;;  %v272_v63 = vrot.slane %v191_v44, 4  ;;  %v361_v0 = vmul.f32 %v191_v44, %v191_v44  ;;  %v368_v1 = vadd.f32 %v367_v48, %v366_v36  ;;  %v257_v2 = vadd.f32 %v256_v49, %v255_v37 }
  0xd2   :  { %v193_v52 = vpop.f32.mrf.mxu0  ;;  %v580_v53 = vpop.f32.mrf.mxu1  ;;  %v373_v3 = vrot.slane %v372_v50, 2  ;;  %v269_v4 = vadd.f32 %v268_v51, %v267_v39  ;;  %v284_v9 = vrot.slane %v232_v45, 4  ;;  %v363_v10 = vmul.f32 %v232_v45, %v232_v45 }
  0xd3   :  { %244 = vst [vmem:[%s615_s2 + $0x28] sm:$0xff] %v193_v52  ;;  %246 = vst [vmem:[%s615_s2 + $0x38] sm:$0xff] %v580_v53  ;;  %v273_v7 = vadd.f32 %v272_v63, %v191_v44  ;;  %v389_v8 = vrot.slane %v361_v0, 4  ;;  %v252_v11 = vrot.slane %v251_v54, 1  ;;  %v385_v14 = vrot.slane %v384_v58, 2 }
  0xd4   :  { %v195_v59 = vpop.f32.mrf.mxu0  ;;  %v236_v60 = vpop.f32.mrf.mxu1  ;;  %v264_v15 = vrot.slane %v263_v61, 1  ;;  %v401_v18 = vrot.slane %v363_v10, 4  ;;  %v380_v19 = vadd.f32 %v379_v62, %v378_v47  ;;  %v285_v20 = vadd.f32 %v284_v9, %v232_v45 }
  0xd5   :  { %v274_v16 = vrot.slane %v273_v7, 2  ;;  %v390_v17 = vadd.f32 %v389_v8, %v361_v0  ;;  %v369_v21 = vrot.slane %v368_v1, 1  ;;  %v258_v22 = vrot.slane %v257_v2, 1 }
  0xd6   :  { %v196_v5 = vpop.f32.mrf.mxu0  ;;  %v237_v6 = vpop.f32.mrf.mxu1  ;;  %v374_v23 = vadd.f32 %v373_v3, %v372_v50  ;;  %v270_v24 = vrot.slane %v269_v4, 1  ;;  %v253_v25 = vadd.f32 %v252_v11, %v251_v54  ;;  %v589_v26 = vsub.s32 %v310_v12, %v312_v13 }
  0xd7   :  { %v386_v27 = vadd.f32 %v385_v14, %v384_v58  ;;  %v278_v28 = vrot.slane %v193_v52, 4  ;;  %v265_v29 = vadd.f32 %v264_v15, %v263_v61  ;;  %v275_v30 = vadd.f32 %v274_v16, %v273_v7 }
  0xd8   :  { %v391_v31 = vrot.slane %v390_v17, 2  ;;  %v402_v32 = vadd.f32 %v401_v18, %v363_v10  ;;  %v381_v33 = vrot.slane %v380_v19, 1  ;;  %v286_v34 = vrot.slane %v285_v20, 2 }
  0xd9   :  { %v279_v35 = vadd.f32 %v278_v28, %v193_v52  ;;  %v362_v36 = vmul.f32 %v193_v52, %v193_v52  ;;  %v370_v37 = vadd.f32 %v369_v21, %v368_v1  ;;  %v259_v38 = vadd.f32 %v258_v22, %v257_v2 }
  0xda   :  { %v375_v39 = vrot.slane %v374_v23, 1  ;;  %v271_v40 = vadd.f32 %v270_v24, %v269_v4  ;;  %v387_v41 = vrot.slane %v386_v27, 1  ;;  %v290_v44 = vrot.slane %v580_v53, 4 }
  0xdb   :  { %v280_v42 = vrot.slane %v279_v35, 2  ;;  %v395_v43 = vrot.slane %v362_v36, 4  ;;  %v276_v45 = vrot.slane %v275_v30, 1  ;;  %v392_v46 = vadd.f32 %v391_v31, %v390_v17 }
  0xdc   :  { %v403_v47 = vrot.slane %v402_v32, 2  ;;  %v364_v48 = vmul.f32 %v580_v53, %v580_v53  ;;  %v287_v49 = vadd.f32 %v286_v34, %v285_v20  ;;  %v291_v52 = vadd.f32 %v290_v44, %v580_v53 }
  0xdd   :  { %v281_v50 = vadd.f32 %v280_v42, %v279_v35  ;;  %v396_v51 = vadd.f32 %v395_v43, %v362_v36  ;;  %v304_v54 = vcombine.low %v253_v25, %v259_v38  ;;  %v376_v55 = vadd.f32 %v375_v39, %v374_v23 }
  0xde   :  { %v305_v56 = vcombine.low %v265_v29, %v271_v40  ;;  %v407_v57 = vrot.slane %v364_v48, 4  ;;  %v388_v58 = vadd.f32 %v387_v41, %v386_v27  ;;  %v292_v61 = vrot.slane %v291_v52, 2 }
  0xdf   :  { %v282_v59 = vrot.slane %v281_v50, 1  ;;  %v397_v60 = vrot.slane %v396_v51, 2  ;;  %v277_v62 = vadd.f32 %v276_v45, %v275_v30  ;;  %v393_v63 = vrot.slane %v392_v46, 1 }
  0xe0   :  { %v404_v0 = vadd.f32 %v403_v47, %v402_v32  ;;  %v408_v1 = vadd.f32 %v407_v57, %v364_v48  ;;  %v288_v2 = vrot.slane %v287_v49, 1  ;;  %v293_v5 = vadd.f32 %v292_v61, %v291_v52 }
  0xe1   :  { %v283_v3 = vadd.f32 %v282_v59, %v281_v50  ;;  %v398_v4 = vadd.f32 %v397_v60, %v396_v51  ;;  %v382_v6 = vadd.f32 %v381_v33, %v380_v19  ;;  %v314_v7 = vrot.slane %v304_v54, %v589_v26 }
  0xe2   :  { %v409_v53 = vrot.slane %v408_v1, 2  ;;  %v421_v8 = vcombine.low %v370_v37, %v376_v55  ;;  %v294_v11 = vrot.slane %v293_v5, 1  ;;  %v321_v12 = vrot.slane %v305_v56, %v589_v26 }
  0xe3   :  { %v306_v9 = vcombine.low %v277_v62, %v283_v3  ;;  %v399_v10 = vrot.slane %v398_v4, 1  ;;  %v422_v13 = vcombine.low %v382_v6, %v388_v58  ;;  %v405_v14 = vrot.slane %v404_v0, 1 }
  0xe4   :  { %v410_v15 = vadd.f32 %v409_v53, %v408_v1  ;;  %v394_v16 = vadd.f32 %v393_v63, %v392_v46  ;;  %v289_v17 = vadd.f32 %v288_v2, %v287_v49  ;;  %v295_v20 = vadd.f32 %v294_v11, %v293_v5 }
  0xe5   :  { %v400_v18 = vadd.f32 %v399_v10, %v398_v4  ;;  %v328_v22 = vrot.slane %v306_v9, %v589_v26  ;;  %v431_v24 = vrot.slane %v421_v8, %v589_v26  ;;  %v438_v25 = vrot.slane %v422_v13, %v589_v26 }
  0xe6   :  { %v411_v21 = vrot.slane %v410_v15, 1  ;;  %v307_v23 = vcombine.low %v289_v17, %v295_v20  ;;  %v406_v27 = vadd.f32 %v405_v14, %v404_v0  ;;  %v336_v29 = vcombine.low %v314_v7, %v321_v12 }
  0xe7   :  { %v423_v19 = vcombine.low %v394_v16, %v400_v18  ;;  %v453_v34 = vcombine.low %v431_v24, %v438_v25 }
  0xe8   :  { %v412_v28 = vadd.f32 %v411_v21, %v410_v15  ;;  %v335_v30 = vrot.slane %v307_v23, %v589_v26  ;;  %v344_v36 = vrot.slane %v336_v29, %v589_v26 }
  0xe9   :  { %v445_v31 = vrot.slane %v423_v19, %v589_v26  ;;  %v461_v40 = vrot.slane %v453_v34, %v589_v26 }
  0xea   :  { %v424_v32 = vcombine.low %v406_v27, %v412_v28  ;;  %v337_v33 = vcombine.low %v328_v22, %v335_v30 }
  0xec   :  { %v452_v35 = vrot.slane %v424_v32, %v589_v26  ;;  %v351_v37 = vrot.slane %v337_v33, %v589_v26 }
  0xee   :  { %v454_v38 = vcombine.low %v445_v31, %v452_v35  ;;  %v352_v39 = vcombine.low %v344_v36, %v351_v37 }
  0xf0   :  { %v468_v41 = vrot.slane %v454_v38, %v589_v26  ;;  %355 = vst [vmem:[%s616_s3] sm:$0xff] %v352_v39 }
  0xf2   :  { %v469_v42 = vcombine.low %v461_v40, %v468_v41 }
  0xf4   :  { %472 = vst [vmem:[%s617_s4] sm:$0xff] %v469_v42 }

// kernel: tile.53
= control target key start
LH: loop header
LB: loop body
LE: loop exit
PB: predicated region body
PF: predicated region fallthrough
CT: control target
= control target key end

     0   :  { %s22_s0 = inlined_call_operand.vmem [shape: f32[32], index: 0, kind: input, shape index: {}]   ;;  %s23_s1 = inlined_call_operand.vmem [shape: f32[4,32], index: 1, kind: output, shape index: {}]  }
   0x1   :  { %v4_v0 = vld [vmem:[%s22_s0] ss:$0 sm:$0xff] }
   0x2   :  { %5 = vst [vmem:[%s23_s1] sm:$0xf] %v4_v0 }

// kernel: tile.54
= control target key start
LH: loop header
LB: loop body
LE: loop exit
PB: predicated region body
PF: predicated region fallthrough
CT: control target
= control target key end

     0   :  { %vm8_vm0 = vcmask 261120   ;;  %s40_s8 = smov 32   ;;  %s41_s9 = smov 64   ;;  %vm14_vm1 = vcmask 1048320   ;;  %vm20_vm2 = vcmask 785920   ;;  %vm26_vm3 = vcmask 523520   ;;  %s58_s0 = inlined_call_operand.vmem [shape: f32[4,32], index: 0, kind: input, shape index: {}]   ;;  %s59_s1 = inlined_call_operand.vmem [shape: f32[1,128], index: 1, kind: output, shape index: {}]  }
   0x1   :  { %v5_v0 = vld [vmem:[%s58_s0] sm:$0xf]  ;;  %s39_s0 = smov 96  }
   0x2   :  { %6 = vst [vmem:[#allocation1] sm:$0xf] %v5_v0 }
   0x9   :  { %v11_v1 = vld [vmem:[#allocation1 + $0x3] sm:$0x1]   ;;  %v23_v2 = vld [vmem:[#allocation1 + $0x1] sm:$0x1]   ;;  %v7_v3 = vld [vmem:[#allocation1] sm:$0x1]  }
   0xa   :  { %12 = vrot.lane.b32.xlu0 %v11_v1, %s39_s0  ;;  %24 = vrot.lane.b32.xlu1 %v23_v2, %s40_s8  ;;  %v17_v4 = vld [vmem:[#allocation1 + $0x2] sm:$0x1]   ;;  %9 = vst.msk [vmem:[#allocation0] sm:$0x1] %vm8_vm0, %v7_v3  }
   0xe   :  { %18 = vrot.lane.b32.xlu0 %v17_v4, %s41_s9 }
  0x7c   :  { %v13_v5 = vpop.permute.xlu0 %12   ;;  %v25_v6 = vpop.permute.xlu1 %24  }
  0x7d   :  { %15 = vst.msk [vmem:[#allocation0] sm:$0x1] %vm14_vm1, %v13_v5  }
  0x80   :  { %v19_v7 = vpop.permute.xlu0 %18  }
  0x81   :  { %21 = vst.msk [vmem:[#allocation0] sm:$0x1] %vm20_vm2, %v19_v7  }
  0x82   :  { %27 = vst.msk [vmem:[#allocation0] sm:$0x1] %vm26_vm3, %v25_v6  }
  0x89   :  { %v32_v8 = vld [vmem:[#allocation0] sm:$0x1] }
  0x8a   :  { %35 = vst [vmem:[%s59_s1] sm:$0x1] %v32_v8 }

// kernel: generator_forward.11
= control target key start
LH: loop header
LB: loop body
LE: loop exit
PB: predicated region body
PF: predicated region fallthrough
CT: control target
= control target key end

     0   :  { %vm371_vm0 = vcmask 523264   ;;  %v742_v46 = vmov 0.0   ;;  %s936_s1 = inlined_call_operand.vmem [shape: bf16[576,128], index: 1, kind: input, shape index: {}]   ;;  %s937_s0 = inlined_call_operand.vmem [shape: bf16[32,576], index: 0, kind: input, shape index: {}]   ;;  %s938_s3 = inlined_call_operand.vmem [shape: f32[1,128], index: 3, kind: output, shape index: {1}]   ;;  %s939_s4 = inlined_call_operand.vmem [shape: f32[1,128], index: 4, kind: output, shape index: {2}]   ;;  %s940_s2 = inlined_call_operand.vmem [shape: f32[32,128], index: 2, kind: output, shape index: {0}]  }
   0x1   :  { %v692_v0 = vld [vmem:[%s936_s1 + $0x78] sm:$0xff]   ;;  %v696_v4 = vld [vmem:[%s936_s1 + $0x70] sm:$0xff]   ;;  %v700_v8 = vld [vmem:[%s936_s1 + $0x68] sm:$0xff]   ;;  %19 = vst [vmem:[%s938_s3] sm:$0x1] %v742_v46 }
   0x2   :  { %v693_v1 = vld [vmem:[%s936_s1 + $0xf8] sm:$0xff]   ;;  %617 = vmatprep.subr.bf16.mxu0 %v692_v0  ;;  %v697_v5 = vld [vmem:[%s936_s1 + $0xf0] sm:$0xff]   ;;  %v701_v9 = vld [vmem:[%s936_s1 + $0xe8] sm:$0xff]   ;;  %20 = vst [vmem:[%s939_s4] sm:$0x1] %v742_v46 }
   0x3   :  { %v694_v2 = vld [vmem:[%s936_s1 + $0x38] sm:$0xff]   ;;  %645 = vmatprep.subr.bf16.mxu1 %v693_v1  ;;  %v698_v6 = vld [vmem:[%s936_s1 + $0x30] sm:$0xff]   ;;  %v702_v10 = vld [vmem:[%s936_s1 + $0x28] sm:$0xff]  }
   0x4   :  { %v695_v3 = vld [vmem:[%s936_s1 + $0xb8] sm:$0xff]   ;;  %618 = vmatpush3.bf16.msra.mxu0 %v694_v2  ;;  %v699_v7 = vld [vmem:[%s936_s1 + $0xb0] sm:$0xff]   ;;  %v703_v11 = vld [vmem:[%s936_s1 + $0xa8] sm:$0xff]  }
   0x5   :  { %646 = vmatpush3.bf16.msra.mxu1 %v695_v3  ;;  %619 = vmatprep.subr.bf16.mxu0 %v696_v4  ;;  %v704_v12 = vld [vmem:[%s936_s1 + $0x60] sm:$0xff]   ;;  %v708_v16 = vld [vmem:[%s936_s1 + $0x58] sm:$0xff]   ;;  %v712_v20 = vld [vmem:[%s936_s1 + $0x50] sm:$0xff]  }
   0x6   :  { %647 = vmatprep.subr.bf16.mxu1 %v697_v5  ;;  %v705_v13 = vld [vmem:[%s936_s1 + $0xe0] sm:$0xff]   ;;  %v709_v17 = vld [vmem:[%s936_s1 + $0xd8] sm:$0xff]   ;;  %v713_v21 = vld [vmem:[%s936_s1 + $0xd0] sm:$0xff]  }
   0x7   :  { %v706_v14 = vld [vmem:[%s936_s1 + $0x20] sm:$0xff]   ;;  %v710_v18 = vld [vmem:[%s936_s1 + $0x18] sm:$0xff]   ;;  %v714_v22 = vld [vmem:[%s936_s1 + $0x10] sm:$0xff]  }
   0x8   :  { %620 = vmatpush3.bf16.msra.mxu0 %v698_v6  ;;  %v707_v15 = vld [vmem:[%s936_s1 + $0xa0] sm:$0xff]   ;;  %v711_v19 = vld [vmem:[%s936_s1 + $0x98] sm:$0xff]   ;;  %v715_v23 = vld [vmem:[%s936_s1 + $0x90] sm:$0xff]  }
   0x9   :  { %648 = vmatpush3.bf16.msra.mxu1 %v699_v7  ;;  %621 = vmatprep.subr.bf16.mxu0 %v700_v8  ;;  %v716_v24 = vld [vmem:[%s936_s1 + $0x48] sm:$0xff]   ;;  %v720_v28 = vld [vmem:[%s936_s1 + $0x40] sm:$0xff]   ;;  %v730_v36 = vld [vmem:[%s936_s1 + $0x118] sm:$0xff]  }
   0xa   :  { %649 = vmatprep.subr.bf16.mxu1 %v701_v9  ;;  %v717_v25 = vld [vmem:[%s936_s1 + $0xc8] sm:$0xff]   ;;  %v721_v29 = vld [vmem:[%s936_s1 + $0xc0] sm:$0xff]   ;;  %v731_v37 = vld [vmem:[%s936_s1 + $0x110] sm:$0xff]  }
   0xb   :  { %v718_v26 = vld [vmem:[%s936_s1 + $0x8] sm:$0xff]   ;;  %v722_v30 = vld [vmem:[%s936_s1] sm:$0xff]  }
   0xc   :  { %622 = vmatpush3.bf16.msra.mxu0 %v702_v10  ;;  %v719_v27 = vld [vmem:[%s936_s1 + $0x88] sm:$0xff]   ;;  %v723_v31 = vld [vmem:[%s936_s1 + $0x80] sm:$0xff]  }
   0xd   :  { %650 = vmatpush3.bf16.msra.mxu1 %v703_v11  ;;  %623 = vmatprep.subr.bf16.mxu0 %v704_v12  ;;  %v724_v32 = vld [vmem:[%s937_s0] ss:$20 sps:$4 sm:$0xff]   ;;  %v726_v33 = vld [vmem:[%s937_s0 + $0x4] ss:$20 sps:$4 sm:$0xff]   ;;  %v727_v34 = vld [vmem:[%s937_s0 + $0x8] ss:$20 sps:$4 sm:$0xff]  }
   0xe   :  { %651 = vmatprep.subr.bf16.mxu1 %v705_v13  ;;  %v729_v35 = vld [vmem:[%s937_s0 + $0xc] ss:$20 sps:$4 sm:$0xff]   ;;  %410 = vmatprep.mubr.bf16.mxu0 %v726_v33  ;;  %v734_v39 = vld [vmem:[%s937_s0 + $0x34] ss:$20 sps:$4 sm:$0xff]   ;;  %v737_v42 = vld [vmem:[%s937_s0 + $0x30] ss:$20 sps:$4 sm:$0xff]  }
   0xf   :  { %459 = vmatprep.mubr.bf16.mxu1 %v729_v35  ;;  %v732_v38 = vld [vmem:[%s937_s0 + $0x2c] ss:$20 sps:$4 sm:$0xff]   ;;  %v736_v40 = vld [vmem:[%s937_s0 + $0x28] ss:$20 sps:$4 sm:$0xff]   ;;  %v740_v43 = vld [vmem:[%s937_s0 + $0x10] ss:$20 sps:$4 sm:$0xff]  }
  0x10   :  { %624 = vmatpush3.bf16.msra.mxu0 %v706_v14  ;;  %v738_v41 = vld [vmem:[%s936_s1 + $0x108] sm:$0xff]   ;;  %v739_v44 = vld [vmem:[%s936_s1 + $0x100] sm:$0xff]  }
  0x11   :  { %652 = vmatpush3.bf16.msra.mxu1 %v707_v15  ;;  %625 = vmatprep.subr.bf16.mxu0 %v708_v16  ;;  %v741_v45 = vld [vmem:[%s937_s0 + $0x38] ss:$20 sps:$4 sm:$0xff]  }
  0x12   :  { %653 = vmatprep.subr.bf16.mxu1 %v709_v17 }
  0x14   :  { %626 = vmatpush3.bf16.msra.mxu0 %v710_v18 }
  0x15   :  { %654 = vmatpush3.bf16.msra.mxu1 %v711_v19  ;;  %627 = vmatprep.subr.bf16.mxu0 %v712_v20 }
  0x16   :  { %655 = vmatprep.subr.bf16.mxu1 %v713_v21 }
  0x18   :  { %628 = vmatpush3.bf16.msra.mxu0 %v714_v22 }
  0x19   :  { %656 = vmatpush3.bf16.msra.mxu1 %v715_v23  ;;  %629 = vmatprep.subr.bf16.mxu0 %v716_v24 }
  0x1a   :  { %657 = vmatprep.subr.bf16.mxu1 %v717_v25 }
  0x1c   :  { %630 = vmatpush3.bf16.msra.mxu0 %v718_v26 }
  0x1d   :  { %658 = vmatpush3.bf16.msra.mxu1 %v719_v27  ;;  %631 = vmatprep.subr.bf16.mxu0 %v720_v28 }
  0x1e   :  { %659 = vmatprep.subr.bf16.mxu1 %v721_v29 }
  0x20   :  { %632 = vmatpush3.bf16.msra.mxu0 %v722_v30 }
  0x21   :  { %660 = vmatpush3.bf16.msra.mxu1 %v723_v31  ;;  %679 = vmatprep.subr.bf16.mxu0 %v730_v36 }
  0x23   :  { %411 = vmatmul.mubr.bf16.vlgmr.msra.gmra.mxu0 %v724_v32 }
  0x24   :  { %460 = vmatmul.mubr.bf16.vlgmr.msra.gmra.mxu1 %v727_v34  ;;  %680 = vmatpush3.bf16.msra.mxu0 %v730_v36 }
  0x25   :  { %681 = vmatprep.subr.bf16.mxu0 %v731_v37  ;;  %418 = vmatprep.mubr.bf16.mxu0 %v732_v38  ;;  %v529_v38 = vld [vmem:[%s938_s3] sm:$0x1] }
  0x26   :  { %467 = vmatprep.mubr.bf16.mxu1 %v734_v39 }
  0x28   :  { %682 = vmatpush3.bf16.msra.mxu0 %v731_v37 }
  0x29   :  { %683 = vmatprep.subr.bf16.mxu0 %v738_v41 }
  0x2b   :  { %419 = vmatmul.mubr.bf16.gmra.mxu0 %v736_v40 }
  0x2c   :  { %468 = vmatmul.mubr.bf16.gmra.mxu1 %v737_v42  ;;  %687 = vmatprep.mubr.msk.bf16.mxu0 %vm371_vm0, %v740_v43 }
  0x2d   :  { %684 = vmatpush3.bf16.msra.mxu0 %v738_v41  ;;  %v541_v41 = vld [vmem:[%s939_s4] sm:$0x1] }
  0x2e   :  { %685 = vmatprep.subr.bf16.mxu0 %v739_v44 }
  0x31   :  { %686 = vmatpush3.bf16.msra.mxu0 %v739_v44 }
  0x34   :  { %688 = vmatmul.mubr.msk.bf16.vlgmr.msra.gmra.mxu0 %vm371_vm0, %v741_v45 }
  0xe3   :  { %v633_v47 = vpop.f32.mrf.mxu0 }
  0xe4   :  { %v661_v48 = vpop.f32.mrf.mxu1 }
  0xe5   :  { %v634_v49 = vpop.f32.mrf.mxu0 }
  0xe6   :  { %v662_v50 = vpop.f32.mrf.mxu1  ;;  %v635_v63 = vadd.f32 %v634_v49, %v633_v47 }
  0xe7   :  { %v636_v51 = vpop.f32.mrf.mxu0  ;;  %v663_v0 = vadd.f32 %v662_v50, %v661_v48 }
  0xe8   :  { %v664_v52 = vpop.f32.mrf.mxu1 }
  0xe9   :  { %v637_v53 = vpop.f32.mrf.mxu0  ;;  %v462_v10 = vadd.f32 %v663_v0, %v635_v63 }
  0xea   :  { %v665_v54 = vpop.f32.mrf.mxu1  ;;  %v638_v7 = vadd.f32 %v637_v53, %v636_v51 }
  0xeb   :  { %v639_v55 = vpop.f32.mrf.mxu0  ;;  %v666_v8 = vadd.f32 %v665_v54, %v664_v52 }
  0xec   :  { %v667_v56 = vpop.f32.mrf.mxu1 }
  0xed   :  { %v640_v57 = vpop.f32.mrf.mxu0  ;;  %v465_v16 = vadd.f32 %v666_v8, %v638_v7 }
  0xee   :  { %v668_v58 = vpop.f32.mrf.mxu1  ;;  %v641_v59 = vadd.f32 %v640_v57, %v639_v55 }
  0xef   :  { %v669_v60 = vadd.f32 %v668_v58, %v667_v56  ;;  %v642_v61 = vpop.f32.mrf.mxu0 }
  0xf0   :  { %v670_v62 = vpop.f32.mrf.mxu1 }
  0xf1   :  { %v643_v1 = vpop.f32.mrf.mxu0  ;;  %v470_v5 = vadd.f32 %v669_v60, %v641_v59 }
  0xf2   :  { %v671_v2 = vpop.f32.mrf.mxu1  ;;  %v644_v3 = vadd.f32 %v643_v1, %v642_v61 }
  0xf3   :  { %v672_v4 = vadd.f32 %v671_v2, %v670_v62 }
  0xf4   :  { %v689_v6 = vpop.f32.mrf.mxu0 }
  0xf5   :  { %v519_v9 = vadd.f32 %v689_v6, %v470_v5  ;;  %v473_v13 = vadd.f32 %v672_v4, %v644_v3 }
  0xf6   :  { %v510_v11 = vpop.f32.mrf.mxu0 }
  0xf7   :  { %527 = vst [vmem:[%s940_s2 + $0x10] sm:$0xff] %v519_v9  ;;  %v511_v12 = vadd.f32 %v510_v11, %v462_v10  ;;  %v544_v22 = vmul.f32 %v519_v9, %v519_v9 }
  0xf8   :  { %v690_v14 = vpop.f32.mrf.mxu0 }
  0xf9   :  { %525 = vst [vmem:[%s940_s2] sm:$0xff] %v511_v12  ;;  %v522_v15 = vadd.f32 %v690_v14, %v473_v13  ;;  %v542_v19 = vmul.f32 %v511_v12, %v511_v12 }
  0xfa   :  { %v513_v17 = vpop.f32.mrf.mxu0 }
  0xfb   :  { %528 = vst [vmem:[%s940_s2 + $0x18] sm:$0xff] %v522_v15  ;;  %v514_v18 = vadd.f32 %v513_v17, %v465_v16  ;;  %v545_v25 = vmul.f32 %v522_v15, %v522_v15 }
  0xfd   :  { %526 = vst [vmem:[%s940_s2 + $0x8] sm:$0xff] %v514_v18  ;;  %v530_v20 = vadd.f32 %v514_v18, %v511_v12  ;;  %v543_v21 = vmul.f32 %v514_v18, %v514_v18 }
  0xff   :  { %v531_v23 = vadd.f32 %v530_v20, %v519_v9  ;;  %v546_v24 = vadd.f32 %v543_v21, %v542_v19 }
 0x101   :  { %v532_v26 = vadd.f32 %v531_v23, %v522_v15  ;;  %v547_v27 = vadd.f32 %v546_v24, %v544_v22 }
 0x103   :  { %v533_v28 = vrot.slane %v532_v26, 4  ;;  %v548_v29 = vadd.f32 %v547_v27, %v545_v25 }
 0x105   :  { %v534_v30 = vadd.f32 %v533_v28, %v532_v26  ;;  %v549_v31 = vrot.slane %v548_v29, 4 }
 0x107   :  { %v535_v32 = vrot.slane %v534_v30, 2  ;;  %v550_v33 = vadd.f32 %v549_v31, %v548_v29 }
 0x109   :  { %v536_v34 = vadd.f32 %v535_v32, %v534_v30  ;;  %v551_v35 = vrot.slane %v550_v33, 2 }
 0x10b   :  { %v537_v36 = vrot.slane %v536_v34, 1  ;;  %v552_v37 = vadd.f32 %v551_v35, %v550_v33 }
 0x10d   :  { %v538_v39 = vadd.f32 %v537_v36, %v536_v34  ;;  %v553_v40 = vrot.slane %v552_v37, 1 }
 0x10f   :  { %v539_v42 = vadd.f32 %v538_v39, %v529_v38  ;;  %v554_v43 = vadd.f32 %v553_v40, %v552_v37 }
 0x111   :  { %540 = vst [vmem:[%s938_s3] sm:$0x1] %v539_v42  ;;  %v555_v44 = vadd.f32 %v554_v43, %v541_v41 }
 0x113   :  { %556 = vst [vmem:[%s939_s4] sm:$0x1] %v555_v44 }

// kernel: generator_forward.12
= control target key start
LH: loop header
LB: loop body
LE: loop exit
PB: predicated region body
PF: predicated region fallthrough
CT: control target
= control target key end

     0   :  { %s133_s0 = inlined_call_operand.vmem [shape: f32[32,128], index: 0, kind: input, shape index: {}]   ;;  %s134_s1 = inlined_call_operand.vmem [shape: f32[1,128], index: 1, kind: input, shape index: {}]   ;;  %s135_s2 = inlined_call_operand.vmem [shape: f32[1,128], index: 2, kind: input, shape index: {}]   ;;  %s136_s3 = inlined_call_operand.vmem [shape: bf16[32,128], index: 3, kind: output, shape index: {}]  }
   0x1   :  { %v14_v0 = vld [vmem:[%s133_s0] sm:$0xff]  ;;  %v15_v1 = vld [vmem:[%s133_s0 + $0x8] sm:$0xff]  ;;  %v16_v6 = vld [vmem:[%s133_s0 + $0x10] sm:$0xff] }
   0x2   :  { %v68_v2 = vld [vmem:[%s134_s1] ss:$0 sm:$0xff]  ;;  %v17_v7 = vld [vmem:[%s133_s0 + $0x18] sm:$0xff] }
   0x3   :  { %v25_v3 = vmul.f32 %v68_v2, %v14_v0  ;;  %v26_v4 = vmul.f32 %v68_v2, %v15_v1  ;;  %v69_v5 = vld [vmem:[%s135_s2] ss:$0 sm:$0xff]  ;;  %v27_v8 = vmul.f32 %v68_v2, %v16_v6  ;;  %v28_v9 = vmul.f32 %v68_v2, %v17_v7 }
   0x5   :  { %v36_v10 = vadd.f32 %v69_v5, %v25_v3  ;;  %v37_v11 = vadd.f32 %v69_v5, %v26_v4  ;;  %v38_v12 = vadd.f32 %v69_v5, %v27_v8  ;;  %v39_v13 = vadd.f32 %v69_v5, %v28_v9 }
   0x7   :  { %v40_v14 = vmax.f32 %v36_v10, 0.0  ;;  %v41_v15 = vmax.f32 %v37_v11, 0.0  ;;  %v42_v16 = vmax.f32 %v38_v12, 0.0  ;;  %v43_v17 = vmax.f32 %v39_v13, 0.0 }
   0x9   :  { %v81_v18 = vpack.c.bf16 %v41_v15, %v40_v14  ;;  %v86_v19 = vpack.c.bf16 %v43_v17, %v42_v16 }
   0xb   :  { %82 = vst [vmem:[%s136_s3] sm:$0xff] %v81_v18   ;;  %88 = vst [vmem:[%s136_s3 + $0x8] sm:$0xff] %v86_v19  }

// kernel: tile.63
= control target key start
LH: loop header
LB: loop body
LE: loop exit
PB: predicated region body
PF: predicated region fallthrough
CT: control target
= control target key end

     0   :  { %s22_s0 = inlined_call_operand.vmem [shape: f32[16], index: 0, kind: input, shape index: {}]   ;;  %s23_s1 = inlined_call_operand.vmem [shape: f32[4,16], index: 1, kind: output, shape index: {}]  }
   0x1   :  { %v4_v0 = vld [vmem:[%s22_s0] ss:$0 sm:$0xff] }
   0x2   :  { %5 = vst [vmem:[%s23_s1] sm:$0xf] %v4_v0 }

// kernel: tile.64
= control target key start
LH: loop header
LB: loop body
LE: loop exit
PB: predicated region body
PF: predicated region fallthrough
CT: control target
= control target key end

     0   :  { %vm8_vm0 = vcmask 130048   ;;  %s40_s8 = smov 16   ;;  %s41_s9 = smov 32   ;;  %vm14_vm1 = vcmask 523648   ;;  %vm20_vm2 = vcmask 392448   ;;  %vm26_vm3 = vcmask 261248   ;;  %s58_s0 = inlined_call_operand.vmem [shape: f32[4,16], index: 0, kind: input, shape index: {}]   ;;  %s59_s1 = inlined_call_operand.vmem [shape: f32[1,64], index: 1, kind: output, shape index: {}]  }
   0x1   :  { %v5_v0 = vld [vmem:[%s58_s0] sm:$0xf]  ;;  %s39_s0 = smov 48  }
   0x2   :  { %6 = vst [vmem:[#allocation1] sm:$0xf] %v5_v0 }
   0x9   :  { %v11_v1 = vld [vmem:[#allocation1 + $0x3] sm:$0x1]   ;;  %v23_v2 = vld [vmem:[#allocation1 + $0x1] sm:$0x1]   ;;  %v7_v3 = vld [vmem:[#allocation1] sm:$0x1]  }
   0xa   :  { %12 = vrot.lane.b32.xlu0 %v11_v1, %s39_s0  ;;  %24 = vrot.lane.b32.xlu1 %v23_v2, %s40_s8  ;;  %v17_v4 = vld [vmem:[#allocation1 + $0x2] sm:$0x1]   ;;  %9 = vst.msk [vmem:[#allocation0] sm:$0x1] %vm8_vm0, %v7_v3  }
   0xe   :  { %18 = vrot.lane.b32.xlu0 %v17_v4, %s41_s9 }
  0x7c   :  { %v13_v5 = vpop.permute.xlu0 %12   ;;  %v25_v6 = vpop.permute.xlu1 %24  }
  0x7d   :  { %15 = vst.msk [vmem:[#allocation0] sm:$0x1] %vm14_vm1, %v13_v5  }
  0x80   :  { %v19_v7 = vpop.permute.xlu0 %18  }
  0x81   :  { %21 = vst.msk [vmem:[#allocation0] sm:$0x1] %vm20_vm2, %v19_v7  }
  0x82   :  { %27 = vst.msk [vmem:[#allocation0] sm:$0x1] %vm26_vm3, %v25_v6  }
  0x89   :  { %v32_v8 = vld [vmem:[#allocation0] sm:$0x1] }
  0x8a   :  { %35 = vst [vmem:[%s59_s1] sm:$0x1] %v32_v8 }

// kernel: generator_forward.13
= control target key start
LH: loop header
LB: loop body
LE: loop exit
PB: predicated region body
PF: predicated region fallthrough
CT: control target
= control target key end

     0   :  { %vm318_vm0 = vcmask 261120   ;;  %vm19_vm1 = vcmask 516096   ;;  %v874_v42 = vmov 0.0   ;;  %vm537_vm2 = vcmask 523264   ;;  %s1176_s1 = inlined_call_operand.vmem [shape: bf16[288,64], index: 1, kind: input, shape index: {}]   ;;  %s1177_s0 = inlined_call_operand.vmem [shape: bf16[128,288], index: 0, kind: input, shape index: {}]   ;;  %s1178_s3 = inlined_call_operand.vmem [shape: f32[1,64], index: 3, kind: output, shape index: {1}]   ;;  %s1179_s4 = inlined_call_operand.vmem [shape: f32[1,64], index: 4, kind: output, shape index: {2}]   ;;  %s1180_s2 = inlined_call_operand.vmem [shape: f32[128,64], index: 2, kind: output, shape index: {0}]  }
   0x1   :  { %v824_v0 = vld [vmem:[%s1176_s1 + $0x78] sm:$0xff]   ;;  %v826_v2 = vld [vmem:[%s1176_s1 + $0x70] sm:$0xff]   ;;  %v828_v4 = vld [vmem:[%s1176_s1 + $0x68] sm:$0xff]   ;;  %20 = vst.msk [vmem:[%s1178_s3] sm:$0x1] %vm19_vm1, %v874_v42 }
   0x2   :  { %v825_v1 = vld [vmem:[%s1176_s1 + $0x38] sm:$0xff]   ;;  %713 = vmatprep.subr.bf16.mxu0 %v824_v0  ;;  %807 = vmatprep.subr.bf16.mxu1 %v824_v0  ;;  %v827_v3 = vld [vmem:[%s1176_s1 + $0x30] sm:$0xff]   ;;  %v829_v5 = vld [vmem:[%s1176_s1 + $0x28] sm:$0xff]   ;;  %21 = vst.msk [vmem:[%s1179_s4] sm:$0x1] %vm19_vm1, %v874_v42 }
   0x3   :  { %714 = vmatpush3.bf16.msra.mxu0 %v825_v1  ;;  %815 = vmatpush3.bf16.msra.mxu1 %v825_v1  ;;  %v830_v6 = vld [vmem:[%s1176_s1 + $0x60] sm:$0xff]   ;;  %v832_v8 = vld [vmem:[%s1176_s1 + $0x58] sm:$0xff]   ;;  %v834_v10 = vld [vmem:[%s1176_s1 + $0x50] sm:$0xff]  }
   0x4   :  { %715 = vmatprep.subr.bf16.mxu0 %v826_v2  ;;  %808 = vmatprep.subr.bf16.mxu1 %v826_v2  ;;  %v831_v7 = vld [vmem:[%s1176_s1 + $0x20] sm:$0xff]   ;;  %v833_v9 = vld [vmem:[%s1176_s1 + $0x18] sm:$0xff]   ;;  %v835_v13 = vld [vmem:[%s1176_s1 + $0x10] sm:$0xff]  }
   0x5   :  { %v842_v11 = vld [vmem:[%s1177_s0 + $0x4] ss:$12 sps:$4 sm:$0xff]   ;;  %v845_v12 = vld [vmem:[%s1177_s0 + $0x94] ss:$12 sps:$4 sm:$0xff]   ;;  %v836_v14 = vld [vmem:[%s1176_s1 + $0x48] sm:$0xff]  }
   0x6   :  { %375 = vmatprep.mubr.bf16.mxu0 %v842_v11  ;;  %423 = vmatprep.mubr.bf16.mxu1 %v845_v12  ;;  %v837_v15 = vld [vmem:[%s1176_s1 + $0x8] sm:$0xff]   ;;  %v838_v16 = vld [vmem:[%s1176_s1 + $0x40] sm:$0xff]   ;;  %v843_v20 = vld [vmem:[%s1177_s0 + $0x90] ss:$12 sps:$4 sm:$0xff]  }
   0x7   :  { %716 = vmatpush3.bf16.msra.mxu0 %v827_v3  ;;  %816 = vmatpush3.bf16.msra.mxu1 %v827_v3  ;;  %v839_v17 = vld [vmem:[%s1176_s1] sm:$0xff]   ;;  %v846_v19 = vld [vmem:[%s1176_s1 + $0x88] sm:$0xff]   ;;  %v857_v28 = vld [vmem:[%s1177_s0 + $0x30] ss:$12 sps:$4 sm:$0xff]  }
   0x8   :  { %717 = vmatprep.subr.bf16.mxu0 %v828_v4  ;;  %809 = vmatprep.subr.bf16.mxu1 %v828_v4  ;;  %v840_v18 = vld [vmem:[%s1177_s0] ss:$12 sps:$4 sm:$0xff]   ;;  %v847_v21 = vld [vmem:[%s1177_s0 + $0x1c] ss:$12 sps:$4 sm:$0xff]   ;;  %v851_v24 = vld [vmem:[%s1177_s0 + $0x18] ss:$12 sps:$4 sm:$0xff]  }
   0x9   :  { %v849_v22 = vld [vmem:[%s1177_s0 + $0xac] ss:$12 sps:$4 sm:$0xff]   ;;  %v853_v23 = vld [vmem:[%s1176_s1 + $0x80] sm:$0xff]   ;;  %v852_v25 = vld [vmem:[%s1177_s0 + $0xa8] ss:$12 sps:$4 sm:$0xff]  }
   0xa   :  { %v854_v26 = vld [vmem:[%s1177_s0 + $0x34] ss:$12 sps:$4 sm:$0xff]   ;;  %v859_v30 = vld [vmem:[%s1177_s0 + $0x4c] ss:$12 sps:$4 sm:$0xff]   ;;  %v863_v33 = vld [vmem:[%s1177_s0 + $0x50] ss:$12 sps:$4 sm:$0xff]  }
   0xb   :  { %718 = vmatpush3.bf16.msra.mxu0 %v829_v5  ;;  %817 = vmatpush3.bf16.msra.mxu1 %v829_v5  ;;  %v856_v27 = vld [vmem:[%s1177_s0 + $0x8] ss:$12 sps:$4 sm:$0xff]   ;;  %v858_v29 = vld [vmem:[%s1177_s0 + $0x20] ss:$12 sps:$4 sm:$0xff]   ;;  %v861_v31 = vld [vmem:[%s1177_s0 + $0x38] ss:$12 sps:$4 sm:$0xff]  }
   0xc   :  { %719 = vmatprep.subr.bf16.mxu0 %v830_v6  ;;  %810 = vmatprep.subr.bf16.mxu1 %v830_v6  ;;  %v862_v32 = vld [vmem:[%s1177_s0 + $0x48] ss:$12 sps:$4 sm:$0xff]   ;;  %v864_v34 = vld [vmem:[%s1177_s0 + $0x64] ss:$12 sps:$4 sm:$0xff]   ;;  %v867_v36 = vld [vmem:[%s1177_s0 + $0x60] ss:$12 sps:$4 sm:$0xff]  }
   0xd   :  { %v866_v35 = vld [vmem:[%s1177_s0 + $0x68] ss:$12 sps:$4 sm:$0xff]   ;;  %v868_v37 = vld [vmem:[%s1177_s0 + $0x80] ss:$12 sps:$4 sm:$0xff]   ;;  %v871_v39 = vld [vmem:[%s1177_s0 + $0x98] ss:$12 sps:$4 sm:$0xff]  }
   0xe   :  { %v869_v38 = vld [vmem:[%s1177_s0 + $0x7c] ss:$12 sps:$4 sm:$0xff]   ;;  %v872_v40 = vld [vmem:[%s1177_s0 + $0x78] ss:$12 sps:$4 sm:$0xff]  }
   0xf   :  { %720 = vmatpush3.bf16.msra.mxu0 %v831_v7  ;;  %818 = vmatpush3.bf16.msra.mxu1 %v831_v7  ;;  %v873_v41 = vld [vmem:[%s1177_s0 + $0xb0] ss:$12 sps:$4 sm:$0xff]  }
  0x10   :  { %721 = vmatprep.subr.bf16.mxu0 %v832_v8  ;;  %811 = vmatprep.subr.bf16.mxu1 %v832_v8 }
  0x13   :  { %722 = vmatpush3.bf16.msra.mxu0 %v833_v9  ;;  %819 = vmatpush3.bf16.msra.mxu1 %v833_v9 }
  0x14   :  { %723 = vmatprep.subr.bf16.mxu0 %v834_v10  ;;  %812 = vmatprep.subr.bf16.mxu1 %v834_v10 }
  0x17   :  { %724 = vmatpush3.bf16.msra.mxu0 %v835_v13  ;;  %820 = vmatpush3.bf16.msra.mxu1 %v835_v13 }
  0x18   :  { %725 = vmatprep.subr.bf16.mxu0 %v836_v14  ;;  %813 = vmatprep.subr.bf16.mxu1 %v836_v14 }
  0x1b   :  { %726 = vmatpush3.bf16.msra.mxu0 %v837_v15  ;;  %821 = vmatpush3.bf16.msra.mxu1 %v837_v15 }
  0x1c   :  { %727 = vmatprep.subr.bf16.mxu0 %v838_v16  ;;  %814 = vmatprep.subr.bf16.mxu1 %v838_v16 }
  0x1f   :  { %728 = vmatpush3.bf16.msra.mxu0 %v839_v17  ;;  %822 = vmatpush3.bf16.msra.mxu1 %v839_v17 }
  0x20   :  { %787 = vmatprep.subr.bf16.mxu1 %v846_v19 }
  0x22   :  { %376 = vmatmul.mubr.bf16.vlgmr.msra.gmra.mxu0 %v840_v18  ;;  %424 = vmatmul.mubr.bf16.vlgmr.msra.gmra.mxu1 %v843_v20 }
  0x23   :  { %788 = vmatpush3.bf16.msra.mxu1 %v846_v19  ;;  %383 = vmatprep.mubr.bf16.mxu0 %v847_v21 }
  0x24   :  { %431 = vmatprep.mubr.bf16.mxu1 %v849_v22  ;;  %789 = vmatprep.subr.bf16.mxu1 %v853_v23 }
  0x27   :  { %790 = vmatpush3.bf16.msra.mxu1 %v853_v23 }
  0x2a   :  { %384 = vmatmul.mubr.bf16.gmra.mxu0 %v851_v24  ;;  %432 = vmatmul.mubr.bf16.gmra.mxu1 %v852_v25 }
  0x2b   :  { %391 = vmatprep.mubr.bf16.mxu0 %v854_v26  ;;  %791 = vmatprep.mubr.msk.bf16.mxu1 %vm318_vm0, %v856_v27 }
  0x32   :  { %392 = vmatmul.mubr.bf16.gmra.mxu0 %v857_v28  ;;  %792 = vmatmul.mubr.msk.bf16.vlgmr.msra.gmra.mxu1 %vm318_vm0, %v858_v29 }
  0x33   :  { %399 = vmatprep.mubr.bf16.mxu0 %v859_v30  ;;  %795 = vmatprep.mubr.msk.bf16.mxu1 %vm318_vm0, %v861_v31 }
  0x3a   :  { %400 = vmatmul.mubr.bf16.gmra.mxu0 %v862_v32  ;;  %796 = vmatmul.mubr.msk.bf16.gmra.mxu1 %vm318_vm0, %v863_v33 }
  0x3b   :  { %407 = vmatprep.mubr.bf16.mxu0 %v864_v34  ;;  %799 = vmatprep.mubr.msk.bf16.mxu1 %vm318_vm0, %v866_v35 }
  0x42   :  { %408 = vmatmul.mubr.bf16.gmra.mxu0 %v867_v36  ;;  %800 = vmatmul.mubr.msk.bf16.gmra.mxu1 %vm318_vm0, %v868_v37 }
  0x43   :  { %415 = vmatprep.mubr.bf16.mxu0 %v869_v38  ;;  %803 = vmatprep.mubr.msk.bf16.mxu1 %vm318_vm0, %v871_v39 }
  0x4a   :  { %416 = vmatmul.mubr.bf16.gmra.mxu0 %v872_v40  ;;  %804 = vmatmul.mubr.msk.bf16.gmra.mxu1 %vm318_vm0, %v873_v41 }
  0xe2   :  { %v729_v43 = vpop.f32.mrf.mxu0  ;;  %v1042_v44 = vpop.f32.mrf.mxu1 }
  0xe4   :  { %v730_v45 = vpop.f32.mrf.mxu0  ;;  %v1044_v46 = vpop.f32.mrf.mxu1 }
  0xe5   :  { %v731_v62 = vadd.f32 %v730_v45, %v729_v43 }
  0xe6   :  { %v732_v47 = vpop.f32.mrf.mxu0  ;;  %v1046_v48 = vpop.f32.mrf.mxu1 }
  0xe8   :  { %v733_v49 = vpop.f32.mrf.mxu0  ;;  %v1048_v50 = vpop.f32.mrf.mxu1 }
  0xe9   :  { %v734_v7 = vadd.f32 %v733_v49, %v732_v47 }
  0xea   :  { %v735_v51 = vpop.f32.mrf.mxu0  ;;  %v1050_v52 = vpop.f32.mrf.mxu1 }
  0xec   :  { %v736_v53 = vpop.f32.mrf.mxu0  ;;  %v1052_v54 = vpop.f32.mrf.mxu1 }
  0xed   :  { %v737_v59 = vadd.f32 %v736_v53, %v735_v51 }
  0xee   :  { %v738_v55 = vpop.f32.mrf.mxu0  ;;  %v1054_v56 = vpop.f32.mrf.mxu1 }
  0xf0   :  { %v739_v57 = vpop.f32.mrf.mxu0  ;;  %v1056_v58 = vpop.f32.mrf.mxu1 }
  0xf1   :  { %v740_v2 = vadd.f32 %v739_v57, %v738_v55 }
  0xf2   :  { %v741_v60 = vpop.f32.mrf.mxu0  ;;  %v793_v61 = vpop.f32.mrf.mxu1 }
  0xf3   :  { %v483_v63 = vadd.f32 %v793_v61, %v737_v59 }
  0xf4   :  { %v742_v0 = vpop.f32.mrf.mxu0  ;;  %v474_v1 = vpop.f32.mrf.mxu1 }
  0xf5   :  { %540 = vst.msk [vmem:[%s1180_s2 + $0x10] sm:$0xff] %vm537_vm2, %v483_v63  ;;  %v475_v3 = vadd.f32 %v731_v62, %v474_v1  ;;  %v743_v14 = vadd.f32 %v742_v0, %v741_v60  ;;  %v598_v15 = vmul.f32 %v483_v63, %v483_v63  ;;  %v558_v24 = vsel %vm537_vm2, %v483_v63, 0.0 }
  0xf6   :  { %v744_v4 = vpop.f32.mrf.mxu0  ;;  %v794_v5 = vpop.f32.mrf.mxu1 }
  0xf7   :  { %538 = vst.msk [vmem:[%s1180_s2] sm:$0xff] %vm537_vm2, %v475_v3  ;;  %v486_v6 = vadd.f32 %v794_v5, %v740_v2  ;;  %v596_v10 = vmul.f32 %v475_v3, %v475_v3  ;;  %v555_v16 = vsel %vm537_vm2, %v475_v3, 0.0  ;;  %v615_v33 = vsel %vm537_vm2, %v598_v15, 0.0 }
  0xf8   :  { %v745_v8 = vpop.f32.mrf.mxu0  ;;  %v477_v9 = vpop.f32.mrf.mxu1 }
  0xf9   :  { %541 = vst.msk [vmem:[%s1180_s2 + $0x18] sm:$0xff] %vm537_vm2, %v486_v6  ;;  %v478_v11 = vadd.f32 %v734_v7, %v477_v9  ;;  %v612_v25 = vsel %vm537_vm2, %v596_v10, 0.0  ;;  %v599_v26 = vmul.f32 %v486_v6, %v486_v6  ;;  %v560_v34 = vsel %vm537_vm2, %v486_v6, 0.0 }
  0xfa   :  { %v747_v12 = vpop.f32.mrf.mxu0  ;;  %v797_v13 = vpop.f32.mrf.mxu1  ;;  %v746_v35 = vadd.f32 %v745_v8, %v744_v4 }
  0xfb   :  { %539 = vst.msk [vmem:[%s1180_s2 + $0x8] sm:$0xff] %vm537_vm2, %v478_v11  ;;  %v556_v17 = vsel %vm537_vm2, %v478_v11, 0.0  ;;  %v597_v18 = vmul.f32 %v478_v11, %v478_v11  ;;  %v617_v41 = vsel %vm537_vm2, %v599_v26, 0.0  ;;  %v773_v11 = vadd.f32 %v1052_v54, %v1050_v52 }
  0xfc   :  { %v748_v19 = vpop.f32.mrf.mxu0  ;;  %v490_v20 = vpop.f32.mrf.mxu1  ;;  %v557_v21 = vadd.f32 %v556_v17, %v555_v16 }
  0xfd   :  { %v749_v22 = vadd.f32 %v748_v19, %v747_v12  ;;  %v491_v23 = vadd.f32 %v743_v14, %v490_v20  ;;  %v613_v27 = vsel %vm537_vm2, %v597_v18, 0.0  ;;  %v767_v20 = vadd.f32 %v1044_v46, %v1042_v44 }
  0xfe   :  { %v750_v28 = vpop.f32.mrf.mxu0  ;;  %v798_v29 = vpop.f32.mrf.mxu1  ;;  %v559_v30 = vadd.f32 %v558_v24, %v557_v21  ;;  %v614_v31 = vadd.f32 %v613_v27, %v612_v25  ;;  %v776_v24 = vadd.f32 %v1056_v58, %v1054_v56 }
  0xff   :  { %v499_v32 = vadd.f32 %v797_v13, %v749_v22  ;;  %542 = vst.msk [vmem:[%s1180_s2 + $0x20] sm:$0xff] %vm537_vm2, %v491_v23  ;;  %v600_v36 = vmul.f32 %v491_v23, %v491_v23  ;;  %v562_v42 = vsel %vm537_vm2, %v491_v23, 0.0 }
 0x100   :  { %v751_v37 = vpop.f32.mrf.mxu0  ;;  %v493_v38 = vpop.f32.mrf.mxu1  ;;  %v616_v39 = vadd.f32 %v615_v33, %v614_v31  ;;  %v561_v40 = vadd.f32 %v560_v34, %v559_v30 }
 0x101   :  { %544 = vst.msk [vmem:[%s1180_s2 + $0x30] sm:$0xff] %vm537_vm2, %v499_v32  ;;  %v752_v43 = vadd.f32 %v751_v37, %v750_v28  ;;  %v494_v45 = vadd.f32 %v746_v35, %v493_v38  ;;  %v619_v55 = vsel %vm537_vm2, %v600_v36, 0.0  ;;  %v602_v2 = vmul.f32 %v499_v32, %v499_v32 }
 0x102   :  { %v753_v47 = vpop.f32.mrf.mxu0  ;;  %v801_v49 = vpop.f32.mrf.mxu1  ;;  %v563_v51 = vadd.f32 %v562_v42, %v561_v40  ;;  %v618_v53 = vadd.f32 %v617_v41, %v616_v39  ;;  %v566_v8 = vsel %vm537_vm2, %v499_v32, 0.0  ;;  %v770_v36 = vadd.f32 %v1048_v50, %v1046_v48 }
 0x103   :  { %v502_v57 = vadd.f32 %v798_v29, %v752_v43  ;;  %543 = vst.msk [vmem:[%s1180_s2 + $0x28] sm:$0xff] %vm537_vm2, %v494_v45  ;;  %v564_v59 = vsel %vm537_vm2, %v494_v45, 0.0  ;;  %v601_v60 = vmul.f32 %v494_v45, %v494_v45  ;;  %v623_v13 = vsel %vm537_vm2, %v602_v2, 0.0 }
 0x104   :  { %v754_v61 = vpop.f32.mrf.mxu0  ;;  %v506_v62 = vpop.f32.mrf.mxu1  ;;  %v620_v63 = vadd.f32 %v619_v55, %v618_v53  ;;  %v565_v0 = vadd.f32 %v564_v59, %v563_v51 }
 0x105   :  { %v755_v1 = vadd.f32 %v754_v61, %v753_v47  ;;  %545 = vst.msk [vmem:[%s1180_s2 + $0x38] sm:$0xff] %vm537_vm2, %v502_v57  ;;  %v621_v3 = vsel %vm537_vm2, %v601_v60, 0.0  ;;  %v603_v14 = vmul.f32 %v502_v57, %v502_v57  ;;  %v568_v21 = vsel %vm537_vm2, %v502_v57, 0.0 }
 0x106   :  { %v756_v4 = vpop.f32.mrf.mxu0  ;;  %v802_v5 = vpop.f32.mrf.mxu1  ;;  %v622_v6 = vadd.f32 %v621_v3, %v620_v63  ;;  %v567_v12 = vadd.f32 %v566_v8, %v565_v0 }
 0x107   :  { %v507_v7 = vadd.f32 %v755_v1, %v506_v62  ;;  %v625_v27 = vsel %vm537_vm2, %v603_v14, 0.0 }
 0x108   :  { %v757_v9 = vpop.f32.mrf.mxu0  ;;  %v509_v10 = vpop.f32.mrf.mxu1  ;;  %v624_v18 = vadd.f32 %v623_v13, %v622_v6  ;;  %v569_v25 = vadd.f32 %v568_v21, %v567_v12 }
 0x109   :  { %546 = vst.msk [vmem:[%s1180_s2 + $0x40] sm:$0xff] %vm537_vm2, %v507_v7  ;;  %v758_v15 = vadd.f32 %v757_v9, %v756_v4  ;;  %v604_v52 = vmul.f32 %v507_v7, %v507_v7  ;;  %v570_v44 = vsel %vm537_vm2, %v507_v7, 0.0 }
 0x10a   :  { %v759_v16 = vpop.f32.mrf.mxu0  ;;  %v805_v17 = vpop.f32.mrf.mxu1  ;;  %v626_v58 = vadd.f32 %v625_v27, %v624_v18  ;;  %v571_v37 = vadd.f32 %v570_v44, %v569_v25  ;;  %v595_v27 = vld [vmem:[%s1179_s4] sm:$0x1] }
 0x10b   :  { %v531_v19 = vadd.f32 %v805_v17, %v773_v11  ;;  %v510_v54 = vadd.f32 %v758_v15, %v509_v10  ;;  %v627_v32 = vsel %vm537_vm2, %v604_v52, 0.0 }
 0x10c   :  { %v760_v22 = vpop.f32.mrf.mxu0  ;;  %v522_v23 = vpop.f32.mrf.mxu1  ;;  %v628_v42 = vadd.f32 %v627_v32, %v626_v58 }
 0x10d   :  { %552 = vst.msk [vmem:[%s1180_s2 + $0x70] sm:$0xff] %vm537_vm2, %v531_v19  ;;  %v761_v26 = vadd.f32 %v760_v22, %v759_v16  ;;  %547 = vst.msk [vmem:[%s1180_s2 + $0x48] sm:$0xff] %vm537_vm2, %v510_v54  ;;  %v605_v46 = vmul.f32 %v510_v54, %v510_v54  ;;  %v523_v28 = vadd.f32 %v767_v20, %v522_v23  ;;  %v572_v33 = vsel %vm537_vm2, %v510_v54, 0.0 }
 0x10e   :  { %v762_v29 = vpop.f32.mrf.mxu0  ;;  %v806_v56 = vpop.f32.mrf.mxu1  ;;  %v573_v43 = vadd.f32 %v572_v33, %v571_v37  ;;  %v610_v1 = vmul.f32 %v531_v19, %v531_v19  ;;  %v582_v6 = vsel %vm537_vm2, %v531_v19, 0.0 }
 0x10f   :  { %v515_v30 = vadd.f32 %v801_v49, %v761_v26  ;;  %v534_v31 = vadd.f32 %v806_v56, %v776_v24  ;;  %550 = vst.msk [vmem:[%s1180_s2 + $0x60] sm:$0xff] %vm537_vm2, %v523_v28  ;;  %v629_v39 = vsel %vm537_vm2, %v605_v46, 0.0  ;;  %v608_v51 = vmul.f32 %v523_v28, %v523_v28  ;;  %v554_v24 = vld [vmem:[%s1178_s3] sm:$0x1] }
 0x110   :  { %v763_v34 = vpop.f32.mrf.mxu0  ;;  %v525_v35 = vpop.f32.mrf.mxu1  ;;  %v630_v47 = vadd.f32 %v629_v39, %v628_v42  ;;  %v578_v60 = vsel %vm537_vm2, %v523_v28, 0.0  ;;  %v639_v11 = vsel %vm537_vm2, %v610_v1, 0.0 }
 0x111   :  { %548 = vst.msk [vmem:[%s1180_s2 + $0x50] sm:$0xff] %vm537_vm2, %v515_v30  ;;  %v606_v38 = vmul.f32 %v515_v30, %v515_v30  ;;  %553 = vst.msk [vmem:[%s1180_s2 + $0x78] sm:$0xff] %vm537_vm2, %v534_v31  ;;  %v574_v40 = vsel %vm537_vm2, %v515_v30, 0.0  ;;  %v764_v41 = vadd.f32 %v763_v34, %v762_v29  ;;  %v526_v48 = vadd.f32 %v770_v36, %v525_v35 }
 0x112   :  { %v575_v49 = vadd.f32 %v574_v40, %v573_v43  ;;  %v635_v2 = vsel %vm537_vm2, %v608_v51, 0.0  ;;  %v611_v7 = vmul.f32 %v534_v31, %v534_v31  ;;  %v584_v12 = vsel %vm537_vm2, %v534_v31, 0.0 }
 0x113   :  { %v631_v50 = vsel %vm537_vm2, %v606_v38, 0.0  ;;  %v518_v45 = vadd.f32 %v802_v5, %v764_v41  ;;  %551 = vst.msk [vmem:[%s1180_s2 + $0x68] sm:$0xff] %vm537_vm2, %v526_v48  ;;  %v609_v62 = vmul.f32 %v526_v48, %v526_v48  ;;  %v580_v3 = vsel %vm537_vm2, %v526_v48, 0.0 }
 0x114   :  { %v632_v57 = vadd.f32 %v631_v50, %v630_v47  ;;  %v641_v15 = vsel %vm537_vm2, %v611_v7, 0.0 }
 0x115   :  { %549 = vst.msk [vmem:[%s1180_s2 + $0x58] sm:$0xff] %vm537_vm2, %v518_v45  ;;  %v576_v53 = vsel %vm537_vm2, %v518_v45, 0.0  ;;  %v607_v55 = vmul.f32 %v518_v45, %v518_v45  ;;  %v637_v8 = vsel %vm537_vm2, %v609_v62, 0.0 }
 0x116   :  { %v577_v59 = vadd.f32 %v576_v53, %v575_v49 }
 0x117   :  { %v633_v61 = vsel %vm537_vm2, %v607_v55, 0.0 }
 0x118   :  { %v634_v63 = vadd.f32 %v633_v61, %v632_v57  ;;  %v579_v0 = vadd.f32 %v578_v60, %v577_v59 }
 0x11a   :  { %v581_v4 = vadd.f32 %v580_v3, %v579_v0  ;;  %v636_v5 = vadd.f32 %v635_v2, %v634_v63 }
 0x11c   :  { %v583_v9 = vadd.f32 %v582_v6, %v581_v4  ;;  %v638_v10 = vadd.f32 %v637_v8, %v636_v5 }
 0x11e   :  { %v585_v13 = vadd.f32 %v584_v12, %v583_v9  ;;  %v640_v14 = vadd.f32 %v639_v11, %v638_v10 }
 0x120   :  { %v586_v16 = vrot.slane %v585_v13, 4  ;;  %v642_v17 = vadd.f32 %v641_v15, %v640_v14 }
 0x122   :  { %v587_v18 = vadd.f32 %v586_v16, %v585_v13  ;;  %v643_v20 = vrot.slane %v642_v17, 4 }
 0x124   :  { %v588_v21 = vrot.slane %v587_v18, 2  ;;  %v644_v52 = vadd.f32 %v643_v20, %v642_v17 }
 0x126   :  { %v589_v19 = vadd.f32 %v588_v21, %v587_v18  ;;  %v645_v54 = vrot.slane %v644_v52, 2 }
 0x128   :  { %v590_v22 = vrot.slane %v589_v19, 1  ;;  %v646_v23 = vadd.f32 %v645_v54, %v644_v52 }
 0x12a   :  { %v591_v25 = vadd.f32 %v590_v22, %v589_v19  ;;  %v647_v26 = vrot.slane %v646_v23, 1 }
 0x12c   :  { %v592_v44 = vadd.f32 %v591_v25, %v554_v24  ;;  %v648_v46 = vadd.f32 %v647_v26, %v646_v23 }
 0x12e   :  { %594 = vst.msk [vmem:[%s1178_s3] sm:$0x1] %vm19_vm1, %v592_v44  ;;  %v649_v28 = vadd.f32 %v648_v46, %v595_v27 }
 0x130   :  { %650 = vst.msk [vmem:[%s1179_s4] sm:$0x1] %vm19_vm1, %v649_v28 }

// kernel: generator_forward.14
= control target key start
LH: loop header
LB: loop body
LE: loop exit
PB: predicated region body
PF: predicated region fallthrough
CT: control target
= control target key end

     0   :  { %vm156_vm0 = vcmask 519168   ;;  %s385_s0 = inlined_call_operand.vmem [shape: f32[128,64], index: 0, kind: input, shape index: {}]   ;;  %s386_s1 = inlined_call_operand.vmem [shape: f32[1,64], index: 1, kind: input, shape index: {}]   ;;  %s387_s2 = inlined_call_operand.vmem [shape: f32[1,64], index: 2, kind: input, shape index: {}]   ;;  %s388_s3 = inlined_call_operand.vmem [shape: bf16[128,64], index: 3, kind: output, shape index: {}]  }
   0x1   :  { %v14_v0 = vld [vmem:[%s385_s0] sm:$0xff]  ;;  %v15_v4 = vld [vmem:[%s385_s0 + $0x8] sm:$0xff]  ;;  %v16_v5 = vld [vmem:[%s385_s0 + $0x10] sm:$0xff] }
   0x2   :  { %v237_v1 = vld [vmem:[%s386_s1] ss:$0 sm:$0xff]  ;;  %v17_v6 = vld [vmem:[%s385_s0 + $0x18] sm:$0xff]  ;;  %v19_v11 = vld [vmem:[%s385_s0 + $0x28] sm:$0xff] }
   0x3   :  { %v242_v2 = vld [vmem:[%s387_s2] ss:$0 sm:$0xff]  ;;  %v37_v3 = vmul.f32 %v237_v1, %v14_v0  ;;  %v38_v7 = vmul.f32 %v237_v1, %v15_v4  ;;  %v39_v8 = vmul.f32 %v237_v1, %v16_v5  ;;  %v40_v9 = vmul.f32 %v237_v1, %v17_v6  ;;  %v20_v12 = vld [vmem:[%s385_s0 + $0x30] sm:$0xff]  ;;  %v21_v17 = vld [vmem:[%s385_s0 + $0x38] sm:$0xff] }
   0x4   :  { %v18_v10 = vld [vmem:[%s385_s0 + $0x20] sm:$0xff]  ;;  %v42_v15 = vmul.f32 %v237_v1, %v19_v11  ;;  %v43_v16 = vmul.f32 %v237_v1, %v20_v12  ;;  %v44_v21 = vmul.f32 %v237_v1, %v21_v17  ;;  %v23_v35 = vld [vmem:[%s385_s0 + $0x48] sm:$0xff]  ;;  %v24_v36 = vld [vmem:[%s385_s0 + $0x50] sm:$0xff] }
   0x5   :  { %v60_v13 = vadd.f32 %v242_v2, %v37_v3  ;;  %v41_v14 = vmul.f32 %v237_v1, %v18_v10  ;;  %v61_v18 = vadd.f32 %v242_v2, %v38_v7  ;;  %v62_v19 = vadd.f32 %v242_v2, %v39_v8  ;;  %v22_v30 = vld [vmem:[%s385_s0 + $0x40] sm:$0xff]  ;;  %v25_v37 = vld [vmem:[%s385_s0 + $0x58] sm:$0xff]  ;;  %v27_v43 = vld [vmem:[%s385_s0 + $0x68] sm:$0xff] }
   0x6   :  { %v63_v20 = vadd.f32 %v242_v2, %v40_v9  ;;  %v65_v24 = vadd.f32 %v242_v2, %v42_v15  ;;  %v66_v25 = vadd.f32 %v242_v2, %v43_v16  ;;  %v67_v29 = vadd.f32 %v242_v2, %v44_v21  ;;  %v26_v42 = vld [vmem:[%s385_s0 + $0x60] sm:$0xff]  ;;  %v28_v44 = vld [vmem:[%s385_s0 + $0x70] sm:$0xff]  ;;  %v29_v49 = vld [vmem:[%s385_s0 + $0x78] sm:$0xff] }
   0x7   :  { %v76_v22 = vmax.f32 %v60_v13, 0.0  ;;  %v64_v23 = vadd.f32 %v242_v2, %v41_v14  ;;  %v77_v26 = vmax.f32 %v61_v18, 0.0  ;;  %v78_v27 = vmax.f32 %v62_v19, 0.0 }
   0x8   :  { %v79_v28 = vmax.f32 %v63_v20, 0.0  ;;  %v81_v33 = vmax.f32 %v65_v24, 0.0  ;;  %v82_v34 = vmax.f32 %v66_v25, 0.0  ;;  %v83_v41 = vmax.f32 %v67_v29, 0.0 }
   0x9   :  { %v195_v31 = vpack.c.bf16 %v76_v22, %v76_v22  ;;  %v80_v32 = vmax.f32 %v64_v23, 0.0  ;;  %v196_v38 = vpack.c.bf16 %v77_v26, %v77_v26  ;;  %v197_v39 = vpack.c.bf16 %v78_v27, %v78_v27 }
   0xa   :  { %v198_v40 = vpack.c.bf16 %v79_v28, %v79_v28  ;;  %v200_v46 = vpack.c.bf16 %v81_v33, %v81_v33  ;;  %v201_v47 = vpack.c.bf16 %v82_v34, %v82_v34  ;;  %v45_v48 = vmul.f32 %v237_v1, %v22_v30 }
   0xb   :  { %157 = vst.msk [vmem:[%s388_s3] sm:$0xf] %vm156_vm0, %v195_v31  ;;  %v199_v45 = vpack.c.bf16 %v80_v32, %v80_v32  ;;  %158 = vst.msk [vmem:[%s388_s3 + $0x4] sm:$0xf] %vm156_vm0, %v196_v38  ;;  %v202_v50 = vpack.c.bf16 %v83_v41, %v83_v41  ;;  %v46_v51 = vmul.f32 %v237_v1, %v23_v35 }
   0xc   :  { %159 = vst.msk [vmem:[%s388_s3 + $0x8] sm:$0xf] %vm156_vm0, %v197_v39  ;;  %160 = vst.msk [vmem:[%s388_s3 + $0xc] sm:$0xf] %vm156_vm0, %v198_v40  ;;  %v47_v52 = vmul.f32 %v237_v1, %v24_v36  ;;  %v48_v53 = vmul.f32 %v237_v1, %v25_v37  ;;  %v68_v54 = vadd.f32 %v242_v2, %v45_v48 }
   0xd   :  { %161 = vst.msk [vmem:[%s388_s3 + $0x10] sm:$0xf] %vm156_vm0, %v199_v45  ;;  %162 = vst.msk [vmem:[%s388_s3 + $0x14] sm:$0xf] %vm156_vm0, %v200_v46  ;;  %v49_v55 = vmul.f32 %v237_v1, %v26_v42  ;;  %v50_v56 = vmul.f32 %v237_v1, %v27_v43  ;;  %v51_v57 = vmul.f32 %v237_v1, %v28_v44 }
   0xe   :  { %163 = vst.msk [vmem:[%s388_s3 + $0x18] sm:$0xf] %vm156_vm0, %v201_v47  ;;  %164 = vst.msk [vmem:[%s388_s3 + $0x1c] sm:$0xf] %vm156_vm0, %v202_v50  ;;  %v69_v58 = vadd.f32 %v242_v2, %v46_v51  ;;  %v70_v59 = vadd.f32 %v242_v2, %v47_v52  ;;  %v71_v60 = vadd.f32 %v242_v2, %v48_v53  ;;  %v84_v62 = vmax.f32 %v68_v54, 0.0 }
   0xf   :  { %v52_v61 = vmul.f32 %v237_v1, %v29_v49  ;;  %v72_v63 = vadd.f32 %v242_v2, %v49_v55  ;;  %v73_v0 = vadd.f32 %v242_v2, %v50_v56  ;;  %v74_v3 = vadd.f32 %v242_v2, %v51_v57 }
  0x10   :  { %v85_v4 = vmax.f32 %v69_v58, 0.0  ;;  %v86_v5 = vmax.f32 %v70_v59, 0.0  ;;  %v87_v6 = vmax.f32 %v71_v60, 0.0  ;;  %v203_v8 = vpack.c.bf16 %v84_v62, %v84_v62 }
  0x11   :  { %v75_v7 = vadd.f32 %v242_v2, %v52_v61  ;;  %v88_v9 = vmax.f32 %v72_v63, 0.0  ;;  %v89_v10 = vmax.f32 %v73_v0, 0.0  ;;  %v90_v11 = vmax.f32 %v74_v3, 0.0 }
  0x12   :  { %v204_v12 = vpack.c.bf16 %v85_v4, %v85_v4  ;;  %v205_v13 = vpack.c.bf16 %v86_v5, %v86_v5  ;;  %v206_v14 = vpack.c.bf16 %v87_v6, %v87_v6  ;;  %165 = vst.msk [vmem:[%s388_s3 + $0x20] sm:$0xf] %vm156_vm0, %v203_v8 }
  0x13   :  { %v91_v1 = vmax.f32 %v75_v7, 0.0  ;;  %v207_v15 = vpack.c.bf16 %v88_v9, %v88_v9  ;;  %v208_v16 = vpack.c.bf16 %v89_v10, %v89_v10  ;;  %v209_v17 = vpack.c.bf16 %v90_v11, %v90_v11 }
  0x14   :  { %166 = vst.msk [vmem:[%s388_s3 + $0x24] sm:$0xf] %vm156_vm0, %v204_v12  ;;  %167 = vst.msk [vmem:[%s388_s3 + $0x28] sm:$0xf] %vm156_vm0, %v205_v13 }
  0x15   :  { %168 = vst.msk [vmem:[%s388_s3 + $0x2c] sm:$0xf] %vm156_vm0, %v206_v14  ;;  %v210_v2 = vpack.c.bf16 %v91_v1, %v91_v1  ;;  %169 = vst.msk [vmem:[%s388_s3 + $0x30] sm:$0xf] %vm156_vm0, %v207_v15 }
  0x16   :  { %170 = vst.msk [vmem:[%s388_s3 + $0x34] sm:$0xf] %vm156_vm0, %v208_v16  ;;  %171 = vst.msk [vmem:[%s388_s3 + $0x38] sm:$0xf] %vm156_vm0, %v209_v17 }
  0x17   :  { %172 = vst.msk [vmem:[%s388_s3 + $0x3c] sm:$0xf] %vm156_vm0, %v210_v2 }

// kernel: tile.73
= control target key start
LH: loop header
LB: loop body
LE: loop exit
PB: predicated region body
PF: predicated region fallthrough
CT: control target
= control target key end

     0   :  { %s22_s0 = inlined_call_operand.vmem [shape: f32[8], index: 0, kind: input, shape index: {}]   ;;  %s23_s1 = inlined_call_operand.vmem [shape: f32[4,8], index: 1, kind: output, shape index: {}]  }
   0x1   :  { %v4_v0 = vld [vmem:[%s22_s0] ss:$0 sm:$0xff] }
   0x2   :  { %5 = vst [vmem:[%s23_s1] sm:$0xf] %v4_v0 }

// kernel: tile.74
= control target key start
LH: loop header
LB: loop body
LE: loop exit
PB: predicated region body
PF: predicated region fallthrough
CT: control target
= control target key end

     0   :  { %vm8_vm0 = vcmask 64512   ;;  %s40_s8 = smov 8   ;;  %s41_s9 = smov 16   ;;  %vm14_vm1 = vcmask 261312   ;;  %vm20_vm2 = vcmask 195712   ;;  %vm26_vm3 = vcmask 130112   ;;  %s58_s0 = inlined_call_operand.vmem [shape: f32[4,8], index: 0, kind: input, shape index: {}]   ;;  %s59_s1 = inlined_call_operand.vmem [shape: f32[1,32], index: 1, kind: output, shape index: {}]  }
   0x1   :  { %v5_v0 = vld [vmem:[%s58_s0] sm:$0xf]  ;;  %s39_s0 = smov 24  }
   0x2   :  { %6 = vst [vmem:[#allocation1] sm:$0xf] %v5_v0 }
   0x9   :  { %v11_v1 = vld [vmem:[#allocation1 + $0x3] sm:$0x1]   ;;  %v23_v2 = vld [vmem:[#allocation1 + $0x1] sm:$0x1]   ;;  %v7_v3 = vld [vmem:[#allocation1] sm:$0x1]  }
   0xa   :  { %12 = vrot.lane.b32.xlu0 %v11_v1, %s39_s0  ;;  %24 = vrot.lane.b32.xlu1 %v23_v2, %s40_s8  ;;  %v17_v4 = vld [vmem:[#allocation1 + $0x2] sm:$0x1]   ;;  %9 = vst.msk [vmem:[#allocation0] sm:$0x1] %vm8_vm0, %v7_v3  }
   0xe   :  { %18 = vrot.lane.b32.xlu0 %v17_v4, %s41_s9 }
  0x7c   :  { %v13_v5 = vpop.permute.xlu0 %12   ;;  %v25_v6 = vpop.permute.xlu1 %24  }
  0x7d   :  { %15 = vst.msk [vmem:[#allocation0] sm:$0x1] %vm14_vm1, %v13_v5  }
  0x80   :  { %v19_v7 = vpop.permute.xlu0 %18  }
  0x81   :  { %21 = vst.msk [vmem:[#allocation0] sm:$0x1] %vm20_vm2, %v19_v7  }
  0x82   :  { %27 = vst.msk [vmem:[#allocation0] sm:$0x1] %vm26_vm3, %v25_v6  }
  0x89   :  { %v32_v8 = vld [vmem:[#allocation0] sm:$0x1] }
  0x8a   :  { %35 = vst [vmem:[%s59_s1] sm:$0x1] %v32_v8 }

// kernel: generator_forward.16
= control target key start
LH: loop header
LB: loop body
LE: loop exit
PB: predicated region body
PF: predicated region fallthrough
CT: control target
= control target key end

     0   :  { %vm540_vm0 = vcmask 257024   ;;  %s1345_s0 = inlined_call_operand.vmem [shape: f32[512,32], index: 0, kind: input, shape index: {}]   ;;  %s1346_s1 = inlined_call_operand.vmem [shape: f32[1,32], index: 1, kind: input, shape index: {}]   ;;  %s1347_s2 = inlined_call_operand.vmem [shape: f32[1,32], index: 2, kind: input, shape index: {}]   ;;  %s1348_s3 = inlined_call_operand.vmem [shape: bf16[512,32], index: 3, kind: output, shape index: {}]  }
   0x1   :  { %v14_v0 = vld [vmem:[%s1345_s0] sm:$0xff]  ;;  %v15_v4 = vld [vmem:[%s1345_s0 + $0x8] sm:$0xff]  ;;  %v16_v5 = vld [vmem:[%s1345_s0 + $0x10] sm:$0xff] }
   0x2   :  { %v765_v1 = vld [vmem:[%s1346_s1] ss:$0 sm:$0xff]  ;;  %v17_v6 = vld [vmem:[%s1345_s0 + $0x18] sm:$0xff]  ;;  %v19_v11 = vld [vmem:[%s1345_s0 + $0x28] sm:$0xff] }
   0x3   :  { %v770_v2 = vld [vmem:[%s1347_s2] ss:$0 sm:$0xff]  ;;  %v85_v3 = vmul.f32 %v765_v1, %v14_v0  ;;  %v86_v7 = vmul.f32 %v765_v1, %v15_v4  ;;  %v87_v8 = vmul.f32 %v765_v1, %v16_v5  ;;  %v88_v9 = vmul.f32 %v765_v1, %v17_v6  ;;  %v20_v12 = vld [vmem:[%s1345_s0 + $0x30] sm:$0xff]  ;;  %v21_v17 = vld [vmem:[%s1345_s0 + $0x38] sm:$0xff] }
   0x4   :  { %v18_v10 = vld [vmem:[%s1345_s0 + $0x20] sm:$0xff]  ;;  %v90_v15 = vmul.f32 %v765_v1, %v19_v11  ;;  %v91_v16 = vmul.f32 %v765_v1, %v20_v12  ;;  %v92_v21 = vmul.f32 %v765_v1, %v21_v17  ;;  %v23_v35 = vld [vmem:[%s1345_s0 + $0x48] sm:$0xff]  ;;  %v24_v36 = vld [vmem:[%s1345_s0 + $0x50] sm:$0xff] }
   0x5   :  { %v156_v13 = vadd.f32 %v770_v2, %v85_v3  ;;  %v89_v14 = vmul.f32 %v765_v1, %v18_v10  ;;  %v157_v18 = vadd.f32 %v770_v2, %v86_v7  ;;  %v158_v19 = vadd.f32 %v770_v2, %v87_v8  ;;  %v22_v30 = vld [vmem:[%s1345_s0 + $0x40] sm:$0xff]  ;;  %v25_v37 = vld [vmem:[%s1345_s0 + $0x58] sm:$0xff]  ;;  %v27_v43 = vld [vmem:[%s1345_s0 + $0x68] sm:$0xff] }
   0x6   :  { %v159_v20 = vadd.f32 %v770_v2, %v88_v9  ;;  %v161_v24 = vadd.f32 %v770_v2, %v90_v15  ;;  %v162_v25 = vadd.f32 %v770_v2, %v91_v16  ;;  %v163_v29 = vadd.f32 %v770_v2, %v92_v21  ;;  %v26_v42 = vld [vmem:[%s1345_s0 + $0x60] sm:$0xff]  ;;  %v28_v44 = vld [vmem:[%s1345_s0 + $0x70] sm:$0xff]  ;;  %v29_v49 = vld [vmem:[%s1345_s0 + $0x78] sm:$0xff] }
   0x7   :  { %v220_v22 = vmax.f32 %v156_v13, 0.0  ;;  %v160_v23 = vadd.f32 %v770_v2, %v89_v14  ;;  %v221_v26 = vmax.f32 %v157_v18, 0.0  ;;  %v222_v27 = vmax.f32 %v158_v19, 0.0  ;;  %v30_v8 = vld [vmem:[%s1345_s0 + $0x80] sm:$0xff]  ;;  %v31_v13 = vld [vmem:[%s1345_s0 + $0x88] sm:$0xff]  ;;  %v32_v14 = vld [vmem:[%s1345_s0 + $0x90] sm:$0xff] }
   0x8   :  { %v223_v28 = vmax.f32 %v159_v20, 0.0  ;;  %v225_v33 = vmax.f32 %v161_v24, 0.0  ;;  %v226_v34 = vmax.f32 %v162_v25, 0.0  ;;  %v227_v41 = vmax.f32 %v163_v29, 0.0  ;;  %v33_v15 = vld [vmem:[%s1345_s0 + $0x98] sm:$0xff]  ;;  %v34_v20 = vld [vmem:[%s1345_s0 + $0xa0] sm:$0xff] }
   0x9   :  { %v675_v31 = vpack.c.bf16 %v220_v22, %v220_v22  ;;  %v224_v32 = vmax.f32 %v160_v23, 0.0  ;;  %v676_v38 = vpack.c.bf16 %v221_v26, %v221_v26  ;;  %v677_v39 = vpack.c.bf16 %v222_v27, %v222_v27  ;;  %v35_v21 = vld [vmem:[%s1345_s0 + $0xa8] sm:$0xff]  ;;  %v36_v22 = vld [vmem:[%s1345_s0 + $0xb0] sm:$0xff]  ;;  %v37_v27 = vld [vmem:[%s1345_s0 + $0xb8] sm:$0xff] }
   0xa   :  { %v678_v40 = vpack.c.bf16 %v223_v28, %v223_v28  ;;  %v680_v46 = vpack.c.bf16 %v225_v33, %v225_v33  ;;  %v681_v47 = vpack.c.bf16 %v226_v34, %v226_v34  ;;  %v93_v48 = vmul.f32 %v765_v1, %v22_v30 }
   0xb   :  { %541 = vst.msk [vmem:[%s1348_s3] sm:$0xf] %vm540_vm0, %v675_v31  ;;  %v679_v45 = vpack.c.bf16 %v224_v32, %v224_v32  ;;  %542 = vst.msk [vmem:[%s1348_s3 + $0x4] sm:$0xf] %vm540_vm0, %v676_v38  ;;  %v682_v50 = vpack.c.bf16 %v227_v41, %v227_v41  ;;  %v94_v51 = vmul.f32 %v765_v1, %v23_v35 }
   0xc   :  { %543 = vst.msk [vmem:[%s1348_s3 + $0x8] sm:$0xf] %vm540_vm0, %v677_v39  ;;  %544 = vst.msk [vmem:[%s1348_s3 + $0xc] sm:$0xf] %vm540_vm0, %v678_v40  ;;  %v95_v52 = vmul.f32 %v765_v1, %v24_v36  ;;  %v96_v53 = vmul.f32 %v765_v1, %v25_v37  ;;  %v164_v54 = vadd.f32 %v770_v2, %v93_v48  ;;  %v38_v48 = vld [vmem:[%s1345_s0 + $0xc0] sm:$0xff] }
   0xd   :  { %545 = vst.msk [vmem:[%s1348_s3 + $0x10] sm:$0xf] %vm540_vm0, %v679_v45  ;;  %546 = vst.msk [vmem:[%s1348_s3 + $0x14] sm:$0xf] %vm540_vm0, %v680_v46  ;;  %v97_v55 = vmul.f32 %v765_v1, %v26_v42  ;;  %v98_v56 = vmul.f32 %v765_v1, %v27_v43  ;;  %v99_v57 = vmul.f32 %v765_v1, %v28_v44 }
   0xe   :  { %547 = vst.msk [vmem:[%s1348_s3 + $0x18] sm:$0xf] %vm540_vm0, %v681_v47  ;;  %548 = vst.msk [vmem:[%s1348_s3 + $0x1c] sm:$0xf] %vm540_vm0, %v682_v50  ;;  %v165_v58 = vadd.f32 %v770_v2, %v94_v51  ;;  %v166_v59 = vadd.f32 %v770_v2, %v95_v52  ;;  %v167_v60 = vadd.f32 %v770_v2, %v96_v53  ;;  %v228_v62 = vmax.f32 %v164_v54, 0.0  ;;  %v39_v53 = vld [vmem:[%s1345_s0 + $0xc8] sm:$0xff] }
   0xf   :  { %v100_v61 = vmul.f32 %v765_v1, %v29_v49  ;;  %v168_v63 = vadd.f32 %v770_v2, %v97_v55  ;;  %v169_v0 = vadd.f32 %v770_v2, %v98_v56  ;;  %v170_v3 = vadd.f32 %v770_v2, %v99_v57  ;;  %v40_v54 = vld [vmem:[%s1345_s0 + $0xd0] sm:$0xff]  ;;  %v41_v55 = vld [vmem:[%s1345_s0 + $0xd8] sm:$0xff] }
  0x10   :  { %v229_v4 = vmax.f32 %v165_v58, 0.0  ;;  %v230_v5 = vmax.f32 %v166_v59, 0.0  ;;  %v231_v6 = vmax.f32 %v167_v60, 0.0  ;;  %v683_v9 = vpack.c.bf16 %v228_v62, %v228_v62  ;;  %v42_v60 = vld [vmem:[%s1345_s0 + $0xe0] sm:$0xff]  ;;  %v44_v62 = vld [vmem:[%s1345_s0 + $0xf0] sm:$0xff] }
  0x11   :  { %v171_v7 = vadd.f32 %v770_v2, %v100_v61  ;;  %v232_v10 = vmax.f32 %v168_v63, 0.0  ;;  %v233_v11 = vmax.f32 %v169_v0, 0.0  ;;  %v234_v12 = vmax.f32 %v170_v3, 0.0  ;;  %v43_v61 = vld [vmem:[%s1345_s0 + $0xe8] sm:$0xff] }
  0x12   :  { %v684_v16 = vpack.c.bf16 %v229_v4, %v229_v4  ;;  %v685_v17 = vpack.c.bf16 %v230_v5, %v230_v5  ;;  %v686_v18 = vpack.c.bf16 %v231_v6, %v231_v6  ;;  %549 = vst.msk [vmem:[%s1348_s3 + $0x20] sm:$0xf] %vm540_vm0, %v683_v9  ;;  %v101_v26 = vmul.f32 %v765_v1, %v30_v8  ;;  %v45_v5 = vld [vmem:[%s1345_s0 + $0xf8] sm:$0xff] }
  0x13   :  { %v235_v19 = vmax.f32 %v171_v7, 0.0  ;;  %v687_v23 = vpack.c.bf16 %v232_v10, %v232_v10  ;;  %v688_v24 = vpack.c.bf16 %v233_v11, %v233_v11  ;;  %v689_v25 = vpack.c.bf16 %v234_v12, %v234_v12 }
  0x14   :  { %550 = vst.msk [vmem:[%s1348_s3 + $0x24] sm:$0xf] %vm540_vm0, %v684_v16  ;;  %551 = vst.msk [vmem:[%s1348_s3 + $0x28] sm:$0xf] %vm540_vm0, %v685_v17  ;;  %v102_v29 = vmul.f32 %v765_v1, %v31_v13  ;;  %v103_v30 = vmul.f32 %v765_v1, %v32_v14  ;;  %v104_v31 = vmul.f32 %v765_v1, %v33_v15 }
  0x15   :  { %552 = vst.msk [vmem:[%s1348_s3 + $0x2c] sm:$0xf] %vm540_vm0, %v686_v18  ;;  %v690_v28 = vpack.c.bf16 %v235_v19, %v235_v19  ;;  %553 = vst.msk [vmem:[%s1348_s3 + $0x30] sm:$0xf] %vm540_vm0, %v687_v23  ;;  %v172_v32 = vadd.f32 %v770_v2, %v101_v26  ;;  %v105_v33 = vmul.f32 %v765_v1, %v34_v20  ;;  %v46_v26 = vld [vmem:[%s1345_s0 + $0x100] sm:$0xff] }
  0x16   :  { %554 = vst.msk [vmem:[%s1348_s3 + $0x34] sm:$0xf] %vm540_vm0, %v688_v24  ;;  %555 = vst.msk [vmem:[%s1348_s3 + $0x38] sm:$0xf] %vm540_vm0, %v689_v25  ;;  %v106_v34 = vmul.f32 %v765_v1, %v35_v21  ;;  %v107_v35 = vmul.f32 %v765_v1, %v36_v22  ;;  %v173_v36 = vadd.f32 %v770_v2, %v102_v29 }
  0x17   :  { %556 = vst.msk [vmem:[%s1348_s3 + $0x3c] sm:$0xf] %vm540_vm0, %v690_v28  ;;  %v174_v37 = vadd.f32 %v770_v2, %v103_v30  ;;  %v175_v38 = vadd.f32 %v770_v2, %v104_v31  ;;  %v108_v39 = vmul.f32 %v765_v1, %v37_v27  ;;  %v236_v40 = vmax.f32 %v172_v32, 0.0  ;;  %v47_v31 = vld [vmem:[%s1345_s0 + $0x108] sm:$0xff]  ;;  %v48_v32 = vld [vmem:[%s1345_s0 + $0x110] sm:$0xff] }
  0x18   :  { %v176_v41 = vadd.f32 %v770_v2, %v105_v33  ;;  %v177_v42 = vadd.f32 %v770_v2, %v106_v34  ;;  %v178_v43 = vadd.f32 %v770_v2, %v107_v35  ;;  %v237_v44 = vmax.f32 %v173_v36, 0.0  ;;  %v49_v33 = vld [vmem:[%s1345_s0 + $0x118] sm:$0xff] }
  0x19   :  { %v238_v45 = vmax.f32 %v174_v37, 0.0  ;;  %v239_v46 = vmax.f32 %v175_v38, 0.0  ;;  %v179_v47 = vadd.f32 %v770_v2, %v108_v39  ;;  %v691_v49 = vpack.c.bf16 %v236_v40, %v236_v40  ;;  %v50_v38 = vld [vmem:[%s1345_s0 + $0x120] sm:$0xff]  ;;  %v51_v39 = vld [vmem:[%s1345_s0 + $0x128] sm:$0xff]  ;;  %v52_v40 = vld [vmem:[%s1345_s0 + $0x130] sm:$0xff] }
  0x1a   :  { %v240_v50 = vmax.f32 %v176_v41, 0.0  ;;  %v241_v51 = vmax.f32 %v177_v42, 0.0  ;;  %v242_v52 = vmax.f32 %v178_v43, 0.0  ;;  %v692_v56 = vpack.c.bf16 %v237_v44, %v237_v44 }
  0x1b   :  { %v693_v57 = vpack.c.bf16 %v238_v45, %v238_v45  ;;  %v694_v58 = vpack.c.bf16 %v239_v46, %v239_v46  ;;  %v243_v59 = vmax.f32 %v179_v47, 0.0  ;;  %557 = vst.msk [vmem:[%s1348_s3 + $0x40] sm:$0xf] %vm540_vm0, %v691_v49  ;;  %v109_v4 = vmul.f32 %v765_v1, %v38_v48  ;;  %v53_v45 = vld [vmem:[%s1345_s0 + $0x138] sm:$0xff] }
  0x1c   :  { %v695_v63 = vpack.c.bf16 %v240_v50, %v240_v50  ;;  %v696_v0 = vpack.c.bf16 %v241_v51, %v241_v51  ;;  %v697_v3 = vpack.c.bf16 %v242_v52, %v242_v52  ;;  %558 = vst.msk [vmem:[%s1348_s3 + $0x44] sm:$0xf] %vm540_vm0, %v692_v56  ;;  %v110_v7 = vmul.f32 %v765_v1, %v39_v53 }
  0x1d   :  { %559 = vst.msk [vmem:[%s1348_s3 + $0x48] sm:$0xf] %vm540_vm0, %v693_v57  ;;  %560 = vst.msk [vmem:[%s1348_s3 + $0x4c] sm:$0xf] %vm540_vm0, %v694_v58  ;;  %v698_v6 = vpack.c.bf16 %v243_v59, %v243_v59  ;;  %v111_v8 = vmul.f32 %v765_v1, %v40_v54  ;;  %v112_v9 = vmul.f32 %v765_v1, %v41_v55 }
  0x1e   :  { %561 = vst.msk [vmem:[%s1348_s3 + $0x50] sm:$0xf] %vm540_vm0, %v695_v63  ;;  %562 = vst.msk [vmem:[%s1348_s3 + $0x54] sm:$0xf] %vm540_vm0, %v696_v0  ;;  %v180_v10 = vadd.f32 %v770_v2, %v109_v4  ;;  %v113_v11 = vmul.f32 %v765_v1, %v42_v60  ;;  %v114_v12 = vmul.f32 %v765_v1, %v43_v61  ;;  %v54_v4 = vld [vmem:[%s1345_s0 + $0x140] sm:$0xff] }
  0x1f   :  { %563 = vst.msk [vmem:[%s1348_s3 + $0x58] sm:$0xf] %vm540_vm0, %v697_v3  ;;  %v115_v13 = vmul.f32 %v765_v1, %v44_v62  ;;  %564 = vst.msk [vmem:[%s1348_s3 + $0x5c] sm:$0xf] %vm540_vm0, %v698_v6  ;;  %v181_v14 = vadd.f32 %v770_v2, %v110_v7  ;;  %v182_v15 = vadd.f32 %v770_v2, %v111_v8 }
  0x20   :  { %v183_v16 = vadd.f32 %v770_v2, %v112_v9  ;;  %v116_v17 = vmul.f32 %v765_v1, %v45_v5  ;;  %v244_v18 = vmax.f32 %v180_v10, 0.0  ;;  %v184_v19 = vadd.f32 %v770_v2, %v113_v11  ;;  %v55_v9 = vld [vmem:[%s1345_s0 + $0x148] sm:$0xff]  ;;  %v56_v10 = vld [vmem:[%s1345_s0 + $0x150] sm:$0xff]  ;;  %v57_v11 = vld [vmem:[%s1345_s0 + $0x158] sm:$0xff] }
  0x21   :  { %v185_v20 = vadd.f32 %v770_v2, %v114_v12  ;;  %v186_v21 = vadd.f32 %v770_v2, %v115_v13  ;;  %v245_v22 = vmax.f32 %v181_v14, 0.0  ;;  %v246_v23 = vmax.f32 %v182_v15, 0.0 }
  0x22   :  { %v247_v24 = vmax.f32 %v183_v16, 0.0  ;;  %v187_v25 = vadd.f32 %v770_v2, %v116_v17  ;;  %v699_v27 = vpack.c.bf16 %v244_v18, %v244_v18  ;;  %v248_v28 = vmax.f32 %v184_v19, 0.0  ;;  %v58_v16 = vld [vmem:[%s1345_s0 + $0x160] sm:$0xff]  ;;  %v59_v17 = vld [vmem:[%s1345_s0 + $0x168] sm:$0xff]  ;;  %v60_v18 = vld [vmem:[%s1345_s0 + $0x170] sm:$0xff] }
  0x23   :  { %v249_v29 = vmax.f32 %v185_v20, 0.0  ;;  %v250_v30 = vmax.f32 %v186_v21, 0.0  ;;  %v700_v34 = vpack.c.bf16 %v245_v22, %v245_v22  ;;  %v701_v35 = vpack.c.bf16 %v246_v23, %v246_v23  ;;  %v61_v23 = vld [vmem:[%s1345_s0 + $0x178] sm:$0xff] }
  0x24   :  { %v702_v36 = vpack.c.bf16 %v247_v24, %v247_v24  ;;  %v251_v37 = vmax.f32 %v187_v25, 0.0  ;;  %565 = vst.msk [vmem:[%s1348_s3 + $0x60] sm:$0xf] %vm540_vm0, %v699_v27  ;;  %v703_v41 = vpack.c.bf16 %v248_v28, %v248_v28  ;;  %v117_v44 = vmul.f32 %v765_v1, %v46_v26 }
  0x25   :  { %v704_v42 = vpack.c.bf16 %v249_v29, %v249_v29  ;;  %v705_v43 = vpack.c.bf16 %v250_v30, %v250_v30  ;;  %566 = vst.msk [vmem:[%s1348_s3 + $0x64] sm:$0xf] %vm540_vm0, %v700_v34  ;;  %567 = vst.msk [vmem:[%s1348_s3 + $0x68] sm:$0xf] %vm540_vm0, %v701_v35  ;;  %v118_v47 = vmul.f32 %v765_v1, %v47_v31 }
  0x26   :  { %568 = vst.msk [vmem:[%s1348_s3 + $0x6c] sm:$0xf] %vm540_vm0, %v702_v36  ;;  %v706_v46 = vpack.c.bf16 %v251_v37, %v251_v37  ;;  %v119_v48 = vmul.f32 %v765_v1, %v48_v32  ;;  %v120_v49 = vmul.f32 %v765_v1, %v49_v33  ;;  %569 = vst.msk [vmem:[%s1348_s3 + $0x70] sm:$0xf] %vm540_vm0, %v703_v41 }
  0x27   :  { %570 = vst.msk [vmem:[%s1348_s3 + $0x74] sm:$0xf] %vm540_vm0, %v704_v42  ;;  %571 = vst.msk [vmem:[%s1348_s3 + $0x78] sm:$0xf] %vm540_vm0, %v705_v43  ;;  %v188_v50 = vadd.f32 %v770_v2, %v117_v44  ;;  %v121_v51 = vmul.f32 %v765_v1, %v50_v38  ;;  %v122_v52 = vmul.f32 %v765_v1, %v51_v39  ;;  %v62_v44 = vld [vmem:[%s1345_s0 + $0x180] sm:$0xff] }
  0x28   :  { %v123_v53 = vmul.f32 %v765_v1, %v52_v40  ;;  %572 = vst.msk [vmem:[%s1348_s3 + $0x7c] sm:$0xf] %vm540_vm0, %v706_v46  ;;  %v189_v54 = vadd.f32 %v770_v2, %v118_v47  ;;  %v190_v55 = vadd.f32 %v770_v2, %v119_v48  ;;  %v191_v56 = vadd.f32 %v770_v2, %v120_v49  ;;  %v63_v49 = vld [vmem:[%s1345_s0 + $0x188] sm:$0xff] }
  0x29   :  { %v124_v57 = vmul.f32 %v765_v1, %v53_v45  ;;  %v252_v58 = vmax.f32 %v188_v50, 0.0  ;;  %v192_v59 = vadd.f32 %v770_v2, %v121_v51  ;;  %v193_v60 = vadd.f32 %v770_v2, %v122_v52  ;;  %v64_v50 = vld [vmem:[%s1345_s0 + $0x190] sm:$0xff]  ;;  %v65_v51 = vld [vmem:[%s1345_s0 + $0x198] sm:$0xff] }
  0x2a   :  { %v194_v61 = vadd.f32 %v770_v2, %v123_v53  ;;  %v253_v62 = vmax.f32 %v189_v54, 0.0  ;;  %v254_v63 = vmax.f32 %v190_v55, 0.0  ;;  %v255_v0 = vmax.f32 %v191_v56, 0.0  ;;  %v66_v56 = vld [vmem:[%s1345_s0 + $0x1a0] sm:$0xff] }
  0x2b   :  { %v195_v3 = vadd.f32 %v770_v2, %v124_v57  ;;  %v707_v5 = vpack.c.bf16 %v252_v58, %v252_v58  ;;  %v256_v6 = vmax.f32 %v192_v59, 0.0  ;;  %v257_v7 = vmax.f32 %v193_v60, 0.0  ;;  %v67_v57 = vld [vmem:[%s1345_s0 + $0x1a8] sm:$0xff]  ;;  %v68_v58 = vld [vmem:[%s1345_s0 + $0x1b0] sm:$0xff] }
  0x2c   :  { %v258_v8 = vmax.f32 %v194_v61, 0.0  ;;  %v708_v12 = vpack.c.bf16 %v253_v62, %v253_v62  ;;  %v709_v13 = vpack.c.bf16 %v254_v63, %v254_v63  ;;  %v710_v14 = vpack.c.bf16 %v255_v0, %v255_v0  ;;  %v69_v63 = vld [vmem:[%s1345_s0 + $0x1b8] sm:$0xff] }
  0x2d   :  { %v259_v15 = vmax.f32 %v195_v3, 0.0  ;;  %573 = vst.msk [vmem:[%s1348_s3 + $0x80] sm:$0xf] %vm540_vm0, %v707_v5  ;;  %v711_v19 = vpack.c.bf16 %v256_v6, %v256_v6  ;;  %v712_v20 = vpack.c.bf16 %v257_v7, %v257_v7  ;;  %v125_v22 = vmul.f32 %v765_v1, %v54_v4 }
  0x2e   :  { %v713_v21 = vpack.c.bf16 %v258_v8, %v258_v8  ;;  %574 = vst.msk [vmem:[%s1348_s3 + $0x84] sm:$0xf] %vm540_vm0, %v708_v12  ;;  %575 = vst.msk [vmem:[%s1348_s3 + $0x88] sm:$0xf] %vm540_vm0, %v709_v13  ;;  %v126_v25 = vmul.f32 %v765_v1, %v55_v9  ;;  %v127_v26 = vmul.f32 %v765_v1, %v56_v10 }
  0x2f   :  { %576 = vst.msk [vmem:[%s1348_s3 + $0x8c] sm:$0xf] %vm540_vm0, %v710_v14  ;;  %v714_v24 = vpack.c.bf16 %v259_v15, %v259_v15  ;;  %v128_v27 = vmul.f32 %v765_v1, %v57_v11  ;;  %577 = vst.msk [vmem:[%s1348_s3 + $0x90] sm:$0xf] %vm540_vm0, %v711_v19  ;;  %v196_v28 = vadd.f32 %v770_v2, %v125_v22  ;;  %v70_v22 = vld [vmem:[%s1345_s0 + $0x1c0] sm:$0xff] }
  0x30   :  { %578 = vst.msk [vmem:[%s1348_s3 + $0x94] sm:$0xf] %vm540_vm0, %v712_v20  ;;  %579 = vst.msk [vmem:[%s1348_s3 + $0x98] sm:$0xf] %vm540_vm0, %v713_v21  ;;  %v129_v29 = vmul.f32 %v765_v1, %v58_v16  ;;  %v130_v30 = vmul.f32 %v765_v1, %v59_v17  ;;  %v131_v31 = vmul.f32 %v765_v1, %v60_v18 }
  0x31   :  { %580 = vst.msk [vmem:[%s1348_s3 + $0x9c] sm:$0xf] %vm540_vm0, %v714_v24  ;;  %v197_v32 = vadd.f32 %v770_v2, %v126_v25  ;;  %v198_v33 = vadd.f32 %v770_v2, %v127_v26  ;;  %v199_v34 = vadd.f32 %v770_v2, %v128_v27  ;;  %v132_v35 = vmul.f32 %v765_v1, %v61_v23  ;;  %v71_v27 = vld [vmem:[%s1345_s0 + $0x1c8] sm:$0xff] }
  0x32   :  { %v260_v36 = vmax.f32 %v196_v28, 0.0  ;;  %v200_v37 = vadd.f32 %v770_v2, %v129_v29  ;;  %v201_v38 = vadd.f32 %v770_v2, %v130_v30  ;;  %v202_v39 = vadd.f32 %v770_v2, %v131_v31  ;;  %v72_v28 = vld [vmem:[%s1345_s0 + $0x1d0] sm:$0xff]  ;;  %v73_v29 = vld [vmem:[%s1345_s0 + $0x1d8] sm:$0xff] }
  0x33   :  { %v261_v40 = vmax.f32 %v197_v32, 0.0  ;;  %v262_v41 = vmax.f32 %v198_v33, 0.0  ;;  %v263_v42 = vmax.f32 %v199_v34, 0.0  ;;  %v203_v43 = vadd.f32 %v770_v2, %v132_v35  ;;  %v74_v34 = vld [vmem:[%s1345_s0 + $0x1e0] sm:$0xff]  ;;  %v75_v35 = vld [vmem:[%s1345_s0 + $0x1e8] sm:$0xff] }
  0x34   :  { %v715_v45 = vpack.c.bf16 %v260_v36, %v260_v36  ;;  %v264_v46 = vmax.f32 %v200_v37, 0.0  ;;  %v265_v47 = vmax.f32 %v201_v38, 0.0  ;;  %v266_v48 = vmax.f32 %v202_v39, 0.0  ;;  %v76_v36 = vld [vmem:[%s1345_s0 + $0x1f0] sm:$0xff] }
  0x35   :  { %v716_v52 = vpack.c.bf16 %v261_v40, %v261_v40  ;;  %v717_v53 = vpack.c.bf16 %v262_v41, %v262_v41  ;;  %v718_v54 = vpack.c.bf16 %v263_v42, %v263_v42  ;;  %v267_v55 = vmax.f32 %v203_v43, 0.0  ;;  %v77_v41 = vld [vmem:[%s1345_s0 + $0x1f8] sm:$0xff] }
  0x36   :  { %581 = vst.msk [vmem:[%s1348_s3 + $0xa0] sm:$0xf] %vm540_vm0, %v715_v45  ;;  %v719_v59 = vpack.c.bf16 %v264_v46, %v264_v46  ;;  %v720_v60 = vpack.c.bf16 %v265_v47, %v265_v47  ;;  %v721_v61 = vpack.c.bf16 %v266_v48, %v266_v48  ;;  %v133_v62 = vmul.f32 %v765_v1, %v62_v44 }
  0x37   :  { %582 = vst.msk [vmem:[%s1348_s3 + $0xa4] sm:$0xf] %vm540_vm0, %v716_v52  ;;  %583 = vst.msk [vmem:[%s1348_s3 + $0xa8] sm:$0xf] %vm540_vm0, %v717_v53  ;;  %v722_v0 = vpack.c.bf16 %v267_v55, %v267_v55  ;;  %v134_v3 = vmul.f32 %v765_v1, %v63_v49  ;;  %v135_v4 = vmul.f32 %v765_v1, %v64_v50 }
  0x38   :  { %584 = vst.msk [vmem:[%s1348_s3 + $0xac] sm:$0xf] %vm540_vm0, %v718_v54  ;;  %v136_v5 = vmul.f32 %v765_v1, %v65_v51  ;;  %585 = vst.msk [vmem:[%s1348_s3 + $0xb0] sm:$0xf] %vm540_vm0, %v719_v59  ;;  %v204_v6 = vadd.f32 %v770_v2, %v133_v62  ;;  %v137_v7 = vmul.f32 %v765_v1, %v66_v56 }
  0x39   :  { %586 = vst.msk [vmem:[%s1348_s3 + $0xb4] sm:$0xf] %vm540_vm0, %v720_v60  ;;  %587 = vst.msk [vmem:[%s1348_s3 + $0xb8] sm:$0xf] %vm540_vm0, %v721_v61  ;;  %v138_v8 = vmul.f32 %v765_v1, %v67_v57  ;;  %v139_v9 = vmul.f32 %v765_v1, %v68_v58  ;;  %v205_v10 = vadd.f32 %v770_v2, %v134_v3 }
  0x3a   :  { %588 = vst.msk [vmem:[%s1348_s3 + $0xbc] sm:$0xf] %vm540_vm0, %v722_v0  ;;  %v206_v11 = vadd.f32 %v770_v2, %v135_v4  ;;  %v207_v12 = vadd.f32 %v770_v2, %v136_v5  ;;  %v140_v13 = vmul.f32 %v765_v1, %v69_v63  ;;  %v268_v14 = vmax.f32 %v204_v6, 0.0 }
  0x3b   :  { %v208_v15 = vadd.f32 %v770_v2, %v137_v7  ;;  %v209_v16 = vadd.f32 %v770_v2, %v138_v8  ;;  %v210_v17 = vadd.f32 %v770_v2, %v139_v9  ;;  %v269_v18 = vmax.f32 %v205_v10, 0.0 }
  0x3c   :  { %v270_v19 = vmax.f32 %v206_v11, 0.0  ;;  %v271_v20 = vmax.f32 %v207_v12, 0.0  ;;  %v211_v21 = vadd.f32 %v770_v2, %v140_v13  ;;  %v723_v23 = vpack.c.bf16 %v268_v14, %v268_v14 }
  0x3d   :  { %v272_v24 = vmax.f32 %v208_v15, 0.0  ;;  %v273_v25 = vmax.f32 %v209_v16, 0.0  ;;  %v274_v26 = vmax.f32 %v210_v17, 0.0  ;;  %v724_v30 = vpack.c.bf16 %v269_v18, %v269_v18 }
  0x3e   :  { %v725_v31 = vpack.c.bf16 %v270_v19, %v270_v19  ;;  %v726_v32 = vpack.c.bf16 %v271_v20, %v271_v20  ;;  %v275_v33 = vmax.f32 %v211_v21, 0.0  ;;  %589 = vst.msk [vmem:[%s1348_s3 + $0xc0] sm:$0xf] %vm540_vm0, %v723_v23  ;;  %v141_v40 = vmul.f32 %v765_v1, %v70_v22 }
  0x3f   :  { %v727_v37 = vpack.c.bf16 %v272_v24, %v272_v24  ;;  %v728_v38 = vpack.c.bf16 %v273_v25, %v273_v25  ;;  %v729_v39 = vpack.c.bf16 %v274_v26, %v274_v26  ;;  %590 = vst.msk [vmem:[%s1348_s3 + $0xc4] sm:$0xf] %vm540_vm0, %v724_v30  ;;  %v142_v43 = vmul.f32 %v765_v1, %v71_v27 }
  0x40   :  { %591 = vst.msk [vmem:[%s1348_s3 + $0xc8] sm:$0xf] %vm540_vm0, %v725_v31  ;;  %592 = vst.msk [vmem:[%s1348_s3 + $0xcc] sm:$0xf] %vm540_vm0, %v726_v32  ;;  %v730_v42 = vpack.c.bf16 %v275_v33, %v275_v33  ;;  %v143_v44 = vmul.f32 %v765_v1, %v72_v28  ;;  %v144_v45 = vmul.f32 %v765_v1, %v73_v29 }
  0x41   :  { %593 = vst.msk [vmem:[%s1348_s3 + $0xd0] sm:$0xf] %vm540_vm0, %v727_v37  ;;  %594 = vst.msk [vmem:[%s1348_s3 + $0xd4] sm:$0xf] %vm540_vm0, %v728_v38  ;;  %v212_v46 = vadd.f32 %v770_v2, %v141_v40  ;;  %v145_v47 = vmul.f32 %v765_v1, %v74_v34  ;;  %v146_v48 = vmul.f32 %v765_v1, %v75_v35 }
  0x42   :  { %595 = vst.msk [vmem:[%s1348_s3 + $0xd8] sm:$0xf] %vm540_vm0, %v729_v39  ;;  %v147_v49 = vmul.f32 %v765_v1, %v76_v36  ;;  %596 = vst.msk [vmem:[%s1348_s3 + $0xdc] sm:$0xf] %vm540_vm0, %v730_v42  ;;  %v213_v50 = vadd.f32 %v770_v2, %v142_v43  ;;  %v214_v51 = vadd.f32 %v770_v2, %v143_v44 }
  0x43   :  { %v215_v52 = vadd.f32 %v770_v2, %v144_v45  ;;  %v148_v53 = vmul.f32 %v765_v1, %v77_v41  ;;  %v276_v54 = vmax.f32 %v212_v46, 0.0  ;;  %v216_v55 = vadd.f32 %v770_v2, %v145_v47 }
  0x44   :  { %v217_v56 = vadd.f32 %v770_v2, %v146_v48  ;;  %v218_v57 = vadd.f32 %v770_v2, %v147_v49  ;;  %v277_v58 = vmax.f32 %v213_v50, 0.0  ;;  %v278_v59 = vmax.f32 %v214_v51, 0.0 }
  0x45   :  { %v279_v60 = vmax.f32 %v215_v52, 0.0  ;;  %v219_v61 = vadd.f32 %v770_v2, %v148_v53  ;;  %v731_v62 = vpack.c.bf16 %v276_v54, %v276_v54  ;;  %v280_v63 = vmax.f32 %v216_v55, 0.0 }
  0x46   :  { %v281_v0 = vmax.f32 %v217_v56, 0.0  ;;  %v282_v3 = vmax.f32 %v218_v57, 0.0  ;;  %v732_v4 = vpack.c.bf16 %v277_v58, %v277_v58  ;;  %v733_v5 = vpack.c.bf16 %v278_v59, %v278_v59 }
  0x47   :  { %v734_v6 = vpack.c.bf16 %v279_v60, %v279_v60  ;;  %v283_v1 = vmax.f32 %v219_v61, 0.0  ;;  %597 = vst.msk [vmem:[%s1348_s3 + $0xe0] sm:$0xf] %vm540_vm0, %v731_v62  ;;  %v735_v7 = vpack.c.bf16 %v280_v63, %v280_v63 }
  0x48   :  { %v736_v8 = vpack.c.bf16 %v281_v0, %v281_v0  ;;  %v737_v9 = vpack.c.bf16 %v282_v3, %v282_v3  ;;  %598 = vst.msk [vmem:[%s1348_s3 + $0xe4] sm:$0xf] %vm540_vm0, %v732_v4  ;;  %599 = vst.msk [vmem:[%s1348_s3 + $0xe8] sm:$0xf] %vm540_vm0, %v733_v5 }
  0x49   :  { %600 = vst.msk [vmem:[%s1348_s3 + $0xec] sm:$0xf] %vm540_vm0, %v734_v6  ;;  %v738_v2 = vpack.c.bf16 %v283_v1, %v283_v1  ;;  %601 = vst.msk [vmem:[%s1348_s3 + $0xf0] sm:$0xf] %vm540_vm0, %v735_v7 }
  0x4a   :  { %602 = vst.msk [vmem:[%s1348_s3 + $0xf4] sm:$0xf] %vm540_vm0, %v736_v8  ;;  %603 = vst.msk [vmem:[%s1348_s3 + $0xf8] sm:$0xf] %vm540_vm0, %v737_v9 }
  0x4b   :  { %604 = vst.msk [vmem:[%s1348_s3 + $0xfc] sm:$0xf] %vm540_vm0, %v738_v2 }

// kernel: generator_forward.15
= control target key start
LH: loop header
LB: loop body
LE: loop exit
PB: predicated region body
PF: predicated region fallthrough
CT: control target
= control target key end

     0   :  { %v1476_v0 = vmov 0   ;;  %vm446_vm0 = vcmask 130048   ;;  %vm832_vm1 = vcmask 261120   ;;  %vm19_vm2 = vcmask 253952   ;;  %s2490_s1 = inlined_call_operand.vmem [shape: bf16[144,32], index: 1, kind: input, shape index: {}]   ;;  %s2491_s0 = inlined_call_operand.vmem [shape: bf16[512,144], index: 0, kind: input, shape index: {}]   ;;  %s2492_s2 = inlined_call_operand.vmem [shape: f32[512,32], index: 2, kind: output, shape index: {0}]   ;;  %s2493_s3 = inlined_call_operand.vmem [shape: f32[1,32], index: 3, kind: output, shape index: {1}]   ;;  %s2494_s4 = inlined_call_operand.vmem [shape: f32[1,32], index: 4, kind: output, shape index: {2}]  }
   0x1   :  { %543 = vmatprep.subr.bf16.mxu0 %v1476_v0  ;;  %v1371_v1 = vld [vmem:[%s2490_s1 + $0x38] sm:$0xff]   ;;  %1351 = vmatprep.subr.bf16.mxu1 %v1476_v0  ;;  %v1372_v2 = vld [vmem:[%s2490_s1 + $0x30] sm:$0xff]   ;;  %v1373_v3 = vld [vmem:[%s2490_s1 + $0x28] sm:$0xff]  }
   0x2   :  { %544 = vmatpush1.bf16.msra.mxu0 %v1371_v1  ;;  %1360 = vmatpush1.bf16.msra.mxu1 %v1371_v1  ;;  %v1374_v4 = vld [vmem:[%s2490_s1 + $0x20] sm:$0xff]   ;;  %v1375_v6 = vld [vmem:[%s2490_s1 + $0x18] sm:$0xff]   ;;  %v1376_v7 = vld [vmem:[%s2490_s1 + $0x10] sm:$0xff]  }
   0x3   :  { %545 = vmatprep.subr.bf16.mxu0 %v1476_v0  ;;  %1352 = vmatprep.subr.bf16.mxu1 %v1476_v0  ;;  %v1382_v5 = vld [vmem:[%s2491_s0 + $0x4] ss:$8 sps:$4 sm:$0xff]   ;;  %v1380_v12 = vld [vmem:[%s2491_s0] ss:$8 sps:$4 sm:$0xff]   ;;  %v1383_v13 = vld [vmem:[%s2491_s0 + $0x14] ss:$8 sps:$4 sm:$0xff]  }
   0x4   :  { %1319 = vmatprep.mubr.msk.bf16.mxu0 %vm446_vm0, %v1382_v5  ;;  %v1406_v8 = vld [vmem:[%s2491_s0 + $0x104] ss:$8 sps:$4 sm:$0xff]   ;;  %v1404_v14 = vld [vmem:[%s2491_s0 + $0x100] ss:$8 sps:$4 sm:$0xff]   ;;  %v1410_v15 = vld [vmem:[%s2491_s0 + $0x114] ss:$8 sps:$4 sm:$0xff]  }
   0x5   :  { %v1377_v9 = vld [vmem:[%s2490_s1 + $0x8] sm:$0xff]   ;;  %1335 = vmatprep.mubr.msk.bf16.mxu1 %vm446_vm0, %v1406_v8  ;;  %v1378_v10 = vld [vmem:[%s2490_s1] sm:$0xff]   ;;  %v1385_v16 = vld [vmem:[%s2491_s0 + $0x10] ss:$8 sps:$4 sm:$0xff]  }
   0x6   :  { %546 = vmatpush1.bf16.msra.mxu0 %v1372_v2  ;;  %1361 = vmatpush1.bf16.msra.mxu1 %v1372_v2  ;;  %v1379_v11 = vld [vmem:[%s2490_s1 + $0x40] sm:$0xff]   ;;  %v1412_v18 = vld [vmem:[%s2491_s0 + $0x110] ss:$8 sps:$4 sm:$0xff]   ;;  %v1389_v21 = vld [vmem:[%s2491_s0 + $0x34] ss:$8 sps:$4 sm:$0xff]  }
   0x7   :  { %547 = vmatprep.subr.bf16.mxu0 %v1476_v0  ;;  %1353 = vmatprep.subr.bf16.mxu1 %v1476_v0  ;;  %v1386_v17 = vld [vmem:[%s2491_s0 + $0x24] ss:$8 sps:$4 sm:$0xff]   ;;  %v1388_v20 = vld [vmem:[%s2491_s0 + $0x20] ss:$8 sps:$4 sm:$0xff]   ;;  %v1422_v23 = vld [vmem:[%s2491_s0 + $0x134] ss:$8 sps:$4 sm:$0xff]  }
   0x8   :  { %v1416_v19 = vld [vmem:[%s2491_s0 + $0x124] ss:$8 sps:$4 sm:$0xff]   ;;  %v1418_v22 = vld [vmem:[%s2491_s0 + $0x120] ss:$8 sps:$4 sm:$0xff]   ;;  %v1391_v24 = vld [vmem:[%s2491_s0 + $0x30] ss:$8 sps:$4 sm:$0xff]  }
   0x9   :  { %v1424_v25 = vld [vmem:[%s2491_s0 + $0x130] ss:$8 sps:$4 sm:$0xff]   ;;  %v1392_v26 = vld [vmem:[%s2491_s0 + $0x44] ss:$8 sps:$4 sm:$0xff]   ;;  %v1394_v28 = vld [vmem:[%s2491_s0 + $0x40] ss:$8 sps:$4 sm:$0xff]  }
   0xa   :  { %548 = vmatpush1.bf16.msra.mxu0 %v1373_v3  ;;  %1362 = vmatpush1.bf16.msra.mxu1 %v1373_v3  ;;  %v1428_v27 = vld [vmem:[%s2491_s0 + $0x144] ss:$8 sps:$4 sm:$0xff]   ;;  %v1430_v29 = vld [vmem:[%s2491_s0 + $0x140] ss:$8 sps:$4 sm:$0xff]   ;;  %v1395_v30 = vld [vmem:[%s2491_s0 + $0x54] ss:$8 sps:$4 sm:$0xff]  }
   0xb   :  { %549 = vmatprep.subr.bf16.mxu0 %v1476_v0  ;;  %1354 = vmatprep.subr.bf16.mxu1 %v1476_v0  ;;  %v1434_v31 = vld [vmem:[%s2491_s0 + $0x154] ss:$8 sps:$4 sm:$0xff]   ;;  %v1397_v32 = vld [vmem:[%s2491_s0 + $0x50] ss:$8 sps:$4 sm:$0xff]   ;;  %v1398_v34 = vld [vmem:[%s2491_s0 + $0x64] ss:$8 sps:$4 sm:$0xff]  }
   0xc   :  { %v1436_v33 = vld [vmem:[%s2491_s0 + $0x150] ss:$8 sps:$4 sm:$0xff]   ;;  %v1440_v35 = vld [vmem:[%s2491_s0 + $0x164] ss:$8 sps:$4 sm:$0xff]   ;;  %v1400_v36 = vld [vmem:[%s2491_s0 + $0x60] ss:$8 sps:$4 sm:$0xff]  }
   0xd   :  { %v1442_v37 = vld [vmem:[%s2491_s0 + $0x160] ss:$8 sps:$4 sm:$0xff]   ;;  %v1401_v38 = vld [vmem:[%s2491_s0 + $0x74] ss:$8 sps:$4 sm:$0xff]   ;;  %v1403_v40 = vld [vmem:[%s2491_s0 + $0x70] ss:$8 sps:$4 sm:$0xff]  }
   0xe   :  { %550 = vmatpush1.bf16.msra.mxu0 %v1374_v4  ;;  %1363 = vmatpush1.bf16.msra.mxu1 %v1374_v4  ;;  %v1446_v39 = vld [vmem:[%s2491_s0 + $0x174] ss:$8 sps:$4 sm:$0xff]   ;;  %v1448_v41 = vld [vmem:[%s2491_s0 + $0x170] ss:$8 sps:$4 sm:$0xff]   ;;  %v1407_v42 = vld [vmem:[%s2491_s0 + $0x84] ss:$8 sps:$4 sm:$0xff]  }
   0xf   :  { %551 = vmatprep.subr.bf16.mxu0 %v1476_v0  ;;  %1355 = vmatprep.subr.bf16.mxu1 %v1476_v0  ;;  %v1452_v43 = vld [vmem:[%s2491_s0 + $0x184] ss:$8 sps:$4 sm:$0xff]   ;;  %v1409_v44 = vld [vmem:[%s2491_s0 + $0x80] ss:$8 sps:$4 sm:$0xff]   ;;  %v1413_v46 = vld [vmem:[%s2491_s0 + $0x94] ss:$8 sps:$4 sm:$0xff]  }
  0x10   :  { %v1454_v45 = vld [vmem:[%s2491_s0 + $0x180] ss:$8 sps:$4 sm:$0xff]   ;;  %v1455_v47 = vld [vmem:[%s2491_s0 + $0x194] ss:$8 sps:$4 sm:$0xff]   ;;  %v1415_v48 = vld [vmem:[%s2491_s0 + $0x90] ss:$8 sps:$4 sm:$0xff]  }
  0x11   :  { %v1457_v49 = vld [vmem:[%s2491_s0 + $0x190] ss:$8 sps:$4 sm:$0xff]   ;;  %v1419_v50 = vld [vmem:[%s2491_s0 + $0xa4] ss:$8 sps:$4 sm:$0xff]   ;;  %v1421_v52 = vld [vmem:[%s2491_s0 + $0xa0] ss:$8 sps:$4 sm:$0xff]  }
  0x12   :  { %552 = vmatpush1.bf16.msra.mxu0 %v1375_v6  ;;  %1364 = vmatpush1.bf16.msra.mxu1 %v1375_v6  ;;  %v1458_v51 = vld [vmem:[%s2491_s0 + $0x1a4] ss:$8 sps:$4 sm:$0xff]   ;;  %v1460_v53 = vld [vmem:[%s2491_s0 + $0x1a0] ss:$8 sps:$4 sm:$0xff]   ;;  %v1425_v54 = vld [vmem:[%s2491_s0 + $0xb4] ss:$8 sps:$4 sm:$0xff]  }
  0x13   :  { %553 = vmatprep.subr.bf16.mxu0 %v1476_v0  ;;  %1356 = vmatprep.subr.bf16.mxu1 %v1476_v0  ;;  %v1461_v55 = vld [vmem:[%s2491_s0 + $0x1b4] ss:$8 sps:$4 sm:$0xff]   ;;  %v1427_v56 = vld [vmem:[%s2491_s0 + $0xb0] ss:$8 sps:$4 sm:$0xff]   ;;  %v1431_v58 = vld [vmem:[%s2491_s0 + $0xc4] ss:$8 sps:$4 sm:$0xff]  }
  0x14   :  { %v1463_v57 = vld [vmem:[%s2491_s0 + $0x1b0] ss:$8 sps:$4 sm:$0xff]   ;;  %v1464_v59 = vld [vmem:[%s2491_s0 + $0x1c4] ss:$8 sps:$4 sm:$0xff]   ;;  %v1433_v60 = vld [vmem:[%s2491_s0 + $0xc0] ss:$8 sps:$4 sm:$0xff]  }
  0x15   :  { %v1466_v61 = vld [vmem:[%s2491_s0 + $0x1c0] ss:$8 sps:$4 sm:$0xff]   ;;  %v1437_v62 = vld [vmem:[%s2491_s0 + $0xd4] ss:$8 sps:$4 sm:$0xff]   ;;  %v1469_v1 = vld [vmem:[%s2491_s0 + $0x1d0] ss:$8 sps:$4 sm:$0xff]  }
  0x16   :  { %554 = vmatpush1.bf16.msra.mxu0 %v1376_v7  ;;  %1365 = vmatpush1.bf16.msra.mxu1 %v1376_v7  ;;  %v1467_v63 = vld [vmem:[%s2491_s0 + $0x1d4] ss:$8 sps:$4 sm:$0xff]   ;;  %v1443_v2 = vld [vmem:[%s2491_s0 + $0xe4] ss:$8 sps:$4 sm:$0xff]   ;;  %v1445_v4 = vld [vmem:[%s2491_s0 + $0xe0] ss:$8 sps:$4 sm:$0xff]  }
  0x17   :  { %555 = vmatprep.subr.bf16.mxu0 %v1476_v0  ;;  %1357 = vmatprep.subr.bf16.mxu1 %v1476_v0  ;;  %v1470_v3 = vld [vmem:[%s2491_s0 + $0x1e4] ss:$8 sps:$4 sm:$0xff]   ;;  %v1472_v5 = vld [vmem:[%s2491_s0 + $0x1e0] ss:$8 sps:$4 sm:$0xff]   ;;  %v1449_v6 = vld [vmem:[%s2491_s0 + $0xf4] ss:$8 sps:$4 sm:$0xff]  }
  0x18   :  { %v1473_v7 = vld [vmem:[%s2491_s0 + $0x1f4] ss:$8 sps:$4 sm:$0xff]   ;;  %v1451_v8 = vld [vmem:[%s2491_s0 + $0xf0] ss:$8 sps:$4 sm:$0xff]  }
  0x1a   :  { %556 = vmatpush1.bf16.msra.mxu0 %v1377_v9  ;;  %1366 = vmatpush1.bf16.msra.mxu1 %v1377_v9  ;;  %v1475_v9 = vld [vmem:[%s2491_s0 + $0x1f0] ss:$8 sps:$4 sm:$0xff]  }
  0x1b   :  { %557 = vmatprep.subr.bf16.mxu0 %v1476_v0  ;;  %1358 = vmatprep.subr.bf16.mxu1 %v1476_v0 }
  0x1e   :  { %558 = vmatpush1.bf16.msra.mxu0 %v1378_v10  ;;  %1367 = vmatpush1.bf16.msra.mxu1 %v1378_v10 }
  0x1f   :  { %573 = vmatprep.subr.bf16.mxu0 %v1476_v0  ;;  %1359 = vmatprep.subr.bf16.mxu1 %v1476_v0  ;;  %v1439_v0 = vld [vmem:[%s2491_s0 + $0xd0] ss:$8 sps:$4 sm:$0xff]  }
  0x22   :  { %574 = vmatpush2.bf16.msra.mxu0 %v1379_v11  ;;  %1368 = vmatpush2.bf16.msra.mxu1 %v1379_v11 }
  0x25   :  { %576 = vmatmul.mubr.bf16.vlgmr.msra.gmra.mxu0 %v1380_v12  ;;  %704 = vmatmul.mubr.bf16.vlgmr.msra.gmra.mxu1 %v1404_v14 }
  0x26   :  { %1320 = vmatprep.mubr.msk.bf16.mxu0 %vm446_vm0, %v1383_v13  ;;  %1336 = vmatprep.mubr.msk.bf16.mxu1 %vm446_vm0, %v1410_v15 }
  0x2d   :  { %584 = vmatmul.mubr.bf16.gmra.mxu0 %v1385_v16  ;;  %712 = vmatmul.mubr.bf16.gmra.mxu1 %v1412_v18 }
  0x2e   :  { %1321 = vmatprep.mubr.msk.bf16.mxu0 %vm446_vm0, %v1386_v17  ;;  %1337 = vmatprep.mubr.msk.bf16.mxu1 %vm446_vm0, %v1416_v19 }
  0x35   :  { %592 = vmatmul.mubr.bf16.gmra.mxu0 %v1388_v20  ;;  %720 = vmatmul.mubr.bf16.gmra.mxu1 %v1418_v22 }
  0x36   :  { %1322 = vmatprep.mubr.msk.bf16.mxu0 %vm446_vm0, %v1389_v21  ;;  %1338 = vmatprep.mubr.msk.bf16.mxu1 %vm446_vm0, %v1422_v23 }
  0x3d   :  { %600 = vmatmul.mubr.bf16.gmra.mxu0 %v1391_v24  ;;  %728 = vmatmul.mubr.bf16.gmra.mxu1 %v1424_v25 }
  0x3e   :  { %1323 = vmatprep.mubr.msk.bf16.mxu0 %vm446_vm0, %v1392_v26  ;;  %1339 = vmatprep.mubr.msk.bf16.mxu1 %vm446_vm0, %v1428_v27 }
  0x45   :  { %608 = vmatmul.mubr.bf16.gmra.mxu0 %v1394_v28  ;;  %736 = vmatmul.mubr.bf16.gmra.mxu1 %v1430_v29 }
  0x46   :  { %1324 = vmatprep.mubr.msk.bf16.mxu0 %vm446_vm0, %v1395_v30  ;;  %1340 = vmatprep.mubr.msk.bf16.mxu1 %vm446_vm0, %v1434_v31 }
  0x4d   :  { %616 = vmatmul.mubr.bf16.gmra.mxu0 %v1397_v32  ;;  %744 = vmatmul.mubr.bf16.gmra.mxu1 %v1436_v33 }
  0x4e   :  { %1325 = vmatprep.mubr.msk.bf16.mxu0 %vm446_vm0, %v1398_v34  ;;  %1341 = vmatprep.mubr.msk.bf16.mxu1 %vm446_vm0, %v1440_v35 }
  0x55   :  { %624 = vmatmul.mubr.bf16.gmra.mxu0 %v1400_v36  ;;  %752 = vmatmul.mubr.bf16.gmra.mxu1 %v1442_v37 }
  0x56   :  { %1326 = vmatprep.mubr.msk.bf16.mxu0 %vm446_vm0, %v1401_v38  ;;  %1342 = vmatprep.mubr.msk.bf16.mxu1 %vm446_vm0, %v1446_v39 }
  0x5d   :  { %632 = vmatmul.mubr.bf16.gmra.mxu0 %v1403_v40  ;;  %760 = vmatmul.mubr.bf16.gmra.mxu1 %v1448_v41 }
  0x5e   :  { %1327 = vmatprep.mubr.msk.bf16.mxu0 %vm446_vm0, %v1407_v42  ;;  %1343 = vmatprep.mubr.msk.bf16.mxu1 %vm446_vm0, %v1452_v43 }
  0x65   :  { %640 = vmatmul.mubr.bf16.gmra.mxu0 %v1409_v44  ;;  %768 = vmatmul.mubr.bf16.gmra.mxu1 %v1454_v45 }
  0x66   :  { %1328 = vmatprep.mubr.msk.bf16.mxu0 %vm446_vm0, %v1413_v46  ;;  %1344 = vmatprep.mubr.msk.bf16.mxu1 %vm446_vm0, %v1455_v47 }
  0x6d   :  { %648 = vmatmul.mubr.bf16.gmra.mxu0 %v1415_v48  ;;  %776 = vmatmul.mubr.bf16.gmra.mxu1 %v1457_v49 }
  0x6e   :  { %1329 = vmatprep.mubr.msk.bf16.mxu0 %vm446_vm0, %v1419_v50  ;;  %1345 = vmatprep.mubr.msk.bf16.mxu1 %vm446_vm0, %v1458_v51 }
  0x75   :  { %656 = vmatmul.mubr.bf16.gmra.mxu0 %v1421_v52  ;;  %784 = vmatmul.mubr.bf16.gmra.mxu1 %v1460_v53 }
  0x76   :  { %1330 = vmatprep.mubr.msk.bf16.mxu0 %vm446_vm0, %v1425_v54  ;;  %1346 = vmatprep.mubr.msk.bf16.mxu1 %vm446_vm0, %v1461_v55 }
  0x7d   :  { %664 = vmatmul.mubr.bf16.gmra.mxu0 %v1427_v56  ;;  %792 = vmatmul.mubr.bf16.gmra.mxu1 %v1463_v57 }
  0x7e   :  { %1331 = vmatprep.mubr.msk.bf16.mxu0 %vm446_vm0, %v1431_v58  ;;  %1347 = vmatprep.mubr.msk.bf16.mxu1 %vm446_vm0, %v1464_v59 }
  0x85   :  { %672 = vmatmul.mubr.bf16.gmra.mxu0 %v1433_v60  ;;  %800 = vmatmul.mubr.bf16.gmra.mxu1 %v1466_v61 }
  0x86   :  { %1332 = vmatprep.mubr.msk.bf16.mxu0 %vm446_vm0, %v1437_v62  ;;  %1348 = vmatprep.mubr.msk.bf16.mxu1 %vm446_vm0, %v1467_v63 }
  0x8d   :  { %680 = vmatmul.mubr.bf16.gmra.mxu0 %v1439_v0  ;;  %808 = vmatmul.mubr.bf16.gmra.mxu1 %v1469_v1 }
  0x8e   :  { %1333 = vmatprep.mubr.msk.bf16.mxu0 %vm446_vm0, %v1443_v2  ;;  %1349 = vmatprep.mubr.msk.bf16.mxu1 %vm446_vm0, %v1470_v3 }
  0x95   :  { %688 = vmatmul.mubr.bf16.gmra.mxu0 %v1445_v4  ;;  %816 = vmatmul.mubr.bf16.gmra.mxu1 %v1472_v5 }
  0x96   :  { %1334 = vmatprep.mubr.msk.bf16.mxu0 %vm446_vm0, %v1449_v6  ;;  %1350 = vmatprep.mubr.msk.bf16.mxu1 %vm446_vm0, %v1473_v7 }
  0x9d   :  { %696 = vmatmul.mubr.bf16.gmra.mxu0 %v1451_v8  ;;  %824 = vmatmul.mubr.bf16.gmra.mxu1 %v1475_v9 }
  0xe5   :  { %v1754_v10 = vpop.f32.mrf.mxu0  ;;  %v1756_v11 = vpop.f32.mrf.mxu1 }
  0xe6   :  { %833 = vst.msk [vmem:[%s2492_s2] sm:$0xff] %vm832_vm1, %v1754_v10  ;;  %865 = vst.msk [vmem:[%s2492_s2 + $0x100] sm:$0xff] %vm832_vm1, %v1756_v11 }
  0xe7   :  { %v579_v12 = vpop.f32.mrf.mxu0  ;;  %v707_v13 = vpop.f32.mrf.mxu1 }
  0xe8   :  { %v1035_v13 = vmul.f32 %v1754_v10, %v1754_v10 }
  0xe9   :  { %v1768_v14 = vpop.f32.mrf.mxu0  ;;  %v1770_v15 = vpop.f32.mrf.mxu1 }
  0xea   :  { %834 = vst.msk [vmem:[%s2492_s2 + $0x8] sm:$0xff] %vm832_vm1, %v1768_v14  ;;  %866 = vst.msk [vmem:[%s2492_s2 + $0x108] sm:$0xff] %vm832_vm1, %v1770_v15  ;;  %v1036_v8 = vmul.f32 %v1768_v14, %v1768_v14 }
  0xeb   :  { %v582_v16 = vpop.f32.mrf.mxu0  ;;  %v710_v17 = vpop.f32.mrf.mxu1 }
  0xec   :  { %v899_v16 = vsel %vm832_vm1, %v1768_v14, 0.0  ;;  %v898_v14 = vsel %vm832_vm1, %v1754_v10, 0.0 }
  0xed   :  { %v1782_v18 = vpop.f32.mrf.mxu0  ;;  %v1784_v19 = vpop.f32.mrf.mxu1  ;;  %v900_v10 = vadd.f32 %v899_v16, %v898_v14 }
  0xee   :  { %835 = vst.msk [vmem:[%s2492_s2 + $0x10] sm:$0xff] %vm832_vm1, %v1782_v18  ;;  %867 = vst.msk [vmem:[%s2492_s2 + $0x110] sm:$0xff] %vm832_vm1, %v1784_v19  ;;  %v1037_v17 = vmul.f32 %v1782_v18, %v1782_v18 }
  0xef   :  { %v587_v20 = vpop.f32.mrf.mxu0  ;;  %v715_v21 = vpop.f32.mrf.mxu1 }
  0xf0   :  { %v1477_v20 = vmov 0.0  }
  0xf1   :  { %v1796_v22 = vpop.f32.mrf.mxu0  ;;  %v1798_v23 = vpop.f32.mrf.mxu1  ;;  %20 = vst.msk [vmem:[%s2493_s3] sm:$0x1] %vm19_vm2, %v1477_v20  ;;  %21 = vst.msk [vmem:[%s2494_s4] sm:$0x1] %vm19_vm2, %v1477_v20 }
  0xf2   :  { %836 = vst.msk [vmem:[%s2492_s2 + $0x18] sm:$0xff] %vm832_vm1, %v1796_v22  ;;  %868 = vst.msk [vmem:[%s2492_s2 + $0x118] sm:$0xff] %vm832_vm1, %v1798_v23 }
  0xf3   :  { %v590_v24 = vpop.f32.mrf.mxu0  ;;  %v718_v25 = vpop.f32.mrf.mxu1 }
  0xf4   :  { %v1100_v25 = vsel %vm832_vm1, %v1036_v8, 0.0 }
  0xf5   :  { %v1810_v26 = vpop.f32.mrf.mxu0  ;;  %v1812_v27 = vpop.f32.mrf.mxu1 }
  0xf6   :  { %837 = vst.msk [vmem:[%s2492_s2 + $0x20] sm:$0xff] %vm832_vm1, %v1810_v26  ;;  %869 = vst.msk [vmem:[%s2492_s2 + $0x120] sm:$0xff] %vm832_vm1, %v1812_v27 }
  0xf7   :  { %v595_v28 = vpop.f32.mrf.mxu0  ;;  %v723_v29 = vpop.f32.mrf.mxu1 }
  0xf8   :  { %v901_v28 = vsel %vm832_vm1, %v1782_v18, 0.0  ;;  %v1038_v29 = vmul.f32 %v1796_v22, %v1796_v22  ;;  %v1099_v18 = vsel %vm832_vm1, %v1035_v13, 0.0 }
  0xf9   :  { %v1824_v30 = vpop.f32.mrf.mxu0  ;;  %v1826_v31 = vpop.f32.mrf.mxu1 }
  0xfa   :  { %838 = vst.msk [vmem:[%s2492_s2 + $0x28] sm:$0xff] %vm832_vm1, %v1824_v30  ;;  %870 = vst.msk [vmem:[%s2492_s2 + $0x128] sm:$0xff] %vm832_vm1, %v1826_v31 }
  0xfb   :  { %v598_v32 = vpop.f32.mrf.mxu0  ;;  %v726_v33 = vpop.f32.mrf.mxu1 }
  0xfd   :  { %v1838_v34 = vpop.f32.mrf.mxu0  ;;  %v1840_v35 = vpop.f32.mrf.mxu1 }
  0xfe   :  { %839 = vst.msk [vmem:[%s2492_s2 + $0x30] sm:$0xff] %vm832_vm1, %v1838_v34  ;;  %871 = vst.msk [vmem:[%s2492_s2 + $0x130] sm:$0xff] %vm832_vm1, %v1840_v35 }
  0xff   :  { %v603_v36 = vpop.f32.mrf.mxu0  ;;  %v731_v37 = vpop.f32.mrf.mxu1 }
 0x100   :  { %v1102_v36 = vsel %vm832_vm1, %v1037_v17, 0.0  ;;  %v903_v37 = vsel %vm832_vm1, %v1796_v22, 0.0 }
 0x101   :  { %v1852_v38 = vpop.f32.mrf.mxu0  ;;  %v1854_v39 = vpop.f32.mrf.mxu1 }
 0x102   :  { %840 = vst.msk [vmem:[%s2492_s2 + $0x38] sm:$0xff] %vm832_vm1, %v1852_v38  ;;  %872 = vst.msk [vmem:[%s2492_s2 + $0x138] sm:$0xff] %vm832_vm1, %v1854_v39  ;;  %v1042_v13 = vmul.f32 %v1852_v38, %v1852_v38  ;;  %v911_v14 = vsel %vm832_vm1, %v1852_v38, 0.0 }
 0x103   :  { %v606_v40 = vpop.f32.mrf.mxu0  ;;  %v734_v41 = vpop.f32.mrf.mxu1 }
 0x104   :  { %v1039_v40 = vmul.f32 %v1810_v26, %v1810_v26  ;;  %v1101_v41 = vadd.f32 %v1100_v25, %v1099_v18 }
 0x105   :  { %v1866_v42 = vpop.f32.mrf.mxu0  ;;  %v1868_v43 = vpop.f32.mrf.mxu1 }
 0x106   :  { %841 = vst.msk [vmem:[%s2492_s2 + $0x40] sm:$0xff] %vm832_vm1, %v1866_v42  ;;  %873 = vst.msk [vmem:[%s2492_s2 + $0x140] sm:$0xff] %vm832_vm1, %v1868_v43  ;;  %v1103_v22 = vadd.f32 %v1102_v36, %v1101_v41  ;;  %v1043_v25 = vmul.f32 %v1866_v42, %v1866_v42  ;;  %v913_v18 = vsel %vm832_vm1, %v1866_v42, 0.0 }
 0x107   :  { %v611_v44 = vpop.f32.mrf.mxu0  ;;  %v739_v45 = vpop.f32.mrf.mxu1 }
 0x108   :  { %v902_v44 = vadd.f32 %v901_v28, %v900_v10  ;;  %v1114_v42 = vsel %vm832_vm1, %v1043_v25, 0.0 }
 0x109   :  { %v1880_v46 = vpop.f32.mrf.mxu0  ;;  %v1882_v47 = vpop.f32.mrf.mxu1 }
 0x10a   :  { %842 = vst.msk [vmem:[%s2492_s2 + $0x48] sm:$0xff] %vm832_vm1, %v1880_v46  ;;  %874 = vst.msk [vmem:[%s2492_s2 + $0x148] sm:$0xff] %vm832_vm1, %v1882_v47  ;;  %v1044_v36 = vmul.f32 %v1880_v46, %v1880_v46 }
 0x10b   :  { %v614_v48 = vpop.f32.mrf.mxu0  ;;  %v742_v49 = vpop.f32.mrf.mxu1 }
 0x10c   :  { %v1104_v49 = vsel %vm832_vm1, %v1038_v29, 0.0 }
 0x10d   :  { %v1894_v50 = vpop.f32.mrf.mxu0  ;;  %v1896_v51 = vpop.f32.mrf.mxu1 }
 0x10e   :  { %843 = vst.msk [vmem:[%s2492_s2 + $0x50] sm:$0xff] %vm832_vm1, %v1894_v50  ;;  %875 = vst.msk [vmem:[%s2492_s2 + $0x150] sm:$0xff] %vm832_vm1, %v1896_v51 }
 0x10f   :  { %v619_v52 = vpop.f32.mrf.mxu0  ;;  %v747_v53 = vpop.f32.mrf.mxu1 }
 0x110   :  { %v905_v52 = vsel %vm832_vm1, %v1810_v26, 0.0  ;;  %v1040_v53 = vmul.f32 %v1824_v30, %v1824_v30  ;;  %v1106_v26 = vsel %vm832_vm1, %v1039_v40, 0.0 }
 0x111   :  { %v1908_v54 = vpop.f32.mrf.mxu0  ;;  %v1910_v55 = vpop.f32.mrf.mxu1 }
 0x112   :  { %844 = vst.msk [vmem:[%s2492_s2 + $0x58] sm:$0xff] %vm832_vm1, %v1908_v54  ;;  %876 = vst.msk [vmem:[%s2492_s2 + $0x158] sm:$0xff] %vm832_vm1, %v1910_v55 }
 0x113   :  { %v622_v56 = vpop.f32.mrf.mxu0  ;;  %v750_v57 = vpop.f32.mrf.mxu1 }
 0x114   :  { %v904_v56 = vadd.f32 %v903_v37, %v902_v44  ;;  %v915_v44 = vsel %vm832_vm1, %v1880_v46, 0.0 }
 0x115   :  { %v1922_v58 = vpop.f32.mrf.mxu0  ;;  %v1924_v59 = vpop.f32.mrf.mxu1 }
 0x116   :  { %845 = vst.msk [vmem:[%s2492_s2 + $0x60] sm:$0xff] %vm832_vm1, %v1922_v58  ;;  %877 = vst.msk [vmem:[%s2492_s2 + $0x160] sm:$0xff] %vm832_vm1, %v1924_v59 }
 0x117   :  { %v627_v60 = vpop.f32.mrf.mxu0  ;;  %v755_v61 = vpop.f32.mrf.mxu1 }
 0x118   :  { %v907_v61 = vsel %vm832_vm1, %v1824_v30, 0.0 }
 0x119   :  { %v1936_v62 = vpop.f32.mrf.mxu0  ;;  %v1938_v63 = vpop.f32.mrf.mxu1 }
 0x11a   :  { %846 = vst.msk [vmem:[%s2492_s2 + $0x68] sm:$0xff] %vm832_vm1, %v1936_v62  ;;  %878 = vst.msk [vmem:[%s2492_s2 + $0x168] sm:$0xff] %vm832_vm1, %v1938_v63 }
 0x11b   :  { %v630_v0 = vpop.f32.mrf.mxu0  ;;  %v758_v1 = vpop.f32.mrf.mxu1 }
 0x11c   :  { %v1041_v0 = vmul.f32 %v1838_v34, %v1838_v34  ;;  %v1105_v1 = vadd.f32 %v1104_v49, %v1103_v22  ;;  %v1045_v49 = vmul.f32 %v1894_v50, %v1894_v50 }
 0x11d   :  { %v1950_v2 = vpop.f32.mrf.mxu0  ;;  %v1952_v3 = vpop.f32.mrf.mxu1 }
 0x11e   :  { %847 = vst.msk [vmem:[%s2492_s2 + $0x70] sm:$0xff] %vm832_vm1, %v1950_v2  ;;  %879 = vst.msk [vmem:[%s2492_s2 + $0x170] sm:$0xff] %vm832_vm1, %v1952_v3  ;;  %v1107_v30 = vadd.f32 %v1106_v26, %v1105_v1  ;;  %v1046_v26 = vmul.f32 %v1908_v54, %v1908_v54 }
 0x11f   :  { %v635_v4 = vpop.f32.mrf.mxu0  ;;  %v763_v5 = vpop.f32.mrf.mxu1 }
 0x120   :  { %v906_v4 = vadd.f32 %v905_v52, %v904_v56 }
 0x121   :  { %v1964_v6 = vpop.f32.mrf.mxu0  ;;  %v1966_v7 = vpop.f32.mrf.mxu1 }
 0x122   :  { %848 = vst.msk [vmem:[%s2492_s2 + $0x78] sm:$0xff] %vm832_vm1, %v1964_v6  ;;  %880 = vst.msk [vmem:[%s2492_s2 + $0x178] sm:$0xff] %vm832_vm1, %v1966_v7  ;;  %v908_v16 = vadd.f32 %v907_v61, %v906_v4  ;;  %v919_v4 = vsel %vm832_vm1, %v1908_v54, 0.0 }
 0x123   :  { %v638_v9 = vpop.f32.mrf.mxu0  ;;  %v766_v12 = vpop.f32.mrf.mxu1 }
 0x124   :  { %v1108_v9 = vsel %vm832_vm1, %v1040_v53, 0.0  ;;  %v909_v12 = vsel %vm832_vm1, %v1838_v34, 0.0  ;;  %v1110_v34 = vsel %vm832_vm1, %v1041_v0, 0.0 }
 0x125   :  { %v1994_v21 = vpop.f32.mrf.mxu0  ;;  %v1996_v24 = vpop.f32.mrf.mxu1  ;;  %v1109_v28 = vadd.f32 %v1108_v9, %v1107_v30  ;;  %v910_v29 = vadd.f32 %v909_v12, %v908_v16  ;;  %v1047_v9 = vmul.f32 %v1922_v58, %v1922_v58 }
 0x126   :  { %849 = vst.msk [vmem:[%s2492_s2 + $0x80] sm:$0xff] %vm832_vm1, %v1994_v21  ;;  %881 = vst.msk [vmem:[%s2492_s2 + $0x180] sm:$0xff] %vm832_vm1, %v1996_v24 }
 0x127   :  { %v643_v32 = vpop.f32.mrf.mxu0  ;;  %v771_v33 = vpop.f32.mrf.mxu1  ;;  %v1111_v38 = vadd.f32 %v1110_v34, %v1109_v28  ;;  %v912_v37 = vadd.f32 %v911_v14, %v910_v29  ;;  %v1048_v34 = vmul.f32 %v1936_v62, %v1936_v62  ;;  %v923_v29 = vsel %vm832_vm1, %v1936_v62, 0.0 }
 0x128   :  { %v1112_v33 = vsel %vm832_vm1, %v1042_v13, 0.0 }
 0x129   :  { %v2021_v45 = vpop.f32.mrf.mxu0  ;;  %v2023_v48 = vpop.f32.mrf.mxu1  ;;  %v1113_v52 = vadd.f32 %v1112_v33, %v1111_v38  ;;  %v914_v53 = vadd.f32 %v913_v18, %v912_v37  ;;  %v1049_v33 = vmul.f32 %v1950_v2, %v1950_v2 }
 0x12a   :  { %850 = vst.msk [vmem:[%s2492_s2 + $0x88] sm:$0xff] %vm832_vm1, %v2021_v45  ;;  %882 = vst.msk [vmem:[%s2492_s2 + $0x188] sm:$0xff] %vm832_vm1, %v2023_v48 }
 0x12b   :  { %v646_v57 = vpop.f32.mrf.mxu0  ;;  %v774_v60 = vpop.f32.mrf.mxu1  ;;  %v1115_v46 = vadd.f32 %v1114_v42, %v1113_v52  ;;  %v916_v61 = vadd.f32 %v915_v44, %v914_v53  ;;  %v1050_v42 = vmul.f32 %v1964_v6, %v1964_v6  ;;  %v927_v53 = vsel %vm832_vm1, %v1964_v6, 0.0 }
 0x12c   :  { %v1116_v57 = vsel %vm832_vm1, %v1044_v36, 0.0  ;;  %v917_v60 = vsel %vm832_vm1, %v1894_v50, 0.0  ;;  %v1118_v50 = vsel %vm832_vm1, %v1045_v49, 0.0 }
 0x12d   :  { %v2045_v5 = vpop.f32.mrf.mxu0  ;;  %v2047_v8 = vpop.f32.mrf.mxu1  ;;  %v1117_v12 = vadd.f32 %v1116_v57, %v1115_v46  ;;  %v918_v13 = vadd.f32 %v917_v60, %v916_v61  ;;  %v1051_v57 = vmul.f32 %v1994_v21, %v1994_v21 }
 0x12e   :  { %851 = vst.msk [vmem:[%s2492_s2 + $0x90] sm:$0xff] %vm832_vm1, %v2045_v5  ;;  %883 = vst.msk [vmem:[%s2492_s2 + $0x190] sm:$0xff] %vm832_vm1, %v2047_v8 }
 0x12f   :  { %v651_v17 = vpop.f32.mrf.mxu0  ;;  %v779_v20 = vpop.f32.mrf.mxu1  ;;  %v1119_v54 = vadd.f32 %v1118_v50, %v1117_v12  ;;  %v920_v14 = vadd.f32 %v919_v4, %v918_v13  ;;  %v1052_v50 = vmul.f32 %v2021_v45, %v2021_v45  ;;  %v931_v13 = vsel %vm832_vm1, %v2021_v45, 0.0 }
 0x130   :  { %v1120_v17 = vsel %vm832_vm1, %v1046_v26, 0.0  ;;  %v921_v20 = vsel %vm832_vm1, %v1922_v58, 0.0  ;;  %v1122_v58 = vsel %vm832_vm1, %v1047_v9, 0.0 }
 0x131   :  { %v2069_v10 = vpop.f32.mrf.mxu0  ;;  %v2071_v32 = vpop.f32.mrf.mxu1  ;;  %v1121_v18 = vadd.f32 %v1120_v17, %v1119_v54  ;;  %v922_v36 = vadd.f32 %v921_v20, %v920_v14  ;;  %v1053_v17 = vmul.f32 %v2045_v5, %v2045_v5 }
 0x132   :  { %852 = vst.msk [vmem:[%s2492_s2 + $0x98] sm:$0xff] %vm832_vm1, %v2069_v10  ;;  %884 = vst.msk [vmem:[%s2492_s2 + $0x198] sm:$0xff] %vm832_vm1, %v2071_v32 }
 0x133   :  { %v654_v40 = vpop.f32.mrf.mxu0  ;;  %v782_v41 = vpop.f32.mrf.mxu1  ;;  %v1123_v62 = vadd.f32 %v1122_v58, %v1121_v18  ;;  %v924_v44 = vadd.f32 %v923_v29, %v922_v36  ;;  %v1054_v58 = vmul.f32 %v2069_v10, %v2069_v10  ;;  %v935_v36 = vsel %vm832_vm1, %v2069_v10, 0.0 }
 0x134   :  { %v1124_v40 = vsel %vm832_vm1, %v1048_v34, 0.0  ;;  %v925_v41 = vsel %vm832_vm1, %v1950_v2, 0.0  ;;  %v1126_v2 = vsel %vm832_vm1, %v1049_v33, 0.0 }
 0x135   :  { %v2093_v22 = vpop.f32.mrf.mxu0  ;;  %v2095_v56 = vpop.f32.mrf.mxu1  ;;  %v1125_v60 = vadd.f32 %v1124_v40, %v1123_v62  ;;  %v926_v26 = vadd.f32 %v925_v41, %v924_v44 }
 0x136   :  { %853 = vst.msk [vmem:[%s2492_s2 + $0xa0] sm:$0xff] %vm832_vm1, %v2093_v22  ;;  %885 = vst.msk [vmem:[%s2492_s2 + $0x1a0] sm:$0xff] %vm832_vm1, %v2095_v56  ;;  %v1055_v40 = vmul.f32 %v2093_v22, %v2093_v22 }
 0x137   :  { %v659_v0 = vpop.f32.mrf.mxu0  ;;  %v787_v1 = vpop.f32.mrf.mxu1  ;;  %v1127_v6 = vadd.f32 %v1126_v2, %v1125_v60  ;;  %v928_v4 = vadd.f32 %v927_v53, %v926_v26 }
 0x138   :  { %v1128_v0 = vsel %vm832_vm1, %v1050_v42, 0.0  ;;  %v929_v1 = vsel %vm832_vm1, %v1994_v21, 0.0  ;;  %v1130_v21 = vsel %vm832_vm1, %v1051_v57, 0.0 }
 0x139   :  { %v2117_v30 = vpop.f32.mrf.mxu0  ;;  %v2119_v16 = vpop.f32.mrf.mxu1  ;;  %v1129_v20 = vadd.f32 %v1128_v0, %v1127_v6  ;;  %v930_v34 = vadd.f32 %v929_v1, %v928_v4 }
 0x13a   :  { %854 = vst.msk [vmem:[%s2492_s2 + $0xa8] sm:$0xff] %vm832_vm1, %v2117_v30  ;;  %886 = vst.msk [vmem:[%s2492_s2 + $0x1a8] sm:$0xff] %vm832_vm1, %v2119_v16  ;;  %v1056_v2 = vmul.f32 %v2117_v30, %v2117_v30  ;;  %v939_v26 = vsel %vm832_vm1, %v2117_v30, 0.0 }
 0x13b   :  { %v662_v25 = vpop.f32.mrf.mxu0  ;;  %v790_v28 = vpop.f32.mrf.mxu1  ;;  %v1131_v45 = vadd.f32 %v1130_v21, %v1129_v20  ;;  %v932_v29 = vadd.f32 %v931_v13, %v930_v34 }
 0x13c   :  { %v1132_v25 = vsel %vm832_vm1, %v1052_v50, 0.0  ;;  %v933_v28 = vsel %vm832_vm1, %v2045_v5, 0.0  ;;  %v1134_v5 = vsel %vm832_vm1, %v1053_v17, 0.0 }
 0x13d   :  { %v2141_v38 = vpop.f32.mrf.mxu0  ;;  %v2143_v37 = vpop.f32.mrf.mxu1  ;;  %v1133_v41 = vadd.f32 %v1132_v25, %v1131_v45  ;;  %v934_v42 = vadd.f32 %v933_v28, %v932_v29 }
 0x13e   :  { %855 = vst.msk [vmem:[%s2492_s2 + $0xb0] sm:$0xff] %vm832_vm1, %v2141_v38  ;;  %887 = vst.msk [vmem:[%s2492_s2 + $0x1b0] sm:$0xff] %vm832_vm1, %v2143_v37  ;;  %v1057_v0 = vmul.f32 %v2141_v38, %v2141_v38 }
 0x13f   :  { %v667_v49 = vpop.f32.mrf.mxu0  ;;  %v795_v52 = vpop.f32.mrf.mxu1  ;;  %v1135_v10 = vadd.f32 %v1134_v5, %v1133_v41  ;;  %v936_v53 = vadd.f32 %v935_v36, %v934_v42 }
 0x140   :  { %v1136_v49 = vsel %vm832_vm1, %v1054_v58, 0.0  ;;  %v937_v52 = vsel %vm832_vm1, %v2093_v22, 0.0  ;;  %v1138_v22 = vsel %vm832_vm1, %v1055_v40, 0.0  ;;  %v1142_v34 = vsel %vm832_vm1, %v1057_v0, 0.0 }
 0x141   :  { %v668_v46 = vpop.f32.mrf.mxu0  ;;  %v2165_v61 = vpop.f32.mrf.mxu1  ;;  %v1137_v1 = vadd.f32 %v1136_v49, %v1135_v10  ;;  %v938_v50 = vadd.f32 %v937_v52, %v936_v53 }
 0x142   :  { %856 = vst.msk [vmem:[%s2492_s2 + $0xb8] sm:$0xff] %vm832_vm1, %v668_v46  ;;  %888 = vst.msk [vmem:[%s2492_s2 + $0x1b8] sm:$0xff] %vm832_vm1, %v2165_v61  ;;  %v1058_v21 = vmul.f32 %v668_v46, %v668_v46 }
 0x143   :  { %v670_v9 = vpop.f32.mrf.mxu0  ;;  %v798_v12 = vpop.f32.mrf.mxu1  ;;  %v1139_v30 = vadd.f32 %v1138_v22, %v1137_v1  ;;  %v940_v13 = vadd.f32 %v939_v26, %v938_v50 }
 0x144   :  { %v1140_v9 = vsel %vm832_vm1, %v1056_v2, 0.0  ;;  %v941_v12 = vsel %vm832_vm1, %v2141_v38, 0.0  ;;  %v943_v38 = vsel %vm832_vm1, %v668_v46, 0.0 }
 0x145   :  { %v673_v54 = vpop.f32.mrf.mxu0  ;;  %v2186_v14 = vpop.f32.mrf.mxu1  ;;  %v1141_v28 = vadd.f32 %v1140_v9, %v1139_v30  ;;  %v942_v58 = vadd.f32 %v941_v12, %v940_v13 }
 0x146   :  { %857 = vst.msk [vmem:[%s2492_s2 + $0xc0] sm:$0xff] %vm832_vm1, %v673_v54  ;;  %889 = vst.msk [vmem:[%s2492_s2 + $0x1c0] sm:$0xff] %vm832_vm1, %v2186_v14  ;;  %v1059_v25 = vmul.f32 %v673_v54, %v673_v54 }
 0x147   :  { %v675_v33 = vpop.f32.mrf.mxu0  ;;  %v803_v18 = vpop.f32.mrf.mxu1  ;;  %v1143_v46 = vadd.f32 %v1142_v34, %v1141_v28  ;;  %v944_v36 = vadd.f32 %v943_v38, %v942_v58 }
 0x148   :  { %v1144_v33 = vsel %vm832_vm1, %v1058_v21, 0.0  ;;  %v945_v18 = vsel %vm832_vm1, %v673_v54, 0.0  ;;  %v1146_v42 = vsel %vm832_vm1, %v1059_v25, 0.0 }
 0x149   :  { %v676_v62 = vpop.f32.mrf.mxu0  ;;  %v2207_v44 = vpop.f32.mrf.mxu1  ;;  %v1145_v52 = vadd.f32 %v1144_v33, %v1143_v46  ;;  %v946_v2 = vadd.f32 %v945_v18, %v944_v36 }
 0x14a   :  { %858 = vst.msk [vmem:[%s2492_s2 + $0xc8] sm:$0xff] %vm832_vm1, %v676_v62  ;;  %890 = vst.msk [vmem:[%s2492_s2 + $0x1c8] sm:$0xff] %vm832_vm1, %v2207_v44  ;;  %v1060_v5 = vmul.f32 %v676_v62, %v676_v62  ;;  %v947_v54 = vsel %vm832_vm1, %v676_v62, 0.0 }
 0x14b   :  { %v678_v57 = vpop.f32.mrf.mxu0  ;;  %v806_v60 = vpop.f32.mrf.mxu1  ;;  %v1147_v62 = vadd.f32 %v1146_v42, %v1145_v52  ;;  %v948_v26 = vadd.f32 %v947_v54, %v946_v2 }
 0x14c   :  { %v1148_v57 = vsel %vm832_vm1, %v1060_v5, 0.0 }
 0x14d   :  { %v681_v6 = vpop.f32.mrf.mxu0  ;;  %v2228_v4 = vpop.f32.mrf.mxu1  ;;  %v1149_v12 = vadd.f32 %v1148_v57, %v1147_v62 }
 0x14e   :  { %859 = vst.msk [vmem:[%s2492_s2 + $0xd0] sm:$0xff] %vm832_vm1, %v681_v6  ;;  %891 = vst.msk [vmem:[%s2492_s2 + $0x1d0] sm:$0xff] %vm832_vm1, %v2228_v4  ;;  %v1061_v49 = vmul.f32 %v681_v6, %v681_v6  ;;  %v949_v60 = vsel %vm832_vm1, %v681_v6, 0.0 }
 0x14f   :  { %v683_v17 = vpop.f32.mrf.mxu0  ;;  %v811_v20 = vpop.f32.mrf.mxu1  ;;  %v950_v21 = vadd.f32 %v949_v60, %v948_v26  ;;  %v1067_v26 = vmul.f32 %v1756_v11, %v1756_v11 }
 0x150   :  { %v1150_v50 = vsel %vm832_vm1, %v1061_v49, 0.0 }
 0x151   :  { %v684_v45 = vpop.f32.mrf.mxu0  ;;  %v2244_v29 = vpop.f32.mrf.mxu1  ;;  %v1151_v38 = vadd.f32 %v1150_v50, %v1149_v12 }
 0x152   :  { %860 = vst.msk [vmem:[%s2492_s2 + $0xd8] sm:$0xff] %vm832_vm1, %v684_v45  ;;  %892 = vst.msk [vmem:[%s2492_s2 + $0x1d8] sm:$0xff] %vm832_vm1, %v2244_v29  ;;  %v1062_v22 = vmul.f32 %v684_v45, %v684_v45  ;;  %v951_v6 = vsel %vm832_vm1, %v684_v45, 0.0 }
 0x153   :  { %v686_v40 = vpop.f32.mrf.mxu0  ;;  %v814_v41 = vpop.f32.mrf.mxu1  ;;  %v952_v25 = vadd.f32 %v951_v6, %v950_v21  ;;  %v961_v21 = vsel %vm832_vm1, %v1756_v11, 0.0  ;;  %v965_v11 = vsel %vm832_vm1, %v1784_v19, 0.0 }
 0x154   :  { %v1152_v17 = vsel %vm832_vm1, %v1062_v22, 0.0 }
 0x155   :  { %v689_v10 = vpop.f32.mrf.mxu0  ;;  %v2259_v53 = vpop.f32.mrf.mxu1  ;;  %v1153_v18 = vadd.f32 %v1152_v17, %v1151_v38  ;;  %v1162_v38 = vsel %vm832_vm1, %v1067_v26, 0.0 }
 0x156   :  { %861 = vst.msk [vmem:[%s2492_s2 + $0xe0] sm:$0xff] %vm832_vm1, %v689_v10  ;;  %893 = vst.msk [vmem:[%s2492_s2 + $0x1e0] sm:$0xff] %vm832_vm1, %v2259_v53  ;;  %v1063_v9 = vmul.f32 %v689_v10, %v689_v10  ;;  %v953_v20 = vsel %vm832_vm1, %v689_v10, 0.0 }
 0x157   :  { %v691_v0 = vpop.f32.mrf.mxu0  ;;  %v819_v1 = vpop.f32.mrf.mxu1  ;;  %v954_v5 = vadd.f32 %v953_v20, %v952_v25  ;;  %v963_v25 = vsel %vm832_vm1, %v1770_v15, 0.0 }
 0x158   :  { %v1154_v45 = vsel %vm832_vm1, %v1063_v9, 0.0 }
 0x159   :  { %v692_v30 = vpop.f32.mrf.mxu0  ;;  %v2274_v13 = vpop.f32.mrf.mxu1  ;;  %v1155_v54 = vadd.f32 %v1154_v45, %v1153_v18  ;;  %v1070_v18 = vmul.f32 %v1798_v23, %v1798_v23 }
 0x15a   :  { %862 = vst.msk [vmem:[%s2492_s2 + $0xe8] sm:$0xff] %vm832_vm1, %v692_v30  ;;  %v1064_v34 = vmul.f32 %v692_v30, %v692_v30  ;;  %894 = vst.msk [vmem:[%s2492_s2 + $0x1e8] sm:$0xff] %vm832_vm1, %v2274_v13  ;;  %v955_v33 = vsel %vm832_vm1, %v692_v30, 0.0  ;;  %v1068_v30 = vmul.f32 %v1770_v15, %v1770_v15  ;;  %v967_v15 = vsel %vm832_vm1, %v1798_v23, 0.0 }
 0x15b   :  { %v694_v28 = vpop.f32.mrf.mxu0  ;;  %v822_v58 = vpop.f32.mrf.mxu1  ;;  %v956_v49 = vadd.f32 %v955_v33, %v954_v5  ;;  %v971_v23 = vsel %vm832_vm1, %v1826_v31, 0.0 }
 0x15c   :  { %v1156_v40 = vsel %vm832_vm1, %v1064_v34, 0.0  ;;  %v1069_v28 = vmul.f32 %v1784_v19, %v1784_v19  ;;  %v1164_v33 = vsel %vm832_vm1, %v1068_v30, 0.0  ;;  %v969_v19 = vsel %vm832_vm1, %v1812_v27, 0.0 }
 0x15d   :  { %v697_v46 = vpop.f32.mrf.mxu0  ;;  %v2289_v36 = vpop.f32.mrf.mxu1  ;;  %v1157_v57 = vadd.f32 %v1156_v40, %v1155_v54 }
 0x15e   :  { %863 = vst.msk [vmem:[%s2492_s2 + $0xf0] sm:$0xff] %vm832_vm1, %v697_v46  ;;  %v957_v41 = vsel %vm832_vm1, %v697_v46, 0.0  ;;  %v1065_v42 = vmul.f32 %v697_v46, %v697_v46  ;;  %895 = vst.msk [vmem:[%s2492_s2 + $0x1f0] sm:$0xff] %vm832_vm1, %v2289_v36  ;;  %v1166_v40 = vsel %vm832_vm1, %v1069_v28, 0.0  ;;  %v1077_v28 = vmul.f32 %v1896_v51, %v1896_v51 }
 0x15f   :  { %v699_v52 = vpop.f32.mrf.mxu0  ;;  %v827_v2 = vpop.f32.mrf.mxu1  ;;  %v958_v60 = vadd.f32 %v957_v41, %v956_v49  ;;  %v1071_v41 = vmul.f32 %v1812_v27, %v1812_v27  ;;  %v1168_v49 = vsel %vm832_vm1, %v1070_v18, 0.0  ;;  %v973_v27 = vsel %vm832_vm1, %v1840_v35, 0.0 }
 0x160   :  { %v1158_v10 = vsel %vm832_vm1, %v1065_v42, 0.0  ;;  %v1072_v52 = vmul.f32 %v1826_v31, %v1826_v31  ;;  %v975_v31 = vsel %vm832_vm1, %v1854_v39, 0.0 }
 0x161   :  { %v700_v22 = vpop.f32.mrf.mxu0  ;;  %v2303_v62 = vpop.f32.mrf.mxu1  ;;  %v1159_v50 = vadd.f32 %v1158_v10, %v1157_v57  ;;  %v1170_v57 = vsel %vm832_vm1, %v1071_v41, 0.0 }
 0x162   :  { %864 = vst.msk [vmem:[%s2492_s2 + $0xf8] sm:$0xff] %vm832_vm1, %v700_v22  ;;  %v959_v0 = vsel %vm832_vm1, %v700_v22, 0.0  ;;  %v1066_v1 = vmul.f32 %v700_v22, %v700_v22  ;;  %896 = vst.msk [vmem:[%s2492_s2 + $0x1f8] sm:$0xff] %vm832_vm1, %v2303_v62 }
 0x163   :  { %v960_v6 = vadd.f32 %v959_v0, %v958_v60  ;;  %v702_v9 = vpop.f32.mrf.mxu0  ;;  %v830_v12 = vpop.f32.mrf.mxu1  ;;  %v1073_v60 = vmul.f32 %v1840_v35, %v1840_v35  ;;  %v1172_v0 = vsel %vm832_vm1, %v1072_v52, 0.0  ;;  %v977_v35 = vsel %vm832_vm1, %v1868_v43, 0.0 }
 0x164   :  { %v1160_v17 = vsel %vm832_vm1, %v1066_v1, 0.0  ;;  %v1074_v1 = vmul.f32 %v1854_v39, %v1854_v39  ;;  %v1075_v12 = vmul.f32 %v1868_v43, %v1868_v43  ;;  %v979_v39 = vsel %vm832_vm1, %v1882_v47, 0.0 }
 0x165   :  { %v962_v20 = vadd.f32 %v961_v21, %v960_v6  ;;  %v1161_v34 = vadd.f32 %v1160_v17, %v1159_v50  ;;  %v1174_v9 = vsel %vm832_vm1, %v1073_v60, 0.0  ;;  %v981_v43 = vsel %vm832_vm1, %v1896_v51, 0.0 }
 0x166   :  { %v1176_v17 = vsel %vm832_vm1, %v1074_v1, 0.0  ;;  %v985_v51 = vsel %vm832_vm1, %v1924_v59, 0.0  ;;  %v1082_v60 = vmul.f32 %v1966_v7, %v1966_v7 }
 0x167   :  { %v964_v58 = vadd.f32 %v963_v25, %v962_v20  ;;  %v1163_v45 = vadd.f32 %v1162_v38, %v1161_v34  ;;  %v1076_v20 = vmul.f32 %v1882_v47, %v1882_v47  ;;  %v1178_v25 = vsel %vm832_vm1, %v1075_v12, 0.0 }
 0x168   :  { %v983_v47 = vsel %vm832_vm1, %v1910_v55, 0.0 }
 0x169   :  { %v966_v5 = vadd.f32 %v965_v11, %v964_v58  ;;  %v1165_v46 = vadd.f32 %v1164_v33, %v1163_v45  ;;  %v1180_v33 = vsel %vm832_vm1, %v1076_v20, 0.0  ;;  %v1078_v11 = vmul.f32 %v1910_v55, %v1910_v55 }
 0x16a   :  { %v987_v55 = vsel %vm832_vm1, %v1938_v63, 0.0 }
 0x16b   :  { %v968_v42 = vadd.f32 %v967_v15, %v966_v5  ;;  %v1167_v54 = vadd.f32 %v1166_v40, %v1165_v46  ;;  %v1182_v46 = vsel %vm832_vm1, %v1077_v28, 0.0  ;;  %v1079_v40 = vmul.f32 %v1924_v59, %v1924_v59 }
 0x16c   :  { %v989_v59 = vsel %vm832_vm1, %v1952_v3, 0.0  ;;  %v1087_v28 = vmul.f32 %v2095_v56, %v2095_v56 }
 0x16d   :  { %v970_v2 = vadd.f32 %v969_v19, %v968_v42  ;;  %v1169_v10 = vadd.f32 %v1168_v49, %v1167_v54  ;;  %v1184_v42 = vsel %vm832_vm1, %v1078_v11, 0.0  ;;  %v1080_v54 = vmul.f32 %v1938_v63, %v1938_v63 }
 0x16e   :  { %v1186_v52 = vsel %vm832_vm1, %v1079_v40, 0.0  ;;  %v991_v63 = vsel %vm832_vm1, %v1966_v7, 0.0  ;;  %v995_v7 = vsel %vm832_vm1, %v2023_v48, 0.0 }
 0x16f   :  { %v972_v22 = vadd.f32 %v971_v23, %v970_v2  ;;  %v1171_v26 = vadd.f32 %v1170_v57, %v1169_v10  ;;  %v1081_v2 = vmul.f32 %v1952_v3, %v1952_v3  ;;  %v1188_v23 = vsel %vm832_vm1, %v1080_v54, 0.0 }
 0x170   :  { %v993_v3 = vsel %vm832_vm1, %v1996_v24, 0.0 }
 0x171   :  { %v974_v50 = vadd.f32 %v973_v27, %v972_v22  ;;  %v1173_v6 = vadd.f32 %v1172_v0, %v1171_v26  ;;  %v1190_v0 = vsel %vm832_vm1, %v1081_v2, 0.0  ;;  %v1083_v27 = vmul.f32 %v1996_v24, %v1996_v24 }
 0x172   :  { %v997_v24 = vsel %vm832_vm1, %v2047_v8, 0.0  ;;  %v1092_v2 = vmul.f32 %v2207_v44, %v2207_v44 }
 0x173   :  { %v976_v21 = vadd.f32 %v975_v31, %v974_v50  ;;  %v1175_v30 = vadd.f32 %v1174_v9, %v1173_v6  ;;  %v1192_v6 = vsel %vm832_vm1, %v1082_v60, 0.0  ;;  %v1084_v9 = vmul.f32 %v2023_v48, %v2023_v48 }
 0x174   :  { %v999_v48 = vsel %vm832_vm1, %v2071_v32, 0.0 }
 0x175   :  { %v1177_v34 = vadd.f32 %v1176_v17, %v1175_v30  ;;  %v978_v38 = vadd.f32 %v977_v35, %v976_v21  ;;  %v1194_v21 = vsel %vm832_vm1, %v1083_v27, 0.0  ;;  %v1085_v30 = vmul.f32 %v2047_v8, %v2047_v8 }
 0x176   :  { %v1196_v20 = vsel %vm832_vm1, %v1084_v9, 0.0  ;;  %v1001_v8 = vsel %vm832_vm1, %v2095_v56, 0.0  ;;  %v1005_v56 = vsel %vm832_vm1, %v2143_v37, 0.0 }
 0x177   :  { %v980_v58 = vadd.f32 %v979_v39, %v978_v38  ;;  %v1179_v45 = vadd.f32 %v1178_v25, %v1177_v34  ;;  %v1086_v34 = vmul.f32 %v2071_v32, %v2071_v32  ;;  %v1198_v39 = vsel %vm832_vm1, %v1085_v30, 0.0 }
 0x178   :  { %v1003_v32 = vsel %vm832_vm1, %v2119_v16, 0.0  ;;  %v1097_v30 = vmul.f32 %v2289_v36, %v2289_v36 }
 0x179   :  { %v982_v18 = vadd.f32 %v981_v43, %v980_v58  ;;  %v1181_v5 = vadd.f32 %v1180_v33, %v1179_v45  ;;  %v1200_v33 = vsel %vm832_vm1, %v1086_v34, 0.0  ;;  %v1088_v43 = vmul.f32 %v2119_v16, %v2119_v16 }
 0x17a   :  { %v1007_v16 = vsel %vm832_vm1, %v2165_v61, 0.0 }
 0x17b   :  { %v984_v15 = vadd.f32 %v983_v47, %v982_v18  ;;  %v1183_v41 = vadd.f32 %v1182_v46, %v1181_v5  ;;  %v1202_v5 = vsel %vm832_vm1, %v1087_v28, 0.0  ;;  %v1089_v46 = vmul.f32 %v2143_v37, %v2143_v37 }
 0x17c   :  { %v1009_v37 = vsel %vm832_vm1, %v2186_v14, 0.0 }
 0x17d   :  { %v986_v49 = vadd.f32 %v985_v51, %v984_v15  ;;  %v1185_v19 = vadd.f32 %v1184_v42, %v1183_v41  ;;  %v1204_v15 = vsel %vm832_vm1, %v1088_v43, 0.0  ;;  %v1090_v41 = vmul.f32 %v2165_v61, %v2165_v61 }
 0x17e   :  { %v1206_v54 = vsel %vm832_vm1, %v1089_v46, 0.0  ;;  %v1011_v61 = vsel %vm832_vm1, %v2207_v44, 0.0  ;;  %v1015_v44 = vsel %vm832_vm1, %v2244_v29, 0.0  ;;  %v897_v46 = vld [vmem:[%s2493_s3] sm:$0x1] }
 0x17f   :  { %v988_v10 = vadd.f32 %v987_v55, %v986_v49  ;;  %v1187_v57 = vadd.f32 %v1186_v52, %v1185_v19  ;;  %v1091_v49 = vmul.f32 %v2186_v14, %v2186_v14  ;;  %v1208_v55 = vsel %vm832_vm1, %v1090_v41, 0.0 }
 0x180   :  { %v1013_v14 = vsel %vm832_vm1, %v2228_v4, 0.0 }
 0x181   :  { %v990_v22 = vadd.f32 %v989_v59, %v988_v10  ;;  %v1189_v26 = vadd.f32 %v1188_v23, %v1187_v57  ;;  %v1210_v23 = vsel %vm832_vm1, %v1091_v49, 0.0  ;;  %v1093_v59 = vmul.f32 %v2228_v4, %v2228_v4 }
 0x182   :  { %v1017_v4 = vsel %vm832_vm1, %v2259_v53, 0.0 }
 0x183   :  { %v992_v1 = vadd.f32 %v991_v63, %v990_v22  ;;  %v1191_v50 = vadd.f32 %v1190_v0, %v1189_v26  ;;  %v1212_v26 = vsel %vm832_vm1, %v1092_v2, 0.0  ;;  %v1094_v0 = vmul.f32 %v2244_v29, %v2244_v29 }
 0x184   :  { %v1019_v29 = vsel %vm832_vm1, %v2274_v13, 0.0 }
 0x185   :  { %v994_v31 = vadd.f32 %v993_v3, %v992_v1  ;;  %v1193_v12 = vadd.f32 %v1192_v6, %v1191_v50  ;;  %v1214_v1 = vsel %vm832_vm1, %v1093_v59, 0.0  ;;  %v1095_v50 = vmul.f32 %v2259_v53, %v2259_v53 }
 0x186   :  { %v1216_v9 = vsel %vm832_vm1, %v1094_v0, 0.0  ;;  %v1021_v53 = vsel %vm832_vm1, %v2289_v36, 0.0 }
 0x187   :  { %v996_v17 = vadd.f32 %v995_v7, %v994_v31  ;;  %v1195_v35 = vadd.f32 %v1194_v21, %v1193_v12  ;;  %v1096_v31 = vmul.f32 %v2274_v13, %v2274_v13  ;;  %v1218_v7 = vsel %vm832_vm1, %v1095_v50, 0.0 }
 0x188   :  { %v1023_v13 = vsel %vm832_vm1, %v2303_v62, 0.0 }
 0x189   :  { %v1197_v38 = vadd.f32 %v1196_v20, %v1195_v35  ;;  %v998_v25 = vadd.f32 %v997_v24, %v996_v17  ;;  %v1220_v20 = vsel %vm832_vm1, %v1096_v31, 0.0  ;;  %v1098_v24 = vmul.f32 %v2303_v62, %v2303_v62 }
 0x18b   :  { %v1199_v58 = vadd.f32 %v1198_v39, %v1197_v38  ;;  %v1000_v45 = vadd.f32 %v999_v48, %v998_v25  ;;  %v1222_v25 = vsel %vm832_vm1, %v1097_v30, 0.0  ;;  %v1224_v28 = vsel %vm832_vm1, %v1098_v24, 0.0 }
 0x18d   :  { %v1201_v11 = vadd.f32 %v1200_v33, %v1199_v58  ;;  %v1002_v18 = vadd.f32 %v1001_v8, %v1000_v45 }
 0x18f   :  { %v1203_v47 = vadd.f32 %v1202_v5, %v1201_v11  ;;  %v1004_v40 = vadd.f32 %v1003_v32, %v1002_v18 }
 0x191   :  { %v1205_v42 = vadd.f32 %v1204_v15, %v1203_v47  ;;  %v1006_v51 = vadd.f32 %v1005_v56, %v1004_v40  ;;  %v1034_v40 = vld [vmem:[%s2494_s4] sm:$0x1] }
 0x193   :  { %v1207_v19 = vadd.f32 %v1206_v54, %v1205_v42  ;;  %v1008_v52 = vadd.f32 %v1007_v16, %v1006_v51 }
 0x195   :  { %v1209_v10 = vadd.f32 %v1208_v55, %v1207_v19  ;;  %v1010_v57 = vadd.f32 %v1009_v37, %v1008_v52 }
 0x197   :  { %v1211_v60 = vadd.f32 %v1210_v23, %v1209_v10  ;;  %v1012_v22 = vadd.f32 %v1011_v61, %v1010_v57 }
 0x199   :  { %v1213_v63 = vadd.f32 %v1212_v26, %v1211_v60  ;;  %v1014_v27 = vadd.f32 %v1013_v14, %v1012_v22 }
 0x19b   :  { %v1215_v6 = vadd.f32 %v1214_v1, %v1213_v63  ;;  %v1016_v3 = vadd.f32 %v1015_v44, %v1014_v27 }
 0x19d   :  { %v1217_v12 = vadd.f32 %v1216_v9, %v1215_v6  ;;  %v1018_v21 = vadd.f32 %v1017_v4, %v1016_v3 }
 0x19f   :  { %v1219_v17 = vadd.f32 %v1218_v7, %v1217_v12  ;;  %v1020_v35 = vadd.f32 %v1019_v29, %v1018_v21 }
 0x1a1   :  { %v1221_v34 = vadd.f32 %v1220_v20, %v1219_v17  ;;  %v1022_v38 = vadd.f32 %v1021_v53, %v1020_v35 }
 0x1a3   :  { %v1223_v39 = vadd.f32 %v1222_v25, %v1221_v34  ;;  %v1024_v48 = vadd.f32 %v1023_v13, %v1022_v38 }
 0x1a5   :  { %v1025_v58 = vrot.slane %v1024_v48, 4  ;;  %v1225_v45 = vadd.f32 %v1224_v28, %v1223_v39 }
 0x1a7   :  { %v1026_v33 = vadd.f32 %v1025_v58, %v1024_v48  ;;  %v1226_v8 = vrot.slane %v1225_v45, 4 }
 0x1a9   :  { %v1027_v43 = vrot.slane %v1026_v33, 2  ;;  %v1227_v36 = vadd.f32 %v1226_v8, %v1225_v45 }
 0x1ab   :  { %v1028_v11 = vadd.f32 %v1027_v43, %v1026_v33  ;;  %v1228_v18 = vrot.slane %v1227_v36, 2 }
 0x1ad   :  { %v1029_v5 = vrot.slane %v1028_v11, 1  ;;  %v1229_v32 = vadd.f32 %v1228_v18, %v1227_v36 }
 0x1af   :  { %v1030_v47 = vadd.f32 %v1029_v5, %v1028_v11  ;;  %v1230_v62 = vrot.slane %v1229_v32, 1 }
 0x1b1   :  { %v1031_v15 = vadd.f32 %v1030_v47, %v897_v46  ;;  %v1231_v56 = vadd.f32 %v1230_v62, %v1229_v32 }
 0x1b3   :  { %1033 = vst.msk [vmem:[%s2493_s3] sm:$0x1] %vm19_vm2, %v1031_v15  ;;  %v1232_v41 = vadd.f32 %v1231_v56, %v1034_v40 }
 0x1b5   :  { %1233 = vst.msk [vmem:[%s2494_s4] sm:$0x1] %vm19_vm2, %v1232_v41 }

// kernel: generator_forward.17
= control target key start
LH: loop header
LB: loop body
LE: loop exit
PB: predicated region body
PF: predicated region fallthrough
CT: control target
= control target key end

     0   :  { %s1382_s9 = smov 0   ;;  %s1614_s0 = inlined_call_operand.vmem [shape: bf16[2048,72], index: 0, kind: input, shape index: {}]   ;;  %s1615_s1 = inlined_call_operand.vmem [shape: bf16[72,12], index: 1, kind: input, shape index: {}]   ;;  %s1616_s2 = inlined_call_operand.vmem [shape: f32[2048,12], index: 2, kind: output, shape index: {}]  }
   0x1 LB: > { %s983_s10 = sadd.s32 4294967295, %s1365_s9   ;;  %p987_p0 = scmp.ge.s32.totalorder %s1365_s9, 1  ;;  %s1365_s9 = sphi %s1382_s9, %s12_s9  }
   0x2   : > { %p113_p1 = scmp.lt.s32.totalorder %s1365_s9, 5 }
   0x4   : > { %p114_p2 = pnand %p987_p0, %p113_p1 }
   0x5   : > { %s988_s15 = sshll.u32 (!%p114_p2), %s983_s10, 6 }
   0x6   : > { %117 = sbr.rel (%p114_p2) target bundleno = 303 (0x12f), region = 28  ;;  %p136_p3 = scmp.lt.s32.totalorder (!%p114_p2), %s988_s15, 255 }
   0xb   : > { %v1194_v0 = vld [vmem:[%s1615_s1 + $0x20] ss:$0 sps:$4 sm:$0xff]   ;;  %vm505_vm0 = vcmask 1043456   ;;  %v1195_v1 = vld [vmem:[%s1615_s1 + $0x18] sm:$0xff]   ;;  %v1196_v3 = vld [vmem:[%s1615_s1 + $0x10] sm:$0xff]   ;;  %s1618_s15 = smov (!%p136_p3, %s988_s15), 255 }
   0xc   : > { %1184 = vmatprep.subr.msk.bf16.mxu0 %vm505_vm0, %v1194_v0  ;;  %1185 = vmatprep.subr.msk.bf16.mxu1 %vm505_vm0, %v1194_v0  ;;  %v507_v2 = vsel %vm505_vm0, %v1194_v0, 0  ;;  %v1197_v4 = vld [vmem:[%s1615_s1 + $0x8] sm:$0xff]   ;;  %s989_s20 = sshll.u32 %s1618_s15, 2  ;;  %vm408_vm1 = vcmask 588800   ;;  %v1198_v7 = vld [vmem:[%s1615_s1] sm:$0xff]   ;;  %s991_s26 = sshll.u32 %s1618_s15, 3 }
   0xd   : > { %1101 = vmatpush3.bf16.msra.mxu0 %v507_v2  ;;  %1179 = vmatpush3.bf16.msra.mxu1 %v507_v2  ;;  %s1408_s23 = scalar_lea.vmem %s1614_s0, %s989_s20  ;;  %s1481_s29 = scalar_lea.vmem %s1616_s2, %s991_s26  ;;  %vm862_vm2 = vcmask 97280  }
   0xe   : > { %1102 = vmatprep.subr.bf16.mxu0 %v1195_v1  ;;  %1175 = vmatprep.subr.bf16.mxu1 %v1195_v1  ;;  %v1199_v5 = vld [vmem:[%s1408_s23] sm:$0xff]   ;;  %v1201_v8 = vld [vmem:[%s1408_s23 + $0x8] sm:$0xff]   ;;  %v1203_v10 = vld [vmem:[%s1408_s23 + $0x10] sm:$0xff]  }
   0xf   : > { %v1200_v6 = vld [vmem:[%s1408_s23 + $0x80] sm:$0xff]   ;;  %1110 = vmatprep.mubr.msk.bf16.mxu0 %vm408_vm1, %v1199_v5  ;;  %v1202_v9 = vld [vmem:[%s1408_s23 + $0x88] sm:$0xff]   ;;  %v1204_v11 = vld [vmem:[%s1408_s23 + $0x90] sm:$0xff]  }
  0x10   : > { %1142 = vmatprep.mubr.msk.bf16.mxu1 %vm408_vm1, %v1200_v6  ;;  %v1205_v12 = vld [vmem:[%s1408_s23 + $0x18] sm:$0xff]   ;;  %v1207_v14 = vld [vmem:[%s1408_s23 + $0x20] sm:$0xff]   ;;  %v1209_v16 = vld [vmem:[%s1408_s23 + $0x28] sm:$0xff]  }
  0x11   : > { %1103 = vmatpush3.bf16.msra.mxu0 %v1195_v1  ;;  %1180 = vmatpush3.bf16.msra.mxu1 %v1195_v1  ;;  %v1206_v13 = vld [vmem:[%s1408_s23 + $0x98] sm:$0xff]   ;;  %v1208_v15 = vld [vmem:[%s1408_s23 + $0xa0] sm:$0xff]   ;;  %v1210_v17 = vld [vmem:[%s1408_s23 + $0xa8] sm:$0xff]  }
  0x12   : > { %1104 = vmatprep.subr.bf16.mxu0 %v1196_v3  ;;  %1176 = vmatprep.subr.bf16.mxu1 %v1196_v3  ;;  %v1211_v18 = vld [vmem:[%s1408_s23 + $0x30] sm:$0xff]   ;;  %v1213_v20 = vld [vmem:[%s1408_s23 + $0x38] sm:$0xff]   ;;  %v1215_v22 = vld [vmem:[%s1408_s23 + $0x40] sm:$0xff]  }
  0x13   : > { %v1212_v19 = vld [vmem:[%s1408_s23 + $0xb0] sm:$0xff]   ;;  %v1214_v21 = vld [vmem:[%s1408_s23 + $0xb8] sm:$0xff]   ;;  %v1216_v23 = vld [vmem:[%s1408_s23 + $0xc0] sm:$0xff]  }
  0x14   : > { %v1217_v24 = vld [vmem:[%s1408_s23 + $0x48] sm:$0xff]   ;;  %v1219_v26 = vld [vmem:[%s1408_s23 + $0x50] sm:$0xff]   ;;  %v1221_v28 = vld [vmem:[%s1408_s23 + $0x58] sm:$0xff]  }
  0x15   : > { %1105 = vmatpush3.bf16.msra.mxu0 %v1196_v3  ;;  %1181 = vmatpush3.bf16.msra.mxu1 %v1196_v3  ;;  %v1218_v25 = vld [vmem:[%s1408_s23 + $0xc8] sm:$0xff]   ;;  %v1220_v27 = vld [vmem:[%s1408_s23 + $0xd0] sm:$0xff]   ;;  %v1222_v29 = vld [vmem:[%s1408_s23 + $0xd8] sm:$0xff]  }
  0x16   : > { %1106 = vmatprep.subr.bf16.mxu0 %v1197_v4  ;;  %1177 = vmatprep.subr.bf16.mxu1 %v1197_v4  ;;  %v1223_v30 = vld [vmem:[%s1408_s23 + $0x60] sm:$0xff]   ;;  %v1225_v32 = vld [vmem:[%s1408_s23 + $0x68] sm:$0xff]   ;;  %v1227_v34 = vld [vmem:[%s1408_s23 + $0x70] sm:$0xff]  }
  0x17   : > { %v1224_v31 = vld [vmem:[%s1408_s23 + $0xe0] sm:$0xff]   ;;  %v1226_v33 = vld [vmem:[%s1408_s23 + $0xe8] sm:$0xff]   ;;  %v1228_v35 = vld [vmem:[%s1408_s23 + $0xf0] sm:$0xff]  }
  0x18   : > { %v1229_v36 = vld [vmem:[%s1408_s23 + $0x78] sm:$0xff]  }
  0x19   : > { %1107 = vmatpush3.bf16.msra.mxu0 %v1197_v4  ;;  %1182 = vmatpush3.bf16.msra.mxu1 %v1197_v4  ;;  %v1230_v37 = vld [vmem:[%s1408_s23 + $0xf8] sm:$0xff]  }
  0x1a   : > { %1108 = vmatprep.subr.bf16.mxu0 %v1198_v7  ;;  %1178 = vmatprep.subr.bf16.mxu1 %v1198_v7 }
  0x1d   : > { %1109 = vmatpush3.bf16.msra.mxu0 %v1198_v7  ;;  %1183 = vmatpush3.bf16.msra.mxu1 %v1198_v7 }
  0x20   : > { %1111 = vmatmul.mubr.msk.bf16.vlgmr.msra.gmra.mxu0 %vm408_vm1, %v1201_v8  ;;  %1143 = vmatmul.mubr.msk.bf16.vlgmr.msra.gmra.mxu1 %vm408_vm1, %v1202_v9 }
  0x21   : > { %1114 = vmatprep.mubr.msk.bf16.mxu0 %vm408_vm1, %v1203_v10  ;;  %1146 = vmatprep.mubr.msk.bf16.mxu1 %vm408_vm1, %v1204_v11 }
  0x28   : > { %1115 = vmatmul.mubr.msk.bf16.gmra.mxu0 %vm408_vm1, %v1205_v12  ;;  %1147 = vmatmul.mubr.msk.bf16.gmra.mxu1 %vm408_vm1, %v1206_v13 }
  0x29   : > { %1118 = vmatprep.mubr.msk.bf16.mxu0 %vm408_vm1, %v1207_v14  ;;  %1150 = vmatprep.mubr.msk.bf16.mxu1 %vm408_vm1, %v1208_v15 }
  0x30   : > { %1119 = vmatmul.mubr.msk.bf16.gmra.mxu0 %vm408_vm1, %v1209_v16  ;;  %1151 = vmatmul.mubr.msk.bf16.gmra.mxu1 %vm408_vm1, %v1210_v17 }
  0x31   : > { %1122 = vmatprep.mubr.msk.bf16.mxu0 %vm408_vm1, %v1211_v18  ;;  %1154 = vmatprep.mubr.msk.bf16.mxu1 %vm408_vm1, %v1212_v19 }
  0x38   : > { %1123 = vmatmul.mubr.msk.bf16.gmra.mxu0 %vm408_vm1, %v1213_v20  ;;  %1155 = vmatmul.mubr.msk.bf16.gmra.mxu1 %vm408_vm1, %v1214_v21 }
  0x39   : > { %1126 = vmatprep.mubr.msk.bf16.mxu0 %vm408_vm1, %v1215_v22  ;;  %1158 = vmatprep.mubr.msk.bf16.mxu1 %vm408_vm1, %v1216_v23 }
  0x40   : > { %1127 = vmatmul.mubr.msk.bf16.gmra.mxu0 %vm408_vm1, %v1217_v24  ;;  %1159 = vmatmul.mubr.msk.bf16.gmra.mxu1 %vm408_vm1, %v1218_v25 }
  0x41   : > { %1130 = vmatprep.mubr.msk.bf16.mxu0 %vm408_vm1, %v1219_v26  ;;  %1162 = vmatprep.mubr.msk.bf16.mxu1 %vm408_vm1, %v1220_v27 }
  0x48   : > { %1131 = vmatmul.mubr.msk.bf16.gmra.mxu0 %vm408_vm1, %v1221_v28  ;;  %1163 = vmatmul.mubr.msk.bf16.gmra.mxu1 %vm408_vm1, %v1222_v29 }
  0x49   : > { %1134 = vmatprep.mubr.msk.bf16.mxu0 %vm408_vm1, %v1223_v30  ;;  %1166 = vmatprep.mubr.msk.bf16.mxu1 %vm408_vm1, %v1224_v31 }
  0x50   : > { %1135 = vmatmul.mubr.msk.bf16.gmra.mxu0 %vm408_vm1, %v1225_v32  ;;  %1167 = vmatmul.mubr.msk.bf16.gmra.mxu1 %vm408_vm1, %v1226_v33 }
  0x51   : > { %1138 = vmatprep.mubr.msk.bf16.mxu0 %vm408_vm1, %v1227_v34  ;;  %1170 = vmatprep.mubr.msk.bf16.mxu1 %vm408_vm1, %v1228_v35 }
  0x58   : > { %1139 = vmatmul.mubr.msk.bf16.gmra.mxu0 %vm408_vm1, %v1229_v36  ;;  %1171 = vmatmul.mubr.msk.bf16.gmra.mxu1 %vm408_vm1, %v1230_v37 }
  0xe0   : > { %v1112_v38 = vpop.f32.mrf.mxu0  ;;  %v1144_v39 = vpop.f32.mrf.mxu1 }
  0xe1   : > { %1231 = vtanh.f32 %v1112_v38 }
  0xe2   : > { %1233 = vtanh.f32 %v1144_v39  ;;  %v543_v40 = vpop.f32.mrf.mxu0  ;;  %v671_v41 = vpop.f32.mrf.mxu1 }
  0xe3   : > { %1235 = vtanh.f32 %v543_v40 }
  0xe4   : > { %1237 = vtanh.f32 %v671_v41  ;;  %v1113_v42 = vpop.f32.mrf.mxu0  ;;  %v1145_v43 = vpop.f32.mrf.mxu1 }
  0xe5   : > { %1239 = vtanh.f32 %v1113_v42 }
  0xe6   : > { %1241 = vtanh.f32 %v1145_v43  ;;  %v546_v44 = vpop.f32.mrf.mxu0  ;;  %v674_v45 = vpop.f32.mrf.mxu1 }
  0xe7   : > { %1243 = vtanh.f32 %v546_v44 }
  0xe8   : > { %1245 = vtanh.f32 %v674_v45  ;;  %v1116_v46 = vpop.f32.mrf.mxu0  ;;  %v1148_v47 = vpop.f32.mrf.mxu1 }
  0xe9   : > { %1247 = vtanh.f32 %v1116_v46 }
  0xea   : > { %1249 = vtanh.f32 %v1148_v47  ;;  %v559_v48 = vpop.f32.mrf.mxu0  ;;  %v687_v49 = vpop.f32.mrf.mxu1 }
  0xeb   : > { %1251 = vtanh.f32 %v559_v48 }
  0xec   : > { %1253 = vtanh.f32 %v687_v49  ;;  %v1117_v50 = vpop.f32.mrf.mxu0  ;;  %v1149_v51 = vpop.f32.mrf.mxu1 }
  0xed   : > { %1255 = vtanh.f32 %v1117_v50 }
  0xee   : > { %v1232_v52 = vpop.eup %1231  ;;  %1257 = vtanh.f32 %v1149_v51  ;;  %v562_v53 = vpop.f32.mrf.mxu0 }
  0xef   : > { %v690_v54 = vpop.f32.mrf.mxu1  ;;  %v1234_v55 = vpop.eup %1233  ;;  %865 = vst.msk [vmem:[%s1481_s29 + $0x10] sm:$0xff] %vm862_vm2, %v1232_v52  ;;  %1259 = vtanh.f32 %v562_v53 }
  0xf0   : > { %v1236_v56 = vpop.eup %1235  ;;  %897 = vst.msk [vmem:[%s1481_s29 + $0x110] sm:$0xff] %vm862_vm2, %v1234_v55  ;;  %1261 = vtanh.f32 %v690_v54  ;;  %v1120_v57 = vpop.f32.mrf.mxu0 }
  0xf1   : > { %v1152_v58 = vpop.f32.mrf.mxu1  ;;  %v1238_v59 = vpop.eup %1237  ;;  %863 = vst.msk [vmem:[%s1481_s29] sm:$0xff] %vm862_vm2, %v1236_v56  ;;  %1263 = vtanh.f32 %v1120_v57 }
  0xf2   : > { %v1240_v60 = vpop.eup %1239  ;;  %895 = vst.msk [vmem:[%s1481_s29 + $0x100] sm:$0xff] %vm862_vm2, %v1238_v59  ;;  %1265 = vtanh.f32 %v1152_v58  ;;  %v575_v61 = vpop.f32.mrf.mxu0 }
  0xf3   : > { %v703_v62 = vpop.f32.mrf.mxu1  ;;  %v1242_v63 = vpop.eup %1241  ;;  %866 = vst.msk [vmem:[%s1481_s29 + $0x18] sm:$0xff] %vm862_vm2, %v1240_v60  ;;  %1267 = vtanh.f32 %v575_v61 }
  0xf4   : > { %v1244_v0 = vpop.eup %1243  ;;  %898 = vst.msk [vmem:[%s1481_s29 + $0x118] sm:$0xff] %vm862_vm2, %v1242_v63  ;;  %1269 = vtanh.f32 %v703_v62  ;;  %v1121_v1 = vpop.f32.mrf.mxu0 }
  0xf5   : > { %v1153_v2 = vpop.f32.mrf.mxu1  ;;  %v1246_v3 = vpop.eup %1245  ;;  %864 = vst.msk [vmem:[%s1481_s29 + $0x8] sm:$0xff] %vm862_vm2, %v1244_v0  ;;  %1271 = vtanh.f32 %v1121_v1 }
  0xf6   : > { %v1248_v4 = vpop.eup %1247  ;;  %896 = vst.msk [vmem:[%s1481_s29 + $0x108] sm:$0xff] %vm862_vm2, %v1246_v3  ;;  %1273 = vtanh.f32 %v1153_v2  ;;  %v578_v5 = vpop.f32.mrf.mxu0 }
  0xf7   : > { %v706_v6 = vpop.f32.mrf.mxu1  ;;  %v1250_v7 = vpop.eup %1249  ;;  %869 = vst.msk [vmem:[%s1481_s29 + $0x30] sm:$0xff] %vm862_vm2, %v1248_v4  ;;  %1275 = vtanh.f32 %v578_v5 }
  0xf8   : > { %v1252_v8 = vpop.eup %1251  ;;  %901 = vst.msk [vmem:[%s1481_s29 + $0x130] sm:$0xff] %vm862_vm2, %v1250_v7  ;;  %1277 = vtanh.f32 %v706_v6  ;;  %v1124_v9 = vpop.f32.mrf.mxu0 }
  0xf9   : > { %v1156_v10 = vpop.f32.mrf.mxu1  ;;  %v1254_v11 = vpop.eup %1253  ;;  %867 = vst.msk [vmem:[%s1481_s29 + $0x20] sm:$0xff] %vm862_vm2, %v1252_v8  ;;  %1279 = vtanh.f32 %v1124_v9 }
  0xfa   : > { %v1256_v12 = vpop.eup %1255  ;;  %899 = vst.msk [vmem:[%s1481_s29 + $0x120] sm:$0xff] %vm862_vm2, %v1254_v11  ;;  %1281 = vtanh.f32 %v1156_v10  ;;  %v591_v13 = vpop.f32.mrf.mxu0 }
  0xfb   : > { %v719_v14 = vpop.f32.mrf.mxu1  ;;  %v1258_v15 = vpop.eup %1257  ;;  %870 = vst.msk [vmem:[%s1481_s29 + $0x38] sm:$0xff] %vm862_vm2, %v1256_v12  ;;  %1283 = vtanh.f32 %v591_v13 }
  0xfc   : > { %v1260_v16 = vpop.eup %1259  ;;  %902 = vst.msk [vmem:[%s1481_s29 + $0x138] sm:$0xff] %vm862_vm2, %v1258_v15  ;;  %1285 = vtanh.f32 %v719_v14  ;;  %v1125_v17 = vpop.f32.mrf.mxu0 }
  0xfd   : > { %v1157_v18 = vpop.f32.mrf.mxu1  ;;  %v1262_v19 = vpop.eup %1261  ;;  %868 = vst.msk [vmem:[%s1481_s29 + $0x28] sm:$0xff] %vm862_vm2, %v1260_v16  ;;  %1287 = vtanh.f32 %v1125_v17 }
  0xfe   : > { %v1264_v20 = vpop.eup %1263  ;;  %900 = vst.msk [vmem:[%s1481_s29 + $0x128] sm:$0xff] %vm862_vm2, %v1262_v19  ;;  %1289 = vtanh.f32 %v1157_v18  ;;  %v594_v21 = vpop.f32.mrf.mxu0 }
  0xff   : > { %v722_v22 = vpop.f32.mrf.mxu1  ;;  %v1266_v23 = vpop.eup %1265  ;;  %873 = vst.msk [vmem:[%s1481_s29 + $0x50] sm:$0xff] %vm862_vm2, %v1264_v20  ;;  %1291 = vtanh.f32 %v594_v21 }
 0x100   : > { %v1268_v24 = vpop.eup %1267  ;;  %905 = vst.msk [vmem:[%s1481_s29 + $0x150] sm:$0xff] %vm862_vm2, %v1266_v23  ;;  %1293 = vtanh.f32 %v722_v22  ;;  %v1128_v25 = vpop.f32.mrf.mxu0 }
 0x101   : > { %v1160_v26 = vpop.f32.mrf.mxu1  ;;  %v1270_v27 = vpop.eup %1269  ;;  %871 = vst.msk [vmem:[%s1481_s29 + $0x40] sm:$0xff] %vm862_vm2, %v1268_v24  ;;  %1295 = vtanh.f32 %v1128_v25 }
 0x102   : > { %v1272_v28 = vpop.eup %1271  ;;  %903 = vst.msk [vmem:[%s1481_s29 + $0x140] sm:$0xff] %vm862_vm2, %v1270_v27  ;;  %1297 = vtanh.f32 %v1160_v26  ;;  %v607_v29 = vpop.f32.mrf.mxu0 }
 0x103   : > { %v735_v30 = vpop.f32.mrf.mxu1  ;;  %v1274_v31 = vpop.eup %1273  ;;  %874 = vst.msk [vmem:[%s1481_s29 + $0x58] sm:$0xff] %vm862_vm2, %v1272_v28  ;;  %1299 = vtanh.f32 %v607_v29 }
 0x104   : > { %v1276_v32 = vpop.eup %1275  ;;  %906 = vst.msk [vmem:[%s1481_s29 + $0x158] sm:$0xff] %vm862_vm2, %v1274_v31  ;;  %1301 = vtanh.f32 %v735_v30  ;;  %v1129_v33 = vpop.f32.mrf.mxu0 }
 0x105   : > { %v1161_v34 = vpop.f32.mrf.mxu1  ;;  %v1278_v35 = vpop.eup %1277  ;;  %872 = vst.msk [vmem:[%s1481_s29 + $0x48] sm:$0xff] %vm862_vm2, %v1276_v32  ;;  %1303 = vtanh.f32 %v1129_v33 }
 0x106   : > { %v1280_v36 = vpop.eup %1279  ;;  %904 = vst.msk [vmem:[%s1481_s29 + $0x148] sm:$0xff] %vm862_vm2, %v1278_v35  ;;  %1305 = vtanh.f32 %v1161_v34  ;;  %v610_v37 = vpop.f32.mrf.mxu0 }
 0x107   : > { %v738_v38 = vpop.f32.mrf.mxu1  ;;  %v1282_v39 = vpop.eup %1281  ;;  %877 = vst.msk [vmem:[%s1481_s29 + $0x70] sm:$0xff] %vm862_vm2, %v1280_v36  ;;  %1307 = vtanh.f32 %v610_v37 }
 0x108   : > { %v1284_v40 = vpop.eup %1283  ;;  %909 = vst.msk [vmem:[%s1481_s29 + $0x170] sm:$0xff] %vm862_vm2, %v1282_v39  ;;  %1309 = vtanh.f32 %v738_v38  ;;  %v1132_v41 = vpop.f32.mrf.mxu0 }
 0x109   : > { %v1164_v42 = vpop.f32.mrf.mxu1  ;;  %v1286_v43 = vpop.eup %1285  ;;  %875 = vst.msk [vmem:[%s1481_s29 + $0x60] sm:$0xff] %vm862_vm2, %v1284_v40  ;;  %1311 = vtanh.f32 %v1132_v41 }
 0x10a   : > { %v1288_v44 = vpop.eup %1287  ;;  %907 = vst.msk [vmem:[%s1481_s29 + $0x160] sm:$0xff] %vm862_vm2, %v1286_v43  ;;  %1313 = vtanh.f32 %v1164_v42  ;;  %v623_v45 = vpop.f32.mrf.mxu0 }
 0x10b   : > { %v751_v46 = vpop.f32.mrf.mxu1  ;;  %v1290_v47 = vpop.eup %1289  ;;  %878 = vst.msk [vmem:[%s1481_s29 + $0x78] sm:$0xff] %vm862_vm2, %v1288_v44  ;;  %1315 = vtanh.f32 %v623_v45 }
 0x10c   : > { %v1292_v48 = vpop.eup %1291  ;;  %910 = vst.msk [vmem:[%s1481_s29 + $0x178] sm:$0xff] %vm862_vm2, %v1290_v47  ;;  %1317 = vtanh.f32 %v751_v46  ;;  %v1133_v49 = vpop.f32.mrf.mxu0 }
 0x10d   : > { %v1165_v50 = vpop.f32.mrf.mxu1  ;;  %v1294_v51 = vpop.eup %1293  ;;  %876 = vst.msk [vmem:[%s1481_s29 + $0x68] sm:$0xff] %vm862_vm2, %v1292_v48  ;;  %1319 = vtanh.f32 %v1133_v49 }
 0x10e   : > { %v1296_v52 = vpop.eup %1295  ;;  %908 = vst.msk [vmem:[%s1481_s29 + $0x168] sm:$0xff] %vm862_vm2, %v1294_v51  ;;  %1321 = vtanh.f32 %v1165_v50  ;;  %v626_v53 = vpop.f32.mrf.mxu0 }
 0x10f   : > { %v754_v54 = vpop.f32.mrf.mxu1  ;;  %v1298_v55 = vpop.eup %1297  ;;  %881 = vst.msk [vmem:[%s1481_s29 + $0x90] sm:$0xff] %vm862_vm2, %v1296_v52  ;;  %1323 = vtanh.f32 %v626_v53 }
 0x110   : > { %v1300_v56 = vpop.eup %1299  ;;  %913 = vst.msk [vmem:[%s1481_s29 + $0x190] sm:$0xff] %vm862_vm2, %v1298_v55  ;;  %1325 = vtanh.f32 %v754_v54  ;;  %v1136_v57 = vpop.f32.mrf.mxu0 }
 0x111   : > { %v1168_v58 = vpop.f32.mrf.mxu1  ;;  %v1302_v59 = vpop.eup %1301  ;;  %879 = vst.msk [vmem:[%s1481_s29 + $0x80] sm:$0xff] %vm862_vm2, %v1300_v56  ;;  %1327 = vtanh.f32 %v1136_v57 }
 0x112   : > { %v1304_v60 = vpop.eup %1303  ;;  %911 = vst.msk [vmem:[%s1481_s29 + $0x180] sm:$0xff] %vm862_vm2, %v1302_v59  ;;  %1329 = vtanh.f32 %v1168_v58  ;;  %v639_v61 = vpop.f32.mrf.mxu0 }
 0x113   : > { %v767_v62 = vpop.f32.mrf.mxu1  ;;  %v1306_v63 = vpop.eup %1305  ;;  %882 = vst.msk [vmem:[%s1481_s29 + $0x98] sm:$0xff] %vm862_vm2, %v1304_v60  ;;  %1331 = vtanh.f32 %v639_v61 }
 0x114   : > { %v1308_v0 = vpop.eup %1307  ;;  %914 = vst.msk [vmem:[%s1481_s29 + $0x198] sm:$0xff] %vm862_vm2, %v1306_v63  ;;  %1333 = vtanh.f32 %v767_v62  ;;  %v1137_v1 = vpop.f32.mrf.mxu0 }
 0x115   : > { %v1169_v2 = vpop.f32.mrf.mxu1  ;;  %v1310_v3 = vpop.eup %1309  ;;  %880 = vst.msk [vmem:[%s1481_s29 + $0x88] sm:$0xff] %vm862_vm2, %v1308_v0  ;;  %1335 = vtanh.f32 %v1137_v1 }
 0x116   : > { %v1312_v4 = vpop.eup %1311  ;;  %912 = vst.msk [vmem:[%s1481_s29 + $0x188] sm:$0xff] %vm862_vm2, %v1310_v3  ;;  %1337 = vtanh.f32 %v1169_v2  ;;  %v642_v5 = vpop.f32.mrf.mxu0 }
 0x117   : > { %v770_v6 = vpop.f32.mrf.mxu1  ;;  %v1314_v7 = vpop.eup %1313  ;;  %885 = vst.msk [vmem:[%s1481_s29 + $0xb0] sm:$0xff] %vm862_vm2, %v1312_v4  ;;  %1339 = vtanh.f32 %v642_v5 }
 0x118   : > { %v1316_v8 = vpop.eup %1315  ;;  %917 = vst.msk [vmem:[%s1481_s29 + $0x1b0] sm:$0xff] %vm862_vm2, %v1314_v7  ;;  %1341 = vtanh.f32 %v770_v6  ;;  %v1140_v9 = vpop.f32.mrf.mxu0 }
 0x119   : > { %v1172_v10 = vpop.f32.mrf.mxu1  ;;  %v1318_v11 = vpop.eup %1317  ;;  %883 = vst.msk [vmem:[%s1481_s29 + $0xa0] sm:$0xff] %vm862_vm2, %v1316_v8  ;;  %1343 = vtanh.f32 %v1140_v9 }
 0x11a   : > { %v1320_v12 = vpop.eup %1319  ;;  %915 = vst.msk [vmem:[%s1481_s29 + $0x1a0] sm:$0xff] %vm862_vm2, %v1318_v11  ;;  %1345 = vtanh.f32 %v1172_v10  ;;  %v655_v13 = vpop.f32.mrf.mxu0 }
 0x11b   : > { %v783_v14 = vpop.f32.mrf.mxu1  ;;  %v1322_v15 = vpop.eup %1321  ;;  %886 = vst.msk [vmem:[%s1481_s29 + $0xb8] sm:$0xff] %vm862_vm2, %v1320_v12  ;;  %1347 = vtanh.f32 %v655_v13 }
 0x11c   : > { %v1324_v16 = vpop.eup %1323  ;;  %918 = vst.msk [vmem:[%s1481_s29 + $0x1b8] sm:$0xff] %vm862_vm2, %v1322_v15  ;;  %1349 = vtanh.f32 %v783_v14  ;;  %v1141_v17 = vpop.f32.mrf.mxu0 }
 0x11d   : > { %v1173_v18 = vpop.f32.mrf.mxu1  ;;  %v1326_v19 = vpop.eup %1325  ;;  %884 = vst.msk [vmem:[%s1481_s29 + $0xa8] sm:$0xff] %vm862_vm2, %v1324_v16  ;;  %1351 = vtanh.f32 %v1141_v17 }
 0x11e   : > { %v1328_v20 = vpop.eup %1327  ;;  %916 = vst.msk [vmem:[%s1481_s29 + $0x1a8] sm:$0xff] %vm862_vm2, %v1326_v19  ;;  %1353 = vtanh.f32 %v1173_v18  ;;  %v658_v21 = vpop.f32.mrf.mxu0 }
 0x11f   : > { %v786_v22 = vpop.f32.mrf.mxu1  ;;  %v1330_v23 = vpop.eup %1329  ;;  %889 = vst.msk [vmem:[%s1481_s29 + $0xd0] sm:$0xff] %vm862_vm2, %v1328_v20  ;;  %1355 = vtanh.f32 %v658_v21 }
 0x120   : > { %v1332_v24 = vpop.eup %1331  ;;  %921 = vst.msk [vmem:[%s1481_s29 + $0x1d0] sm:$0xff] %vm862_vm2, %v1330_v23  ;;  %1357 = vtanh.f32 %v786_v22 }
 0x121   : > { %v1334_v25 = vpop.eup %1333  ;;  %887 = vst.msk [vmem:[%s1481_s29 + $0xc0] sm:$0xff] %vm862_vm2, %v1332_v24 }
 0x122   : > { %v1336_v26 = vpop.eup %1335  ;;  %919 = vst.msk [vmem:[%s1481_s29 + $0x1c0] sm:$0xff] %vm862_vm2, %v1334_v25 }
 0x123   : > { %v1338_v27 = vpop.eup %1337  ;;  %890 = vst.msk [vmem:[%s1481_s29 + $0xd8] sm:$0xff] %vm862_vm2, %v1336_v26 }
 0x124   : > { %v1340_v28 = vpop.eup %1339  ;;  %922 = vst.msk [vmem:[%s1481_s29 + $0x1d8] sm:$0xff] %vm862_vm2, %v1338_v27 }
 0x125   : > { %v1342_v29 = vpop.eup %1341  ;;  %888 = vst.msk [vmem:[%s1481_s29 + $0xc8] sm:$0xff] %vm862_vm2, %v1340_v28 }
 0x126   : > { %v1344_v30 = vpop.eup %1343  ;;  %920 = vst.msk [vmem:[%s1481_s29 + $0x1c8] sm:$0xff] %vm862_vm2, %v1342_v29 }
 0x127   : > { %v1346_v31 = vpop.eup %1345  ;;  %893 = vst.msk [vmem:[%s1481_s29 + $0xf0] sm:$0xff] %vm862_vm2, %v1344_v30 }
 0x128   : > { %v1348_v32 = vpop.eup %1347  ;;  %925 = vst.msk [vmem:[%s1481_s29 + $0x1f0] sm:$0xff] %vm862_vm2, %v1346_v31 }
 0x129   : > { %v1350_v33 = vpop.eup %1349  ;;  %891 = vst.msk [vmem:[%s1481_s29 + $0xe0] sm:$0xff] %vm862_vm2, %v1348_v32 }
 0x12a   : > { %v1352_v34 = vpop.eup %1351  ;;  %923 = vst.msk [vmem:[%s1481_s29 + $0x1e0] sm:$0xff] %vm862_vm2, %v1350_v33 }
 0x12b   : > { %v1354_v35 = vpop.eup %1353  ;;  %894 = vst.msk [vmem:[%s1481_s29 + $0xf8] sm:$0xff] %vm862_vm2, %v1352_v34 }
 0x12c   : > { %v1356_v36 = vpop.eup %1355  ;;  %926 = vst.msk [vmem:[%s1481_s29 + $0x1f8] sm:$0xff] %vm862_vm2, %v1354_v35 }
 0x12d   : > { %v1358_v37 = vpop.eup %1357  ;;  %892 = vst.msk [vmem:[%s1481_s29 + $0xe8] sm:$0xff] %vm862_vm2, %v1356_v36 }
 0x12e   : > { %924 = vst.msk [vmem:[%s1481_s29 + $0x1e8] sm:$0xff] %vm862_vm2, %v1358_v37 }
 0x12f PF: > { %s12_s9 = sadd.s32 1, %s1365_s9  }
 0x130   : > { %p9_p4 = scmp.ge.s32.totalorder %s12_s9, 6  }
 0x132   :  { %11 = sbr.rel (!%p9_p4) target bundleno = 1 (0x1), region = 58 }

</bundles_post_ra>
